<compile_context>
chip_gen: v5e
topology: v5e:2x2
jax: 0.10.0
libtpu: 0.0.40
codegen_flags: <defaults>
</compile_context>

<pallas_src>
import math
import numpy as np
import jax
import jax.numpy as jnp
from jax import lax
from jax.experimental import pallas as pl
from jax.experimental.pallas import tpu as pltpu

SHIFT_SIZE = 5
PAD = SHIFT_SIZE // 2            # = 2
_INV_SQRT2 = 0.7071067811865476


def _gelu_exact(x):
    # nn.GELU(approximate='none'): 0.5*x*(1+erf(x/sqrt(2))).
    # erf via Abramowitz & Stegun 7.1.26 (|err| <= 1.5e-7).  exp and the approximate
    # reciprocal run on the EUP slot, keeping the VALU free for the conv MACs.
    a1, a2, a3, a4, a5 = (0.254829592, -0.284496736, 1.421413741,
                          -1.453152027, 1.061405429)
    p = 0.3275911
    u = x * _INV_SQRT2
    au = jnp.abs(u)
    t = pl.reciprocal(1.0 + p * au, approx=True)
    poly = ((((a5 * t + a4) * t + a3) * t + a2) * t + a1) * t
    erf_abs = 1.0 - poly * jnp.exp(-au * au)
    erf = jnp.where(u >= 0.0, erf_abs, -erf_abs)
    return 0.5 * x * (1.0 + erf)


def msf_kernel(xp_ref, dww_ref, dwb_ref, w2_ref, b2_ref, o_ref, ypad_ref):
    # xp_ref  : (Dp, Hp, Wp, C) bf16  H-shifted input for batch b, +1 conv halo
    # dww_ref : (27, C) f32           depthwise taps, row = kd*9 + kh*3 + kw
    # dwb_ref : (1, C)  f32
    # w2_ref  : (C, Cout) bf16        fc2 (1x1x1 conv) weight
    # b2_ref  : (1, Cout) f32
    # o_ref   : (Cout, 1, H, W) f32   NCDHW output slab for grid point (b, d)
    # ypad_ref: (H, W + 2*PAD, C) bf16 scratch; group g's data lives at cols [g, g+W)
    d = pl.program_id(1)
    Dp, Hp, Wp, C = xp_ref.shape
    H, W = Hp - 2, Wp - 2
    Cg = C // SHIFT_SIZE

    # Halo columns of the scratch are zeroed once per batch and never written after,
    # which is exactly the zero fill of the grouped W-shift.
    @pl.when(d == 0)
    def _():
        ypad_ref[...] = jnp.zeros_like(ypad_ref)

    # ---- stage 1: depthwise 3x3x3 conv (bias-seeded f32 accumulator) + exact GELU ---
    acc = jnp.broadcast_to(dwb_ref[0, :], (H, W, C))
    for kd in range(3):
        plane = xp_ref[d + kd].astype(jnp.float32)            # (Hp, Wp, C)
        for kh in range(3):
            rows = plane[kh:kh + H]                            # (H, Wp, C)
            # TODO(synk): the kw taps could use pltpu.roll (XLU) instead of value
            # slices; kept as slices for lowering robustness.
            for kw in range(3):
                acc = acc + dww_ref[kd * 9 + kh * 3 + kw, :] * rows[:, kw:kw + W, :]
    y = _gelu_exact(acc).astype(jnp.bfloat16)                  # (H, W, C)
    # TODO(synk): nn.Dropout(p=0.05) is stochastic in training; inference identity here.

    # ---- stage 2: fold the grouped W-shift into the store offset (group g -> col g) --
    for g in range(SHIFT_SIZE):
        ypad_ref[:, g:g + W, g * Cg:(g + 1) * Cg] = y[:, :, g * Cg:(g + 1) * Cg]

    # ---- stage 3: fc2 as ONE K=C matmul on the shifted activations (bf16 MXU, f32 acc)
    yshift = ypad_ref[:, PAD:PAD + W, :].reshape(H * W, C)     # contiguous, W % 8 == 0
    p = jnp.dot(yshift, w2_ref[...], preferred_element_type=jnp.float32)  # (HW, Cout)
    p = p + b2_ref[...]                                        # bias added at writeback

    # ---- stage 4: channel-major writeback; small per-row XLU transposes hide under
    #      the VALU-bound conv of the next grid step.  Output is NCDHW directly.
    for h in range(H):
        o_ref[:, 0, h, :] = p[h * W:(h + 1) * W, :].T


def msf_forward(x, params):
    """x: (B, C, D, H, W) float32 (NCDHW). Returns (B, Cout, D, H, W) float32."""
    B, C, D, H, W = x.shape
    assert C % SHIFT_SIZE == 0, "implementation assumes C divisible by shift_size"
    Cg = C // SHIFT_SIZE
    dw_w, dw_b, fc2_w, fc2_b = params
    Cout = fc2_w.shape[0]

    # --- glue: NCDHW -> NDHWC in bf16, grouped H-shift (zero fill), +1 conv halo ---
    # TODO(synk): the H-shift could be folded into per-group in-kernel read offsets
    # (needs boundary-row masking for the conv halo); kept in XLA for simplicity.
    xt = jnp.transpose(x.astype(jnp.bfloat16), (0, 2, 3, 4, 1))        # (B, D, H, W, C)
    xh = jnp.pad(xt, ((0, 0), (0, 0), (PAD, PAD), (0, 0), (0, 0)))
    parts = [xh[:, :, 2 * PAD - g:2 * PAD - g + H, :, g * Cg:(g + 1) * Cg]
             for g in range(SHIFT_SIZE)]
    x_s = jnp.concatenate(parts, axis=-1)                              # (B, D, H, W, C)
    xp = jnp.pad(x_s, ((0, 0), (1, 1), (1, 1), (1, 1), (0, 0)))        # conv halo

    # --- parameter re-layout ---
    dww = jnp.transpose(dw_w[:, 0], (1, 2, 3, 0)).reshape(27, C).astype(jnp.float32)
    dwb = dw_b.reshape(1, C).astype(jnp.float32)
    w2 = jnp.transpose(fc2_w[:, :, 0, 0, 0], (1, 0)).astype(jnp.bfloat16)   # (C, Cout)
    b2 = fc2_b.reshape(1, Cout).astype(jnp.float32)

    Dp, Hp, Wp = D + 2, H + 2, W + 2

    # VMEM budget: double-buffered bf16 input block + f32 output slab + weights
    # + the per-slab W-shift scratch.  Cap well below v7x's 64 MiB per-TC VMEM.
    in_block = Dp * Hp * Wp * C * 2
    out_block = Cout * H * W * 4
    weights = (27 * C + C) * 4 + C * Cout * 2 + Cout * 4
    scratch = H * (W + 2 * PAD) * C * 2
    need = 2 * in_block + 2 * out_block + 2 * weights + scratch
    vmem_limit = int(min(48 << 20, max(32 << 20, 2 * need)))

    out = pl.pallas_call(
        msf_kernel,
        out_shape=jax.ShapeDtypeStruct((B, Cout, D, H, W), jnp.float32),
        grid_spec=pltpu.PrefetchScalarGridSpec(
            num_scalar_prefetch=0,
            grid=(B, D),
            in_specs=[
                pl.BlockSpec((None, Dp, Hp, Wp, C), lambda b, d: (b, 0, 0, 0, 0)),
                pl.BlockSpec((27, C), lambda b, d: (0, 0)),
                pl.BlockSpec((1, C), lambda b, d: (0, 0)),
                pl.BlockSpec((C, Cout), lambda b, d: (0, 0)),
                pl.BlockSpec((1, Cout), lambda b, d: (0, 0)),
            ],
            out_specs=pl.BlockSpec((None, Cout, 1, H, W),
                                   lambda b, d: (b, 0, d, 0, 0)),
            scratch_shapes=[pltpu.VMEM((H, W + 2 * PAD, C), jnp.bfloat16)],
        ),
        compiler_params=pltpu.CompilerParams(
            dimension_semantics=("parallel", "arbitrary"),
            vmem_limit_bytes=vmem_limit),
    )(xp, dww, dwb, w2, b2)
    return out


# ---------------- pure-JAX reference (mirrors the torch code, f32) ----------------
def msf_reference(x, params):
    dw_w, dw_b, fc2_w, fc2_b = params
    B, C, D, H, W = x.shape

    def grouped_shift(t, axis):
        tn = jnp.pad(t, ((0, 0), (0, 0), (0, 0), (PAD, PAD), (PAD, PAD)))
        chunks = jnp.split(tn, SHIFT_SIZE, axis=1)
        shifted = [jnp.roll(c, s, axis=axis)
                   for c, s in zip(chunks, range(-PAD, PAD + 1))]
        cat = jnp.concatenate(shifted, axis=1)
        cat = lax.slice_in_dim(cat, PAD, PAD + H, axis=3)
        cat = lax.slice_in_dim(cat, PAD, PAD + W, axis=4)
        return cat

    x_s = grouped_shift(x, 3)
    y = lax.conv_general_dilated(
        x_s, dw_w, window_strides=(1, 1, 1),
        padding=((1, 1), (1, 1), (1, 1)),
        dimension_numbers=('NCDHW', 'OIDHW', 'NCDHW'),
        feature_group_count=C, precision=lax.Precision.HIGHEST)
    y = y + dw_b.reshape(1, C, 1, 1, 1)
    y = jax.nn.gelu(y, approximate=False)
    y_s = grouped_shift(y, 4)
    out = lax.conv_general_dilated(
        y_s, fc2_w, window_strides=(1, 1, 1),
        padding=((0, 0), (0, 0), (0, 0)),
        dimension_numbers=('NCDHW', 'OIDHW', 'NCDHW'),
        precision=lax.Precision.HIGHEST)
    out = out + fc2_b.reshape(1, -1, 1, 1, 1)
    return out


if __name__ == "__main__":
    # small shapes consistent with the module (channels divisible by shift_size=5)
    B, C, D, H, W = 2, 10, 4, 8, 8
    key = jax.random.PRNGKey(0)
    kx, kw1, kw2 = jax.random.split(key, 3)

    x = jax.random.normal(kx, (B, C, D, H, W), jnp.float32)

    # deterministic init following MSF._init_weights for Conv3d:
    #   weight ~ N(0, sqrt(2/fan_out)), fan_out = k0*k1*out_ch // groups, bias = 0
    fan_out_dw = 3 * 3 * C // C      # = 9
    dw_w = jax.random.normal(kw1, (C, 1, 3, 3, 3), jnp.float32) * math.sqrt(2.0 / fan_out_dw)
    dw_b = jnp.zeros((C,), jnp.float32)
    fan_out_fc2 = 1 * 1 * C // 1     # = C
    fc2_w = jax.random.normal(kw2, (C, C, 1, 1, 1), jnp.float32) * math.sqrt(2.0 / fan_out_fc2)
    fc2_b = jnp.zeros((C,), jnp.float32)
    params = (dw_w, dw_b, fc2_w, fc2_b)

    out = jax.block_until_ready(jax.jit(msf_forward)(x, params))
    assert out.shape == (B, C, D, H, W)

    ref = jax.block_until_ready(jax.jit(msf_reference)(x, params))
    out_np, ref_np = np.asarray(out), np.asarray(ref)

    # input and fc2 operands run in bf16 (f32 MXU/VALU accumulation), so validate with
    # a global relative-L2 bound plus a loose element-wise guard that still catches any
    # structural / shift / layout bug (those produce O(1) errors).
    rel_l2 = float(np.linalg.norm(out_np - ref_np) / np.linalg.norm(ref_np))
    assert rel_l2 < 3e-2, f"relative L2 error too large: {rel_l2}"
    np.testing.assert_allclose(out_np, ref_np, rtol=2e-1, atol=2e-1)

    print("KERNEL_OK")
</pallas_src>

<mosaic_0001>
module attributes {stable_mosaic.version = 11 : i64} {
  func.func @msf_kernel(%arg0: i32, %arg1: i32, %arg2: memref<1x6x10x10x10xbf16, #tpu.memory_space<vmem>>, %arg3: memref<27x10xf32, #tpu.memory_space<vmem>>, %arg4: memref<1x10xf32, #tpu.memory_space<vmem>>, %arg5: memref<10x10xbf16, #tpu.memory_space<vmem>>, %arg6: memref<1x10xf32, #tpu.memory_space<vmem>>, %arg7: memref<1x10x1x8x8xf32, #tpu.memory_space<vmem>>, %arg8: memref<8x12x10xbf16, #tpu.memory_space<vmem>>) attributes {dimension_semantics = [#tpu.dimension_semantics<parallel>, #tpu.dimension_semantics<arbitrary>], iteration_bounds = array<i64: 2, 4>, scalar_prefetch = 0 : i64, scratch_operands = 1 : i64, tpu.core_type = #tpu.core_type<tc>, window_params = [{transform_indices = @transform_0, window_bounds = array<i64: 1, 6, 10, 10, 10>}, {pipeline_mode = #tpu.pipeline_mode<synchronous>, transform_indices = @transform_1, window_bounds = array<i64: 27, 10>}, {pipeline_mode = #tpu.pipeline_mode<synchronous>, transform_indices = @transform_2, window_bounds = array<i64: 1, 10>}, {pipeline_mode = #tpu.pipeline_mode<synchronous>, transform_indices = @transform_3, window_bounds = array<i64: 10, 10>}, {pipeline_mode = #tpu.pipeline_mode<synchronous>, transform_indices = @transform_4, window_bounds = array<i64: 1, 10>}, {transform_indices = @transform_5, window_bounds = array<i64: 1, 10, 1, 8, 8>}]} {
    %c0_i32 = arith.constant 0 : i32
    %0 = arith.cmpi eq, %arg1, %c0_i32 : i32
    %1 = arith.extui %0 : i1 to i32
    %c0_i32_0 = arith.constant 0 : i32
    %2 = arith.cmpi ne, %1, %c0_i32_0 : i32
    scf.if %2 {
      %cst_119 = arith.constant 0.000000e+00 : bf16
      %317 = vector.broadcast %cst_119 : bf16 to vector<8x12x10xbf16>
      %c0_120 = arith.constant 0 : index
      %c0_121 = arith.constant 0 : index
      %c0_122 = arith.constant 0 : index
      %318 = vector.load %arg8[%c0_120, %c0_121, %c0_122] : memref<8x12x10xbf16, #tpu.memory_space<vmem>>, vector<8x12x10xbf16>
      tpu.vector_store %arg8[%c0_120, %c0_121, %c0_122], %317 {strides = array<i32>} : memref<8x12x10xbf16, #tpu.memory_space<vmem>>, vector<8x12x10xbf16>,
    } else {
    }
    %c0 = arith.constant 0 : index
    %c0_1 = arith.constant 0 : index
    %3 = vector.load %arg4[%c0, %c0_1] : memref<1x10xf32, #tpu.memory_space<vmem>>, vector<1x10xf32>
    %4 = vector.shape_cast %3 : vector<1x10xf32> to vector<10xf32>
    %5 = vector.shape_cast %4 : vector<10xf32> to vector<1x1x10xf32>
    %6 = vector.broadcast %5 : vector<1x1x10xf32> to vector<8x8x10xf32>
    %c0_i32_2 = arith.constant 0 : i32
    %7 = arith.addi %arg1, %c0_i32_2 : i32
    %c0_3 = arith.constant 0 : index
    %8 = arith.index_cast %7 : i32 to index
    %c0_4 = arith.constant 0 : index
    %c0_5 = arith.constant 0 : index
    %c0_6 = arith.constant 0 : index
    %9 = vector.load %arg2[%c0_3, %8, %c0_4, %c0_5, %c0_6] : memref<1x6x10x10x10xbf16, #tpu.memory_space<vmem>>, vector<1x1x10x10x10xbf16>
    %10 = vector.shape_cast %9 : vector<1x1x10x10x10xbf16> to vector<10x10x10xbf16>
    %11 = arith.extf %10 : vector<10x10x10xbf16> to vector<10x10x10xf32>
    %12 = vector.extract_strided_slice %11 {offsets = [0, 0, 0], sizes = [8, 10, 10], strides = [1, 1, 1]} : vector<10x10x10xf32> to vector<8x10x10xf32>
    %c0_7 = arith.constant 0 : index
    %c0_8 = arith.constant 0 : index
    %13 = vector.load %arg3[%c0_7, %c0_8] : memref<27x10xf32, #tpu.memory_space<vmem>>, vector<1x10xf32>
    %14 = vector.shape_cast %13 : vector<1x10xf32> to vector<10xf32>
    %15 = vector.extract_strided_slice %12 {offsets = [0, 0, 0], sizes = [8, 8, 10], strides = [1, 1, 1]} : vector<8x10x10xf32> to vector<8x8x10xf32>
    %16 = vector.shape_cast %14 : vector<10xf32> to vector<1x1x10xf32>
    %17 = vector.broadcast %16 : vector<1x1x10xf32> to vector<8x8x10xf32>
    %18 = arith.mulf %17, %15 : vector<8x8x10xf32>
    %19 = arith.addf %6, %18 : vector<8x8x10xf32>
    %c1 = arith.constant 1 : index
    %c0_9 = arith.constant 0 : index
    %20 = vector.load %arg3[%c1, %c0_9] : memref<27x10xf32, #tpu.memory_space<vmem>>, vector<1x10xf32>
    %21 = vector.shape_cast %20 : vector<1x10xf32> to vector<10xf32>
    %22 = vector.extract_strided_slice %12 {offsets = [0, 1, 0], sizes = [8, 8, 10], strides = [1, 1, 1]} : vector<8x10x10xf32> to vector<8x8x10xf32>
    %23 = vector.shape_cast %21 : vector<10xf32> to vector<1x1x10xf32>
    %24 = vector.broadcast %23 : vector<1x1x10xf32> to vector<8x8x10xf32>
    %25 = arith.mulf %24, %22 : vector<8x8x10xf32>
    %26 = arith.addf %19, %25 : vector<8x8x10xf32>
    %c2 = arith.constant 2 : index
    %c0_10 = arith.constant 0 : index
    %27 = vector.load %arg3[%c2, %c0_10] : memref<27x10xf32, #tpu.memory_space<vmem>>, vector<1x10xf32>
    %28 = vector.shape_cast %27 : vector<1x10xf32> to vector<10xf32>
    %29 = vector.extract_strided_slice %12 {offsets = [0, 2, 0], sizes = [8, 8, 10], strides = [1, 1, 1]} : vector<8x10x10xf32> to vector<8x8x10xf32>
    %30 = vector.shape_cast %28 : vector<10xf32> to vector<1x1x10xf32>
    %31 = vector.broadcast %30 : vector<1x1x10xf32> to vector<8x8x10xf32>
    %32 = arith.mulf %31, %29 : vector<8x8x10xf32>
    %33 = arith.addf %26, %32 : vector<8x8x10xf32>
    %34 = vector.extract_strided_slice %11 {offsets = [1, 0, 0], sizes = [8, 10, 10], strides = [1, 1, 1]} : vector<10x10x10xf32> to vector<8x10x10xf32>
    %c3 = arith.constant 3 : index
    %c0_11 = arith.constant 0 : index
    %35 = vector.load %arg3[%c3, %c0_11] : memref<27x10xf32, #tpu.memory_space<vmem>>, vector<1x10xf32>
    %36 = vector.shape_cast %35 : vector<1x10xf32> to vector<10xf32>
    %37 = vector.extract_strided_slice %34 {offsets = [0, 0, 0], sizes = [8, 8, 10], strides = [1, 1, 1]} : vector<8x10x10xf32> to vector<8x8x10xf32>
    %38 = vector.shape_cast %36 : vector<10xf32> to vector<1x1x10xf32>
    %39 = vector.broadcast %38 : vector<1x1x10xf32> to vector<8x8x10xf32>
    %40 = arith.mulf %39, %37 : vector<8x8x10xf32>
    %41 = arith.addf %33, %40 : vector<8x8x10xf32>
    %c4 = arith.constant 4 : index
    %c0_12 = arith.constant 0 : index
    %42 = vector.load %arg3[%c4, %c0_12] : memref<27x10xf32, #tpu.memory_space<vmem>>, vector<1x10xf32>
    %43 = vector.shape_cast %42 : vector<1x10xf32> to vector<10xf32>
    %44 = vector.extract_strided_slice %34 {offsets = [0, 1, 0], sizes = [8, 8, 10], strides = [1, 1, 1]} : vector<8x10x10xf32> to vector<8x8x10xf32>
    %45 = vector.shape_cast %43 : vector<10xf32> to vector<1x1x10xf32>
    %46 = vector.broadcast %45 : vector<1x1x10xf32> to vector<8x8x10xf32>
    %47 = arith.mulf %46, %44 : vector<8x8x10xf32>
    %48 = arith.addf %41, %47 : vector<8x8x10xf32>
    %c5 = arith.constant 5 : index
    %c0_13 = arith.constant 0 : index
    %49 = vector.load %arg3[%c5, %c0_13] : memref<27x10xf32, #tpu.memory_space<vmem>>, vector<1x10xf32>
    %50 = vector.shape_cast %49 : vector<1x10xf32> to vector<10xf32>
    %51 = vector.extract_strided_slice %34 {offsets = [0, 2, 0], sizes = [8, 8, 10], strides = [1, 1, 1]} : vector<8x10x10xf32> to vector<8x8x10xf32>
    %52 = vector.shape_cast %50 : vector<10xf32> to vector<1x1x10xf32>
    %53 = vector.broadcast %52 : vector<1x1x10xf32> to vector<8x8x10xf32>
    %54 = arith.mulf %53, %51 : vector<8x8x10xf32>
    %55 = arith.addf %48, %54 : vector<8x8x10xf32>
    %56 = vector.extract_strided_slice %11 {offsets = [2, 0, 0], sizes = [8, 10, 10], strides = [1, 1, 1]} : vector<10x10x10xf32> to vector<8x10x10xf32>
    %c6 = arith.constant 6 : index
    %c0_14 = arith.constant 0 : index
    %57 = vector.load %arg3[%c6, %c0_14] : memref<27x10xf32, #tpu.memory_space<vmem>>, vector<1x10xf32>
    %58 = vector.shape_cast %57 : vector<1x10xf32> to vector<10xf32>
    %59 = vector.extract_strided_slice %56 {offsets = [0, 0, 0], sizes = [8, 8, 10], strides = [1, 1, 1]} : vector<8x10x10xf32> to vector<8x8x10xf32>
    %60 = vector.shape_cast %58 : vector<10xf32> to vector<1x1x10xf32>
    %61 = vector.broadcast %60 : vector<1x1x10xf32> to vector<8x8x10xf32>
    %62 = arith.mulf %61, %59 : vector<8x8x10xf32>
    %63 = arith.addf %55, %62 : vector<8x8x10xf32>
    %c7 = arith.constant 7 : index
    %c0_15 = arith.constant 0 : index
    %64 = vector.load %arg3[%c7, %c0_15] : memref<27x10xf32, #tpu.memory_space<vmem>>, vector<1x10xf32>
    %65 = vector.shape_cast %64 : vector<1x10xf32> to vector<10xf32>
    %66 = vector.extract_strided_slice %56 {offsets = [0, 1, 0], sizes = [8, 8, 10], strides = [1, 1, 1]} : vector<8x10x10xf32> to vector<8x8x10xf32>
    %67 = vector.shape_cast %65 : vector<10xf32> to vector<1x1x10xf32>
    %68 = vector.broadcast %67 : vector<1x1x10xf32> to vector<8x8x10xf32>
    %69 = arith.mulf %68, %66 : vector<8x8x10xf32>
    %70 = arith.addf %63, %69 : vector<8x8x10xf32>
    %c8 = arith.constant 8 : index
    %c0_16 = arith.constant 0 : index
    %71 = vector.load %arg3[%c8, %c0_16] : memref<27x10xf32, #tpu.memory_space<vmem>>, vector<1x10xf32>
    %72 = vector.shape_cast %71 : vector<1x10xf32> to vector<10xf32>
    %73 = vector.extract_strided_slice %56 {offsets = [0, 2, 0], sizes = [8, 8, 10], strides = [1, 1, 1]} : vector<8x10x10xf32> to vector<8x8x10xf32>
    %74 = vector.shape_cast %72 : vector<10xf32> to vector<1x1x10xf32>
    %75 = vector.broadcast %74 : vector<1x1x10xf32> to vector<8x8x10xf32>
    %76 = arith.mulf %75, %73 : vector<8x8x10xf32>
    %77 = arith.addf %70, %76 : vector<8x8x10xf32>
    %c1_i32 = arith.constant 1 : i32
    %78 = arith.addi %arg1, %c1_i32 : i32
    %c0_17 = arith.constant 0 : index
    %79 = arith.index_cast %78 : i32 to index
    %c0_18 = arith.constant 0 : index
    %c0_19 = arith.constant 0 : index
    %c0_20 = arith.constant 0 : index
    %80 = vector.load %arg2[%c0_17, %79, %c0_18, %c0_19, %c0_20] : memref<1x6x10x10x10xbf16, #tpu.memory_space<vmem>>, vector<1x1x10x10x10xbf16>
    %81 = vector.shape_cast %80 : vector<1x1x10x10x10xbf16> to vector<10x10x10xbf16>
    %82 = arith.extf %81 : vector<10x10x10xbf16> to vector<10x10x10xf32>
    %83 = vector.extract_strided_slice %82 {offsets = [0, 0, 0], sizes = [8, 10, 10], strides = [1, 1, 1]} : vector<10x10x10xf32> to vector<8x10x10xf32>
    %c9 = arith.constant 9 : index
    %c0_21 = arith.constant 0 : index
    %84 = vector.load %arg3[%c9, %c0_21] : memref<27x10xf32, #tpu.memory_space<vmem>>, vector<1x10xf32>
    %85 = vector.shape_cast %84 : vector<1x10xf32> to vector<10xf32>
    %86 = vector.extract_strided_slice %83 {offsets = [0, 0, 0], sizes = [8, 8, 10], strides = [1, 1, 1]} : vector<8x10x10xf32> to vector<8x8x10xf32>
    %87 = vector.shape_cast %85 : vector<10xf32> to vector<1x1x10xf32>
    %88 = vector.broadcast %87 : vector<1x1x10xf32> to vector<8x8x10xf32>
    %89 = arith.mulf %88, %86 : vector<8x8x10xf32>
    %90 = arith.addf %77, %89 : vector<8x8x10xf32>
    %c10 = arith.constant 10 : index
    %c0_22 = arith.constant 0 : index
    %91 = vector.load %arg3[%c10, %c0_22] : memref<27x10xf32, #tpu.memory_space<vmem>>, vector<1x10xf32>
    %92 = vector.shape_cast %91 : vector<1x10xf32> to vector<10xf32>
    %93 = vector.extract_strided_slice %83 {offsets = [0, 1, 0], sizes = [8, 8, 10], strides = [1, 1, 1]} : vector<8x10x10xf32> to vector<8x8x10xf32>
    %94 = vector.shape_cast %92 : vector<10xf32> to vector<1x1x10xf32>
    %95 = vector.broadcast %94 : vector<1x1x10xf32> to vector<8x8x10xf32>
    %96 = arith.mulf %95, %93 : vector<8x8x10xf32>
    %97 = arith.addf %90, %96 : vector<8x8x10xf32>
    %c11 = arith.constant 11 : index
    %c0_23 = arith.constant 0 : index
    %98 = vector.load %arg3[%c11, %c0_23] : memref<27x10xf32, #tpu.memory_space<vmem>>, vector<1x10xf32>
    %99 = vector.shape_cast %98 : vector<1x10xf32> to vector<10xf32>
    %100 = vector.extract_strided_slice %83 {offsets = [0, 2, 0], sizes = [8, 8, 10], strides = [1, 1, 1]} : vector<8x10x10xf32> to vector<8x8x10xf32>
    %101 = vector.shape_cast %99 : vector<10xf32> to vector<1x1x10xf32>
    %102 = vector.broadcast %101 : vector<1x1x10xf32> to vector<8x8x10xf32>
    %103 = arith.mulf %102, %100 : vector<8x8x10xf32>
    %104 = arith.addf %97, %103 : vector<8x8x10xf32>
    %105 = vector.extract_strided_slice %82 {offsets = [1, 0, 0], sizes = [8, 10, 10], strides = [1, 1, 1]} : vector<10x10x10xf32> to vector<8x10x10xf32>
    %c12 = arith.constant 12 : index
    %c0_24 = arith.constant 0 : index
    %106 = vector.load %arg3[%c12, %c0_24] : memref<27x10xf32, #tpu.memory_space<vmem>>, vector<1x10xf32>
    %107 = vector.shape_cast %106 : vector<1x10xf32> to vector<10xf32>
    %108 = vector.extract_strided_slice %105 {offsets = [0, 0, 0], sizes = [8, 8, 10], strides = [1, 1, 1]} : vector<8x10x10xf32> to vector<8x8x10xf32>
    %109 = vector.shape_cast %107 : vector<10xf32> to vector<1x1x10xf32>
    %110 = vector.broadcast %109 : vector<1x1x10xf32> to vector<8x8x10xf32>
    %111 = arith.mulf %110, %108 : vector<8x8x10xf32>
    %112 = arith.addf %104, %111 : vector<8x8x10xf32>
    %c13 = arith.constant 13 : index
    %c0_25 = arith.constant 0 : index
    %113 = vector.load %arg3[%c13, %c0_25] : memref<27x10xf32, #tpu.memory_space<vmem>>, vector<1x10xf32>
    %114 = vector.shape_cast %113 : vector<1x10xf32> to vector<10xf32>
    %115 = vector.extract_strided_slice %105 {offsets = [0, 1, 0], sizes = [8, 8, 10], strides = [1, 1, 1]} : vector<8x10x10xf32> to vector<8x8x10xf32>
    %116 = vector.shape_cast %114 : vector<10xf32> to vector<1x1x10xf32>
    %117 = vector.broadcast %116 : vector<1x1x10xf32> to vector<8x8x10xf32>
    %118 = arith.mulf %117, %115 : vector<8x8x10xf32>
    %119 = arith.addf %112, %118 : vector<8x8x10xf32>
    %c14 = arith.constant 14 : index
    %c0_26 = arith.constant 0 : index
    %120 = vector.load %arg3[%c14, %c0_26] : memref<27x10xf32, #tpu.memory_space<vmem>>, vector<1x10xf32>
    %121 = vector.shape_cast %120 : vector<1x10xf32> to vector<10xf32>
    %122 = vector.extract_strided_slice %105 {offsets = [0, 2, 0], sizes = [8, 8, 10], strides = [1, 1, 1]} : vector<8x10x10xf32> to vector<8x8x10xf32>
    %123 = vector.shape_cast %121 : vector<10xf32> to vector<1x1x10xf32>
    %124 = vector.broadcast %123 : vector<1x1x10xf32> to vector<8x8x10xf32>
    %125 = arith.mulf %124, %122 : vector<8x8x10xf32>
    %126 = arith.addf %119, %125 : vector<8x8x10xf32>
    %127 = vector.extract_strided_slice %82 {offsets = [2, 0, 0], sizes = [8, 10, 10], strides = [1, 1, 1]} : vector<10x10x10xf32> to vector<8x10x10xf32>
    %c15 = arith.constant 15 : index
    %c0_27 = arith.constant 0 : index
    %128 = vector.load %arg3[%c15, %c0_27] : memref<27x10xf32, #tpu.memory_space<vmem>>, vector<1x10xf32>
    %129 = vector.shape_cast %128 : vector<1x10xf32> to vector<10xf32>
    %130 = vector.extract_strided_slice %127 {offsets = [0, 0, 0], sizes = [8, 8, 10], strides = [1, 1, 1]} : vector<8x10x10xf32> to vector<8x8x10xf32>
    %131 = vector.shape_cast %129 : vector<10xf32> to vector<1x1x10xf32>
    %132 = vector.broadcast %131 : vector<1x1x10xf32> to vector<8x8x10xf32>
    %133 = arith.mulf %132, %130 : vector<8x8x10xf32>
    %134 = arith.addf %126, %133 : vector<8x8x10xf32>
    %c16 = arith.constant 16 : index
    %c0_28 = arith.constant 0 : index
    %135 = vector.load %arg3[%c16, %c0_28] : memref<27x10xf32, #tpu.memory_space<vmem>>, vector<1x10xf32>
    %136 = vector.shape_cast %135 : vector<1x10xf32> to vector<10xf32>
    %137 = vector.extract_strided_slice %127 {offsets = [0, 1, 0], sizes = [8, 8, 10], strides = [1, 1, 1]} : vector<8x10x10xf32> to vector<8x8x10xf32>
    %138 = vector.shape_cast %136 : vector<10xf32> to vector<1x1x10xf32>
    %139 = vector.broadcast %138 : vector<1x1x10xf32> to vector<8x8x10xf32>
    %140 = arith.mulf %139, %137 : vector<8x8x10xf32>
    %141 = arith.addf %134, %140 : vector<8x8x10xf32>
    %c17 = arith.constant 17 : index
    %c0_29 = arith.constant 0 : index
    %142 = vector.load %arg3[%c17, %c0_29] : memref<27x10xf32, #tpu.memory_space<vmem>>, vector<1x10xf32>
    %143 = vector.shape_cast %142 : vector<1x10xf32> to vector<10xf32>
    %144 = vector.extract_strided_slice %127 {offsets = [0, 2, 0], sizes = [8, 8, 10], strides = [1, 1, 1]} : vector<8x10x10xf32> to vector<8x8x10xf32>
    %145 = vector.shape_cast %143 : vector<10xf32> to vector<1x1x10xf32>
    %146 = vector.broadcast %145 : vector<1x1x10xf32> to vector<8x8x10xf32>
    %147 = arith.mulf %146, %144 : vector<8x8x10xf32>
    %148 = arith.addf %141, %147 : vector<8x8x10xf32>
    %c2_i32 = arith.constant 2 : i32
    %149 = arith.addi %arg1, %c2_i32 : i32
    %c0_30 = arith.constant 0 : index
    %150 = arith.index_cast %149 : i32 to index
    %c0_31 = arith.constant 0 : index
    %c0_32 = arith.constant 0 : index
    %c0_33 = arith.constant 0 : index
    %151 = vector.load %arg2[%c0_30, %150, %c0_31, %c0_32, %c0_33] : memref<1x6x10x10x10xbf16, #tpu.memory_space<vmem>>, vector<1x1x10x10x10xbf16>
    %152 = vector.shape_cast %151 : vector<1x1x10x10x10xbf16> to vector<10x10x10xbf16>
    %153 = arith.extf %152 : vector<10x10x10xbf16> to vector<10x10x10xf32>
    %154 = vector.extract_strided_slice %153 {offsets = [0, 0, 0], sizes = [8, 10, 10], strides = [1, 1, 1]} : vector<10x10x10xf32> to vector<8x10x10xf32>
    %c18 = arith.constant 18 : index
    %c0_34 = arith.constant 0 : index
    %155 = vector.load %arg3[%c18, %c0_34] : memref<27x10xf32, #tpu.memory_space<vmem>>, vector<1x10xf32>
    %156 = vector.shape_cast %155 : vector<1x10xf32> to vector<10xf32>
    %157 = vector.extract_strided_slice %154 {offsets = [0, 0, 0], sizes = [8, 8, 10], strides = [1, 1, 1]} : vector<8x10x10xf32> to vector<8x8x10xf32>
    %158 = vector.shape_cast %156 : vector<10xf32> to vector<1x1x10xf32>
    %159 = vector.broadcast %158 : vector<1x1x10xf32> to vector<8x8x10xf32>
    %160 = arith.mulf %159, %157 : vector<8x8x10xf32>
    %161 = arith.addf %148, %160 : vector<8x8x10xf32>
    %c19 = arith.constant 19 : index
    %c0_35 = arith.constant 0 : index
    %162 = vector.load %arg3[%c19, %c0_35] : memref<27x10xf32, #tpu.memory_space<vmem>>, vector<1x10xf32>
    %163 = vector.shape_cast %162 : vector<1x10xf32> to vector<10xf32>
    %164 = vector.extract_strided_slice %154 {offsets = [0, 1, 0], sizes = [8, 8, 10], strides = [1, 1, 1]} : vector<8x10x10xf32> to vector<8x8x10xf32>
    %165 = vector.shape_cast %163 : vector<10xf32> to vector<1x1x10xf32>
    %166 = vector.broadcast %165 : vector<1x1x10xf32> to vector<8x8x10xf32>
    %167 = arith.mulf %166, %164 : vector<8x8x10xf32>
    %168 = arith.addf %161, %167 : vector<8x8x10xf32>
    %c20 = arith.constant 20 : index
    %c0_36 = arith.constant 0 : index
    %169 = vector.load %arg3[%c20, %c0_36] : memref<27x10xf32, #tpu.memory_space<vmem>>, vector<1x10xf32>
    %170 = vector.shape_cast %169 : vector<1x10xf32> to vector<10xf32>
    %171 = vector.extract_strided_slice %154 {offsets = [0, 2, 0], sizes = [8, 8, 10], strides = [1, 1, 1]} : vector<8x10x10xf32> to vector<8x8x10xf32>
    %172 = vector.shape_cast %170 : vector<10xf32> to vector<1x1x10xf32>
    %173 = vector.broadcast %172 : vector<1x1x10xf32> to vector<8x8x10xf32>
    %174 = arith.mulf %173, %171 : vector<8x8x10xf32>
    %175 = arith.addf %168, %174 : vector<8x8x10xf32>
    %176 = vector.extract_strided_slice %153 {offsets = [1, 0, 0], sizes = [8, 10, 10], strides = [1, 1, 1]} : vector<10x10x10xf32> to vector<8x10x10xf32>
    %c21 = arith.constant 21 : index
    %c0_37 = arith.constant 0 : index
    %177 = vector.load %arg3[%c21, %c0_37] : memref<27x10xf32, #tpu.memory_space<vmem>>, vector<1x10xf32>
    %178 = vector.shape_cast %177 : vector<1x10xf32> to vector<10xf32>
    %179 = vector.extract_strided_slice %176 {offsets = [0, 0, 0], sizes = [8, 8, 10], strides = [1, 1, 1]} : vector<8x10x10xf32> to vector<8x8x10xf32>
    %180 = vector.shape_cast %178 : vector<10xf32> to vector<1x1x10xf32>
    %181 = vector.broadcast %180 : vector<1x1x10xf32> to vector<8x8x10xf32>
    %182 = arith.mulf %181, %179 : vector<8x8x10xf32>
    %183 = arith.addf %175, %182 : vector<8x8x10xf32>
    %c22 = arith.constant 22 : index
    %c0_38 = arith.constant 0 : index
    %184 = vector.load %arg3[%c22, %c0_38] : memref<27x10xf32, #tpu.memory_space<vmem>>, vector<1x10xf32>
    %185 = vector.shape_cast %184 : vector<1x10xf32> to vector<10xf32>
    %186 = vector.extract_strided_slice %176 {offsets = [0, 1, 0], sizes = [8, 8, 10], strides = [1, 1, 1]} : vector<8x10x10xf32> to vector<8x8x10xf32>
    %187 = vector.shape_cast %185 : vector<10xf32> to vector<1x1x10xf32>
    %188 = vector.broadcast %187 : vector<1x1x10xf32> to vector<8x8x10xf32>
    %189 = arith.mulf %188, %186 : vector<8x8x10xf32>
    %190 = arith.addf %183, %189 : vector<8x8x10xf32>
    %c23 = arith.constant 23 : index
    %c0_39 = arith.constant 0 : index
    %191 = vector.load %arg3[%c23, %c0_39] : memref<27x10xf32, #tpu.memory_space<vmem>>, vector<1x10xf32>
    %192 = vector.shape_cast %191 : vector<1x10xf32> to vector<10xf32>
    %193 = vector.extract_strided_slice %176 {offsets = [0, 2, 0], sizes = [8, 8, 10], strides = [1, 1, 1]} : vector<8x10x10xf32> to vector<8x8x10xf32>
    %194 = vector.shape_cast %192 : vector<10xf32> to vector<1x1x10xf32>
    %195 = vector.broadcast %194 : vector<1x1x10xf32> to vector<8x8x10xf32>
    %196 = arith.mulf %195, %193 : vector<8x8x10xf32>
    %197 = arith.addf %190, %196 : vector<8x8x10xf32>
    %198 = vector.extract_strided_slice %153 {offsets = [2, 0, 0], sizes = [8, 10, 10], strides = [1, 1, 1]} : vector<10x10x10xf32> to vector<8x10x10xf32>
    %c24 = arith.constant 24 : index
    %c0_40 = arith.constant 0 : index
    %199 = vector.load %arg3[%c24, %c0_40] : memref<27x10xf32, #tpu.memory_space<vmem>>, vector<1x10xf32>
    %200 = vector.shape_cast %199 : vector<1x10xf32> to vector<10xf32>
    %201 = vector.extract_strided_slice %198 {offsets = [0, 0, 0], sizes = [8, 8, 10], strides = [1, 1, 1]} : vector<8x10x10xf32> to vector<8x8x10xf32>
    %202 = vector.shape_cast %200 : vector<10xf32> to vector<1x1x10xf32>
    %203 = vector.broadcast %202 : vector<1x1x10xf32> to vector<8x8x10xf32>
    %204 = arith.mulf %203, %201 : vector<8x8x10xf32>
    %205 = arith.addf %197, %204 : vector<8x8x10xf32>
    %c25 = arith.constant 25 : index
    %c0_41 = arith.constant 0 : index
    %206 = vector.load %arg3[%c25, %c0_41] : memref<27x10xf32, #tpu.memory_space<vmem>>, vector<1x10xf32>
    %207 = vector.shape_cast %206 : vector<1x10xf32> to vector<10xf32>
    %208 = vector.extract_strided_slice %198 {offsets = [0, 1, 0], sizes = [8, 8, 10], strides = [1, 1, 1]} : vector<8x10x10xf32> to vector<8x8x10xf32>
    %209 = vector.shape_cast %207 : vector<10xf32> to vector<1x1x10xf32>
    %210 = vector.broadcast %209 : vector<1x1x10xf32> to vector<8x8x10xf32>
    %211 = arith.mulf %210, %208 : vector<8x8x10xf32>
    %212 = arith.addf %205, %211 : vector<8x8x10xf32>
    %c26 = arith.constant 26 : index
    %c0_42 = arith.constant 0 : index
    %213 = vector.load %arg3[%c26, %c0_42] : memref<27x10xf32, #tpu.memory_space<vmem>>, vector<1x10xf32>
    %214 = vector.shape_cast %213 : vector<1x10xf32> to vector<10xf32>
    %215 = vector.extract_strided_slice %198 {offsets = [0, 2, 0], sizes = [8, 8, 10], strides = [1, 1, 1]} : vector<8x10x10xf32> to vector<8x8x10xf32>
    %216 = vector.shape_cast %214 : vector<10xf32> to vector<1x1x10xf32>
    %217 = vector.broadcast %216 : vector<1x1x10xf32> to vector<8x8x10xf32>
    %218 = arith.mulf %217, %215 : vector<8x8x10xf32>
    %219 = arith.addf %212, %218 : vector<8x8x10xf32>
    %cst = arith.constant 0.707106769 : f32
    %220 = vector.broadcast %cst : f32 to vector<8x8x10xf32>
    %221 = arith.mulf %219, %220 : vector<8x8x10xf32>
    %222 = math.absf %221 : vector<8x8x10xf32>
    %cst_43 = arith.constant 0.327591091 : f32
    %223 = vector.broadcast %cst_43 : f32 to vector<8x8x10xf32>
    %224 = arith.mulf %223, %222 : vector<8x8x10xf32>
    %cst_44 = arith.constant 1.000000e+00 : f32
    %225 = vector.broadcast %cst_44 : f32 to vector<8x8x10xf32>
    %226 = arith.addf %225, %224 : vector<8x8x10xf32>
    %227 = tpu.reciprocal %226 {approx = true} : vector<8x8x10xf32> -> vector<8x8x10xf32>
    %cst_45 = arith.constant 1.06140542 : f32
    %228 = vector.broadcast %cst_45 : f32 to vector<8x8x10xf32>
    %229 = arith.mulf %228, %227 : vector<8x8x10xf32>
    %cst_46 = arith.constant -1.45315206 : f32
    %230 = vector.broadcast %cst_46 : f32 to vector<8x8x10xf32>
    %231 = arith.addf %229, %230 : vector<8x8x10xf32>
    %232 = arith.mulf %231, %227 : vector<8x8x10xf32>
    %cst_47 = arith.constant 1.42141378 : f32
    %233 = vector.broadcast %cst_47 : f32 to vector<8x8x10xf32>
    %234 = arith.addf %232, %233 : vector<8x8x10xf32>
    %235 = arith.mulf %234, %227 : vector<8x8x10xf32>
    %cst_48 = arith.constant -0.284496725 : f32
    %236 = vector.broadcast %cst_48 : f32 to vector<8x8x10xf32>
    %237 = arith.addf %235, %236 : vector<8x8x10xf32>
    %238 = arith.mulf %237, %227 : vector<8x8x10xf32>
    %cst_49 = arith.constant 0.254829586 : f32
    %239 = vector.broadcast %cst_49 : f32 to vector<8x8x10xf32>
    %240 = arith.addf %238, %239 : vector<8x8x10xf32>
    %241 = arith.mulf %240, %227 : vector<8x8x10xf32>
    %cst_50 = arith.constant 0.000000e+00 : f32
    %242 = vector.broadcast %cst_50 : f32 to vector<8x8x10xf32>
    %243 = arith.subf %242, %222 : vector<8x8x10xf32>
    %244 = arith.mulf %243, %222 : vector<8x8x10xf32>
    %245 = math.exp %244 : vector<8x8x10xf32>
    %246 = arith.mulf %241, %245 : vector<8x8x10xf32>
    %cst_51 = arith.constant 1.000000e+00 : f32
    %247 = vector.broadcast %cst_51 : f32 to vector<8x8x10xf32>
    %248 = arith.subf %247, %246 : vector<8x8x10xf32>
    %cst_52 = arith.constant 0.000000e+00 : f32
    %249 = vector.broadcast %cst_52 : f32 to vector<8x8x10xf32>
    %250 = arith.cmpf oge, %221, %249 : vector<8x8x10xf32>
    %cst_53 = arith.constant 0.000000e+00 : f32
    %251 = vector.broadcast %cst_53 : f32 to vector<8x8x10xf32>
    %252 = arith.subf %251, %248 : vector<8x8x10xf32>
    %253 = arith.select %250, %248, %252 : vector<8x8x10xi1>, vector<8x8x10xf32>
    %cst_54 = arith.constant 5.000000e-01 : f32
    %254 = vector.broadcast %cst_54 : f32 to vector<8x8x10xf32>
    %255 = arith.mulf %254, %219 : vector<8x8x10xf32>
    %cst_55 = arith.constant 1.000000e+00 : f32
    %256 = vector.broadcast %cst_55 : f32 to vector<8x8x10xf32>
    %257 = arith.addf %256, %253 : vector<8x8x10xf32>
    %258 = arith.mulf %255, %257 : vector<8x8x10xf32>
    %259 = arith.truncf %258 : vector<8x8x10xf32> to vector<8x8x10xbf16>
    %260 = vector.extract_strided_slice %259 {offsets = [0, 0, 0], sizes = [8, 8, 2], strides = [1, 1, 1]} : vector<8x8x10xbf16> to vector<8x8x2xbf16>
    %c0_56 = arith.constant 0 : index
    %c0_57 = arith.constant 0 : index
    %c0_58 = arith.constant 0 : index
    %261 = vector.load %arg8[%c0_56, %c0_57, %c0_58] : memref<8x12x10xbf16, #tpu.memory_space<vmem>>, vector<8x8x2xbf16>
    tpu.vector_store %arg8[%c0_56, %c0_57, %c0_58], %260 {strides = array<i32>} : memref<8x12x10xbf16, #tpu.memory_space<vmem>>, vector<8x8x2xbf16>,
    %262 = vector.extract_strided_slice %259 {offsets = [0, 0, 2], sizes = [8, 8, 2], strides = [1, 1, 1]} : vector<8x8x10xbf16> to vector<8x8x2xbf16>
    %c0_59 = arith.constant 0 : index
    %c1_60 = arith.constant 1 : index
    %c2_61 = arith.constant 2 : index
    %263 = vector.load %arg8[%c0_59, %c1_60, %c2_61] : memref<8x12x10xbf16, #tpu.memory_space<vmem>>, vector<8x8x2xbf16>
    tpu.vector_store %arg8[%c0_59, %c1_60, %c2_61], %262 {strides = array<i32>} : memref<8x12x10xbf16, #tpu.memory_space<vmem>>, vector<8x8x2xbf16>,
    %264 = vector.extract_strided_slice %259 {offsets = [0, 0, 4], sizes = [8, 8, 2], strides = [1, 1, 1]} : vector<8x8x10xbf16> to vector<8x8x2xbf16>
    %c0_62 = arith.constant 0 : index
    %c2_63 = arith.constant 2 : index
    %c4_64 = arith.constant 4 : index
    %265 = vector.load %arg8[%c0_62, %c2_63, %c4_64] : memref<8x12x10xbf16, #tpu.memory_space<vmem>>, vector<8x8x2xbf16>
    tpu.vector_store %arg8[%c0_62, %c2_63, %c4_64], %264 {strides = array<i32>} : memref<8x12x10xbf16, #tpu.memory_space<vmem>>, vector<8x8x2xbf16>,
    %266 = vector.extract_strided_slice %259 {offsets = [0, 0, 6], sizes = [8, 8, 2], strides = [1, 1, 1]} : vector<8x8x10xbf16> to vector<8x8x2xbf16>
    %c0_65 = arith.constant 0 : index
    %c3_66 = arith.constant 3 : index
    %c6_67 = arith.constant 6 : index
    %267 = vector.load %arg8[%c0_65, %c3_66, %c6_67] : memref<8x12x10xbf16, #tpu.memory_space<vmem>>, vector<8x8x2xbf16>
    tpu.vector_store %arg8[%c0_65, %c3_66, %c6_67], %266 {strides = array<i32>} : memref<8x12x10xbf16, #tpu.memory_space<vmem>>, vector<8x8x2xbf16>,
    %268 = vector.extract_strided_slice %259 {offsets = [0, 0, 8], sizes = [8, 8, 2], strides = [1, 1, 1]} : vector<8x8x10xbf16> to vector<8x8x2xbf16>
    %c0_68 = arith.constant 0 : index
    %c4_69 = arith.constant 4 : index
    %c8_70 = arith.constant 8 : index
    %269 = vector.load %arg8[%c0_68, %c4_69, %c8_70] : memref<8x12x10xbf16, #tpu.memory_space<vmem>>, vector<8x8x2xbf16>
    tpu.vector_store %arg8[%c0_68, %c4_69, %c8_70], %268 {strides = array<i32>} : memref<8x12x10xbf16, #tpu.memory_space<vmem>>, vector<8x8x2xbf16>,
    %c0_71 = arith.constant 0 : index
    %c2_72 = arith.constant 2 : index
    %c0_73 = arith.constant 0 : index
    %270 = vector.load %arg8[%c0_71, %c2_72, %c0_73] : memref<8x12x10xbf16, #tpu.memory_space<vmem>>, vector<8x8x10xbf16>
    %271 = vector.shape_cast %270 : vector<8x8x10xbf16> to vector<64x10xbf16>
    %c0_74 = arith.constant 0 : index
    %c0_75 = arith.constant 0 : index
    %272 = vector.load %arg5[%c0_74, %c0_75] : memref<10x10xbf16, #tpu.memory_space<vmem>>, vector<10x10xbf16>
    %cst_76 = arith.constant dense<0.000000e+00> : vector<64x10xf32>
    %273 = tpu.matmul %271, %272, %cst_76 {dimension_numbers = #tpu.dot_dimension_numbers<[1], [0], [0], [1], [0, 0, 1, 1], [], []>} : vector<64x10xbf16>, vector<10x10xbf16>, vector<64x10xf32> -> vector<64x10xf32>
    %c0_77 = arith.constant 0 : index
    %c0_78 = arith.constant 0 : index
    %274 = vector.load %arg6[%c0_77, %c0_78] : memref<1x10xf32, #tpu.memory_space<vmem>>, vector<1x10xf32>
    %275 = vector.broadcast %274 : vector<1x10xf32> to vector<64x10xf32>
    %276 = arith.addf %273, %275 : vector<64x10xf32>
    %277 = vector.extract_strided_slice %276 {offsets = [0, 0], sizes = [8, 10], strides = [1, 1]} : vector<64x10xf32> to vector<8x10xf32>
    %278 = tpu.transpose %277, [1, 0] : vector<8x10xf32> -> vector<10x8xf32>
    %c0_79 = arith.constant 0 : index
    %c0_80 = arith.constant 0 : index
    %c0_81 = arith.constant 0 : index
    %c0_82 = arith.constant 0 : index
    %c0_83 = arith.constant 0 : index
    %279 = vector.load %arg7[%c0_79, %c0_80, %c0_81, %c0_82, %c0_83] : memref<1x10x1x8x8xf32, #tpu.memory_space<vmem>>, vector<1x10x1x1x8xf32>
    %280 = vector.shape_cast %279 : vector<1x10x1x1x8xf32> to vector<10x8xf32>
    %281 = vector.shape_cast %278 : vector<10x8xf32> to vector<1x10x1x1x8xf32>
    tpu.vector_store %arg7[%c0_79, %c0_80, %c0_81, %c0_82, %c0_83], %281 {strides = array<i32>} : memref<1x10x1x8x8xf32, #tpu.memory_space<vmem>>, vector<1x10x1x1x8xf32>,
    %282 = vector.extract_strided_slice %276 {offsets = [8, 0], sizes = [8, 10], strides = [1, 1]} : vector<64x10xf32> to vector<8x10xf32>
    %283 = tpu.transpose %282, [1, 0] : vector<8x10xf32> -> vector<10x8xf32>
    %c0_84 = arith.constant 0 : index
    %c0_85 = arith.constant 0 : index
    %c0_86 = arith.constant 0 : index
    %c1_87 = arith.constant 1 : index
    %c0_88 = arith.constant 0 : index
    %284 = vector.load %arg7[%c0_84, %c0_85, %c0_86, %c1_87, %c0_88] : memref<1x10x1x8x8xf32, #tpu.memory_space<vmem>>, vector<1x10x1x1x8xf32>
    %285 = vector.shape_cast %284 : vector<1x10x1x1x8xf32> to vector<10x8xf32>
    %286 = vector.shape_cast %283 : vector<10x8xf32> to vector<1x10x1x1x8xf32>
    tpu.vector_store %arg7[%c0_84, %c0_85, %c0_86, %c1_87, %c0_88], %286 {strides = array<i32>} : memref<1x10x1x8x8xf32, #tpu.memory_space<vmem>>, vector<1x10x1x1x8xf32>,
    %287 = vector.extract_strided_slice %276 {offsets = [16, 0], sizes = [8, 10], strides = [1, 1]} : vector<64x10xf32> to vector<8x10xf32>
    %288 = tpu.transpose %287, [1, 0] : vector<8x10xf32> -> vector<10x8xf32>
    %c0_89 = arith.constant 0 : index
    %c0_90 = arith.constant 0 : index
    %c0_91 = arith.constant 0 : index
    %c2_92 = arith.constant 2 : index
    %c0_93 = arith.constant 0 : index
    %289 = vector.load %arg7[%c0_89, %c0_90, %c0_91, %c2_92, %c0_93] : memref<1x10x1x8x8xf32, #tpu.memory_space<vmem>>, vector<1x10x1x1x8xf32>
    %290 = vector.shape_cast %289 : vector<1x10x1x1x8xf32> to vector<10x8xf32>
    %291 = vector.shape_cast %288 : vector<10x8xf32> to vector<1x10x1x1x8xf32>
    tpu.vector_store %arg7[%c0_89, %c0_90, %c0_91, %c2_92, %c0_93], %291 {strides = array<i32>} : memref<1x10x1x8x8xf32, #tpu.memory_space<vmem>>, vector<1x10x1x1x8xf32>,
    %292 = vector.extract_strided_slice %276 {offsets = [24, 0], sizes = [8, 10], strides = [1, 1]} : vector<64x10xf32> to vector<8x10xf32>
    %293 = tpu.transpose %292, [1, 0] : vector<8x10xf32> -> vector<10x8xf32>
    %c0_94 = arith.constant 0 : index
    %c0_95 = arith.constant 0 : index
    %c0_96 = arith.constant 0 : index
    %c3_97 = arith.constant 3 : index
    %c0_98 = arith.constant 0 : index
    %294 = vector.load %arg7[%c0_94, %c0_95, %c0_96, %c3_97, %c0_98] : memref<1x10x1x8x8xf32, #tpu.memory_space<vmem>>, vector<1x10x1x1x8xf32>
    %295 = vector.shape_cast %294 : vector<1x10x1x1x8xf32> to vector<10x8xf32>
    %296 = vector.shape_cast %293 : vector<10x8xf32> to vector<1x10x1x1x8xf32>
    tpu.vector_store %arg7[%c0_94, %c0_95, %c0_96, %c3_97, %c0_98], %296 {strides = array<i32>} : memref<1x10x1x8x8xf32, #tpu.memory_space<vmem>>, vector<1x10x1x1x8xf32>,
    %297 = vector.extract_strided_slice %276 {offsets = [32, 0], sizes = [8, 10], strides = [1, 1]} : vector<64x10xf32> to vector<8x10xf32>
    %298 = tpu.transpose %297, [1, 0] : vector<8x10xf32> -> vector<10x8xf32>
    %c0_99 = arith.constant 0 : index
    %c0_100 = arith.constant 0 : index
    %c0_101 = arith.constant 0 : index
    %c4_102 = arith.constant 4 : index
    %c0_103 = arith.constant 0 : index
    %299 = vector.load %arg7[%c0_99, %c0_100, %c0_101, %c4_102, %c0_103] : memref<1x10x1x8x8xf32, #tpu.memory_space<vmem>>, vector<1x10x1x1x8xf32>
    %300 = vector.shape_cast %299 : vector<1x10x1x1x8xf32> to vector<10x8xf32>
    %301 = vector.shape_cast %298 : vector<10x8xf32> to vector<1x10x1x1x8xf32>
    tpu.vector_store %arg7[%c0_99, %c0_100, %c0_101, %c4_102, %c0_103], %301 {strides = array<i32>} : memref<1x10x1x8x8xf32, #tpu.memory_space<vmem>>, vector<1x10x1x1x8xf32>,
    %302 = vector.extract_strided_slice %276 {offsets = [40, 0], sizes = [8, 10], strides = [1, 1]} : vector<64x10xf32> to vector<8x10xf32>
    %303 = tpu.transpose %302, [1, 0] : vector<8x10xf32> -> vector<10x8xf32>
    %c0_104 = arith.constant 0 : index
    %c0_105 = arith.constant 0 : index
    %c0_106 = arith.constant 0 : index
    %c5_107 = arith.constant 5 : index
    %c0_108 = arith.constant 0 : index
    %304 = vector.load %arg7[%c0_104, %c0_105, %c0_106, %c5_107, %c0_108] : memref<1x10x1x8x8xf32, #tpu.memory_space<vmem>>, vector<1x10x1x1x8xf32>
    %305 = vector.shape_cast %304 : vector<1x10x1x1x8xf32> to vector<10x8xf32>
    %306 = vector.shape_cast %303 : vector<10x8xf32> to vector<1x10x1x1x8xf32>
    tpu.vector_store %arg7[%c0_104, %c0_105, %c0_106, %c5_107, %c0_108], %306 {strides = array<i32>} : memref<1x10x1x8x8xf32, #tpu.memory_space<vmem>>, vector<1x10x1x1x8xf32>,
    %307 = vector.extract_strided_slice %276 {offsets = [48, 0], sizes = [8, 10], strides = [1, 1]} : vector<64x10xf32> to vector<8x10xf32>
    %308 = tpu.transpose %307, [1, 0] : vector<8x10xf32> -> vector<10x8xf32>
    %c0_109 = arith.constant 0 : index
    %c0_110 = arith.constant 0 : index
    %c0_111 = arith.constant 0 : index
    %c6_112 = arith.constant 6 : index
    %c0_113 = arith.constant 0 : index
    %309 = vector.load %arg7[%c0_109, %c0_110, %c0_111, %c6_112, %c0_113] : memref<1x10x1x8x8xf32, #tpu.memory_space<vmem>>, vector<1x10x1x1x8xf32>
    %310 = vector.shape_cast %309 : vector<1x10x1x1x8xf32> to vector<10x8xf32>
    %311 = vector.shape_cast %308 : vector<10x8xf32> to vector<1x10x1x1x8xf32>
    tpu.vector_store %arg7[%c0_109, %c0_110, %c0_111, %c6_112, %c0_113], %311 {strides = array<i32>} : memref<1x10x1x8x8xf32, #tpu.memory_space<vmem>>, vector<1x10x1x1x8xf32>,
    %312 = vector.extract_strided_slice %276 {offsets = [56, 0], sizes = [8, 10], strides = [1, 1]} : vector<64x10xf32> to vector<8x10xf32>
    %313 = tpu.transpose %312, [1, 0] : vector<8x10xf32> -> vector<10x8xf32>
    %c0_114 = arith.constant 0 : index
    %c0_115 = arith.constant 0 : index
    %c0_116 = arith.constant 0 : index
    %c7_117 = arith.constant 7 : index
    %c0_118 = arith.constant 0 : index
    %314 = vector.load %arg7[%c0_114, %c0_115, %c0_116, %c7_117, %c0_118] : memref<1x10x1x8x8xf32, #tpu.memory_space<vmem>>, vector<1x10x1x1x8xf32>
    %315 = vector.shape_cast %314 : vector<1x10x1x1x8xf32> to vector<10x8xf32>
    %316 = vector.shape_cast %313 : vector<10x8xf32> to vector<1x10x1x1x8xf32>
    tpu.vector_store %arg7[%c0_114, %c0_115, %c0_116, %c7_117, %c0_118], %316 {strides = array<i32>} : memref<1x10x1x8x8xf32, #tpu.memory_space<vmem>>, vector<1x10x1x1x8xf32>,
    return
  }
  func.func @transform_0(%arg0: i32, %arg1: i32) -> (i32, i32, i32, i32, i32) {
    %c0_i32 = arith.constant 0 : i32
    %c0_i32_0 = arith.constant 0 : i32
    %c0_i32_1 = arith.constant 0 : i32
    %c0_i32_2 = arith.constant 0 : i32
    %c0_i32_3 = arith.constant 0 : i32
    return %arg0, %c0_i32, %c0_i32_0, %c0_i32_1, %c0_i32_2 : i32, i32, i32, i32, i32
  }
  func.func @transform_1(%arg0: i32, %arg1: i32) -> (i32, i32) {
    %c0_i32 = arith.constant 0 : i32
    %c0_i32_0 = arith.constant 0 : i32
    %c0_i32_1 = arith.constant 0 : i32
    return %c0_i32, %c0_i32_0 : i32, i32
  }
  func.func @transform_2(%arg0: i32, %arg1: i32) -> (i32, i32) {
    %c0_i32 = arith.constant 0 : i32
    %c0_i32_0 = arith.constant 0 : i32
    %c0_i32_1 = arith.constant 0 : i32
    return %c0_i32, %c0_i32_0 : i32, i32
  }
  func.func @transform_3(%arg0: i32, %arg1: i32) -> (i32, i32) {
    %c0_i32 = arith.constant 0 : i32
    %c0_i32_0 = arith.constant 0 : i32
    %c0_i32_1 = arith.constant 0 : i32
    return %c0_i32, %c0_i32_0 : i32, i32
  }
  func.func @transform_4(%arg0: i32, %arg1: i32) -> (i32, i32) {
    %c0_i32 = arith.constant 0 : i32
    %c0_i32_0 = arith.constant 0 : i32
    %c0_i32_1 = arith.constant 0 : i32
    return %c0_i32, %c0_i32_0 : i32, i32
  }
  func.func @transform_5(%arg0: i32, %arg1: i32) -> (i32, i32, i32, i32, i32) {
    %c0_i32 = arith.constant 0 : i32
    %c0_i32_0 = arith.constant 0 : i32
    %c0_i32_1 = arith.constant 0 : i32
    %c0_i32_2 = arith.constant 0 : i32
    return %arg0, %c0_i32, %arg1, %c0_i32_0, %c0_i32_1 : i32, i32, i32, i32, i32
  }
}

</mosaic_0001>

<bundles_post_ra>
// kernel: msf_forward.1
= control target key start
LH: loop header
LB: loop body
LE: loop exit
PB: predicated region body
PF: predicated region fallthrough
CT: control target
= control target key end

     0   :  { %s3534_s18 = smov 0   ;;  %s3536_s19 = smov 0   ;;  %s5508_s0 = inlined_call_operand.vmem [shape: bf16[2,6,10,10,10], index: 0, kind: input, shape index: {}]   ;;  %s5509_s1 = inlined_call_operand.vmem [shape: f32[27,10], index: 1, kind: input, shape index: {}]   ;;  %s5510_s2 = inlined_call_operand.vmem [shape: f32[1,10], index: 2, kind: input, shape index: {}]   ;;  %s5511_s3 = inlined_call_operand.vmem [shape: bf16[10,10], index: 3, kind: input, shape index: {}]   ;;  %s5512_s4 = inlined_call_operand.vmem [shape: f32[1,10], index: 4, kind: input, shape index: {}]   ;;  %s5513_s5 = inlined_call_operand.vmem [shape: f32[2,10,4,8,8], index: 5, kind: output, shape index: {}]  }
   0x1   :  { %s3538_s20 = smov 0   ;;  %s3540_s21 = smov 0  }
   0x2   :  { %s3542_s22 = smov 0   ;;  %s3544_s23 = smov 0  }
   0x3   :  { %s3546_s24 = smov 0  }
   0x4 LB: > { %s24_s25 = sadd.s32 1, %s3493_s22  ;;  %s27_s26 = sadd.s32 1, %s3497_s23  ;;  %s3501_s24 = sphi %s3546_s24, %s15_s24   ;;  %s3497_s23 = sphi %s3544_s23, %s5598_s23   ;;  %s3493_s22 = sphi %s3542_s22, %s5597_s22   ;;  %s3489_s21 = sphi %s3540_s21, %s5596_s21   ;;  %s3485_s20 = sphi %s3538_s20, %s5595_s20   ;;  %s3481_s19 = sphi %s3536_s19, %s5594_s19   ;;  %s3477_s18 = sphi %s3534_s18, %s5593_s18  }
   0x5   : > { %p25_p0 = scmp.ge.s32.totalorder %s24_s25, 4  ;;  %s3225_s27 = sadd.s32 4294967295, %s3501_s24  }
   0x6   : > { %p156_p1 = scmp.ne.s32.totalorder %s3481_s19, %s3477_s18  ;;  %p157_p2 = scmp.eq.s32.totalorder %s3225_s27, 7 }
   0x7   : > { %s5600_s25 = smov (%p25_p0, %s24_s25), 0  ;;  %s5602_s26 = smov (!%p25_p0, %s27_s26), %s3497_s23 }
   0x8   : > { %s142_s28 = ssub.s32 %s3493_s22, %s5600_s25  ;;  %p29_p3 = scmp.ge.s32.totalorder %s5602_s26, 2 }
   0x9   : > { %p3229_p4 = scmp.ge.s32.totalorder %s3501_s24, 1  ;;  %p3580_p5 = por %p157_p2, %p156_p1 }
   0xa   : > { %p201_p6 = scmp.lt.s32.totalorder %s3501_s24, 9  ;;  %s5604_s26 = smov (%p29_p3, %s5602_s26), 0 }
   0xb   : > { %s141_s30 = ssub.s32 %s3497_s23, %s5604_s26  ;;  %s146_s7 = sadd.s32 1, %s3481_s19 }
   0xc   : > { %p202_p7 = pnand %p3229_p4, %p201_p6  ;;  %s143_s6 = sor.u32 %s142_s28, %s141_s30 }
   0xd   : > { %p144_p8 = scmp.eq.s32.totalorder %s143_s6, 0 }
   0xe   : > { %205 = sbr.rel (%p202_p7) target bundleno = 815 (0x32f), region = 40 }
   0xf   : > { %s3591_s8 = scalar_select %p144_p8, %s3481_s19, %s146_s7  }
  0x13   : > { %s225_s9 = sand.u32 1, %s3477_s18   ;;  %p228_p9 = scmp.lt.s32.totalorder %s3489_s21, 1 }
  0x14   : > { %s3297_s10 = smul.u32 80, %s225_s9  ;;  %p3231_p10 = scmp.ne.s32.totalorder %s3485_s20, 0 }
  0x15   : > { %s229_s11 = scalar_select %p228_p9, %s3489_s21, 1 }
  0x16   : > { %s3601_s16 = scalar_lea.vmem [#allocation3], %s3297_s10  ;;  %237 = sbr.rel (%p3231_p10) target bundleno = 44 (0x2c), region = 44 }
  0x17   : > { %s3298_s12 = smul.u32 480, %s229_s11 }
  0x19   : > { %s3599_s15 = scalar_lea.vmem %s5508_s0, %s3298_s12 }
  0x1b   : > { %vm238_vm0 = vcmask 76800   ;;  %v3503_v0 = vmov 0   ;;  %vm240_vm1 = vcmask 74752  }
  0x1c   : > { %239 = vst.msk [vmem:[#allocation2] sm:$0xf] %vm238_vm0, %v3503_v0 }
  0x1d   : > { %242 = vst.msk [vmem:[#allocation2 + $0x8] sm:$0xf] %vm238_vm0, %v3503_v0 }
  0x1e   : > { %244 = vst.msk [vmem:[#allocation2 + $0x10] sm:$0xf] %vm238_vm0, %v3503_v0 }
  0x1f   : > { %246 = vst.msk [vmem:[#allocation2 + $0x18] sm:$0xf] %vm238_vm0, %v3503_v0 }
  0x20   : > { %248 = vst.msk [vmem:[#allocation2 + $0x20] sm:$0xf] %vm238_vm0, %v3503_v0 }
  0x21   : > { %250 = vst.msk [vmem:[#allocation2 + $0x28] sm:$0xf] %vm238_vm0, %v3503_v0 }
  0x22   : > { %252 = vst.msk [vmem:[#allocation2 + $0x30] sm:$0xf] %vm238_vm0, %v3503_v0 }
  0x23   : > { %254 = vst.msk [vmem:[#allocation2 + $0x38] sm:$0xf] %vm238_vm0, %v3503_v0 }
  0x24   : > { %241 = vst.msk [vmem:[#allocation2 + $0x4] sm:$0x3] %vm240_vm1, %v3503_v0 }
  0x25   : > { %243 = vst.msk [vmem:[#allocation2 + $0xc] sm:$0x3] %vm240_vm1, %v3503_v0 }
  0x26   : > { %245 = vst.msk [vmem:[#allocation2 + $0x14] sm:$0x3] %vm240_vm1, %v3503_v0 }
  0x27   : > { %247 = vst.msk [vmem:[#allocation2 + $0x1c] sm:$0x3] %vm240_vm1, %v3503_v0 }
  0x28   : > { %249 = vst.msk [vmem:[#allocation2 + $0x24] sm:$0x3] %vm240_vm1, %v3503_v0 }
  0x29   : > { %251 = vst.msk [vmem:[#allocation2 + $0x2c] sm:$0x3] %vm240_vm1, %v3503_v0 }
  0x2a   : > { %253 = vst.msk [vmem:[#allocation2 + $0x34] sm:$0x3] %vm240_vm1, %v3503_v0 }
  0x2b   : > { %255 = vst.msk [vmem:[#allocation2 + $0x3c] sm:$0x3] %vm240_vm1, %v3503_v0 }
  0x2c PF: > { %v3283_v1 = vld [vmem:[%s5511_s3] sm:$0xf]  ;;  %v3293_v2 = vld [vmem:[%s5511_s3] sm:$0x10]  ;;  %vm2559_vm2 = vcmask 1044480   ;;  %s3292_s30 = smul.u32 80, %s3485_s20 }
  0x2d   : > { %v3284_v3 = vor.u32 %v3293_v2, %v3283_v1  ;;  %v3614_v4 = vld [vmem:[%s5510_s2] ss:$0 sm:$0xff]  ;;  %v3627_v6 = vld [vmem:[%s5509_s1 + $0x1] ss:$0 sm:$0xff]  ;;  %vm355_vm3 = vcmask 1046528   ;;  %vm430_vm4 = vcmask 1045504  }
  0x2e   : > { %s3617_s9 = scalar_lea.vmem %s3599_s15, %s3292_s30  ;;  %v3622_v5 = vld [vmem:[%s5509_s1] ss:$0 sm:$0xff]  ;;  %v3649_v25 = vld [vmem:[%s5509_s1 + $0x2] ss:$0 sm:$0xff]  ;;  %v3658_v30 = vld [vmem:[%s5509_s1 + $0x3] ss:$0 sm:$0xff] }
  0x2f   : > { %v2561_v7 = vsel %vm2559_vm2, %v3284_v3, 0  ;;  %v263_v8 = vld [vmem:[%s3617_s9] sm:$0xf]  ;;  %v264_v9 = vld [vmem:[%s3617_s9 + $0x4] sm:$0x1]  ;;  %vm2103_vm7 = vcmask 11264  }
  0x30   : > { %2570 = vmatpush.bf16.msra.mxu0 %v2561_v7  ;;  %3294 = vmatpush.bf16.msra.mxu1 %v2561_v7  ;;  %v265_v10 = vld [vmem:[%s3617_s9 + $0x8] sm:$0xf]  ;;  %v266_v11 = vld [vmem:[%s3617_s9 + $0xc] sm:$0x1]  ;;  %v267_v12 = vld [vmem:[%s3617_s9 + $0x10] sm:$0xf]  ;;  %v283_v13 = vunpack.c.l.bf16 %v263_v8  ;;  %v284_v14 = vunpack.c.l.bf16 %v264_v9 }
  0x31   : > { %v268_v15 = vld [vmem:[%s3617_s9 + $0x14] sm:$0x1]  ;;  %v269_v16 = vld [vmem:[%s3617_s9 + $0x18] sm:$0xf]  ;;  %v270_v17 = vld [vmem:[%s3617_s9 + $0x1c] sm:$0x1]  ;;  %v285_v18 = vunpack.c.l.bf16 %v265_v10  ;;  %v286_v19 = vunpack.c.l.bf16 %v266_v11  ;;  %v3637_v20 = vunpack.c.l.bf16 %v267_v12  ;;  %3295 = vmatpush.bf16.msra.mxu2 %v2561_v7  ;;  %3296 = vmatpush.bf16.msra.mxu3 %v2561_v7 }
  0x32   : > { %v3639_v21 = vunpack.c.l.bf16 %v268_v15  ;;  %v3641_v22 = vunpack.c.l.bf16 %v269_v16  ;;  %v3643_v23 = vunpack.c.l.bf16 %v270_v17  ;;  %v305_v24 = vmul.f32 %v3622_v5, %v283_v13  ;;  %v3668_v39 = vld [vmem:[%s5509_s1 + $0x4] ss:$0 sm:$0xff]  ;;  %v3677_v47 = vld [vmem:[%s5509_s1 + $0x5] ss:$0 sm:$0xff]  ;;  %v3691_v60 = vld [vmem:[%s5509_s1 + $0x6] ss:$0 sm:$0xff] }
  0x33   : > { %v306_v26 = vmul.f32 %v3622_v5, %v285_v18  ;;  %v323_v27 = vmul.f32 %v3627_v6, %v283_v13  ;;  %v324_v28 = vmul.f32 %v3627_v6, %v284_v14  ;;  %v325_v29 = vmul.f32 %v3627_v6, %v285_v18  ;;  %v3700_v8 = vld [vmem:[%s5509_s1 + $0x7] ss:$0 sm:$0xff]  ;;  %v3712_v17 = vld [vmem:[%s5509_s1 + $0x8] ss:$0 sm:$0xff]  ;;  %s3299_s18 = smul.u32 (%p3580_p5), 40, %s3489_s21 }
  0x34   : > { %v313_v31 = vadd.f32 %v3614_v4, %v305_v24  ;;  %v326_v32 = vmul.f32 %v3627_v6, %v286_v19  ;;  %v398_v33 = vmul.f32 %v3649_v25, %v283_v13  ;;  %v399_v34 = vmul.f32 %v3649_v25, %v284_v14 }
  0x35   : > { %v314_v35 = vadd.f32 %v3614_v4, %v306_v26  ;;  %v356_v36 = vrot.slane %v323_v27, 1  ;;  %v357_v37 = vrot.slane %v324_v28, 1  ;;  %v359_v38 = vrot.slane %v325_v29, 1  ;;  %s3081_s27 = sadd.s32 (%p3580_p5), %s3485_s20, %s3299_s18 }
  0x36   : > { %v360_v40 = vrot.slane %v326_v32, 1  ;;  %v400_v41 = vmul.f32 %v3649_v25, %v285_v18  ;;  %v401_v42 = vmul.f32 %v3649_v25, %v286_v19  ;;  %v431_v44 = vrot.slane %v398_v33, 2  ;;  %s3289_s28 = sshll.u32 (%p3580_p5), %s3081_s27, 3 }
  0x37   : > { %v358_v43 = vsel %vm355_vm3, %v356_v36, %v357_v37  ;;  %v432_v45 = vrot.slane %v399_v34, 2  ;;  %v473_v46 = vmul.f32 %v3658_v30, %v285_v18  ;;  %v474_v54 = vmul.f32 %v3658_v30, %v3637_v20  ;;  %v3233_v36 = vld [vmem:[%s3617_s9 + $0x50] sm:$0xf]  ;;  %s3083_s29 = scalar_lea.vmem (%p3580_p5), %s5513_s5, %s3289_s28 }
  0x38   : > { %v361_v48 = vsel %vm355_vm3, %v359_v38, %v360_v40  ;;  %v388_v49 = vadd.f32 %v358_v43, %v313_v31  ;;  %v434_v50 = vrot.slane %v400_v41, 2  ;;  %v435_v51 = vrot.slane %v401_v42, 2  ;;  %v3234_v42 = vld [vmem:[%s3617_s9 + $0x54] sm:$0x1] }
  0x39   : > { %v389_v52 = vadd.f32 %v361_v48, %v314_v35  ;;  %v433_v53 = vsel %vm430_vm4, %v431_v44, %v432_v45  ;;  %v491_v55 = vmul.f32 %v3668_v39, %v285_v18  ;;  %v492_v58 = vmul.f32 %v3668_v39, %v286_v19  ;;  %v3235_v48 = vld [vmem:[%s3617_s9 + $0x58] sm:$0xf] }
  0x3a   : > { %v436_v56 = vsel %vm430_vm4, %v434_v50, %v435_v51  ;;  %v463_v57 = vadd.f32 %v433_v53, %v388_v49  ;;  %v493_v59 = vmul.f32 %v3668_v39, %v3637_v20  ;;  %v494_v62 = vmul.f32 %v3668_v39, %v3639_v21  ;;  %v3236_v49 = vld [vmem:[%s3617_s9 + $0x5c] sm:$0x1] }
  0x3b   : > { %v464_v61 = vadd.f32 %v436_v56, %v389_v52  ;;  %v523_v63 = vrot.slane %v491_v55, 1  ;;  %v565_v0 = vmul.f32 %v3677_v47, %v285_v18  ;;  %v524_v2 = vrot.slane %v492_v58, 1  ;;  %v3238_v55 = vld [vmem:[%s3617_s9 + $0x64] sm:$0x1] }
  0x3c   : > { %v481_v1 = vadd.f32 %v473_v46, %v463_v57  ;;  %v526_v3 = vrot.slane %v493_v59, 1  ;;  %v566_v7 = vmul.f32 %v3677_v47, %v286_v19  ;;  %v527_v10 = vrot.slane %v494_v62, 1  ;;  %v3239_v59 = vld [vmem:[%s3617_s9 + $0x68] sm:$0xf] }
  0x3d   : > { %v482_v9 = vadd.f32 %v474_v54, %v464_v61  ;;  %v567_v11 = vmul.f32 %v3677_v47, %v3637_v20  ;;  %v568_v12 = vmul.f32 %v3677_v47, %v3639_v21  ;;  %v525_v13 = vsel %vm355_vm3, %v523_v63, %v524_v2  ;;  %v3237_v54 = vld [vmem:[%s3617_s9 + $0x60] sm:$0xf]  ;;  %v3240_v61 = vld [vmem:[%s3617_s9 + $0x6c] sm:$0x1] }
  0x3e   : > { %v597_v14 = vrot.slane %v565_v0, 2  ;;  %v598_v15 = vrot.slane %v566_v7, 2  ;;  %v639_v16 = vmul.f32 %v3691_v60, %v3637_v20  ;;  %v528_v18 = vsel %vm355_vm3, %v526_v3, %v527_v10  ;;  %v3748_v3 = vld [vmem:[%s5509_s1 + $0x9] ss:$0 sm:$0xff]  ;;  %v3753_v7 = vld [vmem:[%s5509_s1 + $0xa] ss:$0 sm:$0xff] }
  0x3f   : > { %v555_v19 = vadd.f32 %v525_v13, %v481_v1  ;;  %v600_v24 = vrot.slane %v567_v11, 2  ;;  %v601_v26 = vrot.slane %v568_v12, 2  ;;  %v556_v27 = vadd.f32 %v528_v18, %v482_v9  ;;  %v3759_v13 = vld [vmem:[%s5509_s1 + $0xb] ss:$0 sm:$0xff] }
  0x40   : > { %v599_v28 = vsel %vm430_vm4, %v597_v14, %v598_v15  ;;  %v640_v29 = vmul.f32 %v3691_v60, %v3641_v22  ;;  %v657_v31 = vmul.f32 %v3700_v8, %v3637_v20  ;;  %v658_v34 = vmul.f32 %v3700_v8, %v3639_v21 }
  0x41   : > { %v602_v32 = vsel %vm430_vm4, %v600_v24, %v601_v26  ;;  %v629_v33 = vadd.f32 %v599_v28, %v555_v19  ;;  %v659_v35 = vmul.f32 %v3700_v8, %v3641_v22  ;;  %v660_v38 = vmul.f32 %v3700_v8, %v3643_v23 }
  0x42   : > { %v630_v37 = vadd.f32 %v602_v32, %v556_v27  ;;  %v689_v40 = vrot.slane %v657_v31, 1  ;;  %v731_v41 = vmul.f32 %v3712_v17, %v3637_v20  ;;  %v690_v44 = vrot.slane %v658_v34, 1 }
  0x43   : > { %v647_v43 = vadd.f32 %v639_v16, %v629_v33  ;;  %v692_v45 = vrot.slane %v659_v35, 1  ;;  %v732_v46 = vmul.f32 %v3712_v17, %v3639_v21  ;;  %v693_v51 = vrot.slane %v660_v38, 1  ;;  %v3777_v33 = vld [vmem:[%s5509_s1 + $0xc] ss:$0 sm:$0xff] }
  0x44   : > { %v648_v50 = vadd.f32 %v640_v29, %v630_v37  ;;  %v733_v52 = vmul.f32 %v3712_v17, %v3641_v22  ;;  %v734_v53 = vmul.f32 %v3712_v17, %v3643_v23  ;;  %v691_v56 = vsel %vm355_vm3, %v689_v40, %v690_v44 }
  0x45   : > { %v763_v57 = vrot.slane %v731_v41, 2  ;;  %v764_v58 = vrot.slane %v732_v46, 2  ;;  %v827_v62 = vunpack.c.l.bf16 %v3233_v36  ;;  %v694_v63 = vsel %vm355_vm3, %v692_v45, %v693_v51 }
  0x46   : > { %v721_v0 = vadd.f32 %v691_v56, %v647_v43  ;;  %v766_v1 = vrot.slane %v733_v52, 2  ;;  %v767_v2 = vrot.slane %v734_v53, 2  ;;  %v722_v9 = vadd.f32 %v694_v63, %v648_v50  ;;  %v3786_v43 = vld [vmem:[%s5509_s1 + $0xd] ss:$0 sm:$0xff]  ;;  %v3795_v53 = vld [vmem:[%s5509_s1 + $0xe] ss:$0 sm:$0xff] }
  0x47   : > { %v765_v10 = vsel %vm430_vm4, %v763_v57, %v764_v58  ;;  %v828_v11 = vunpack.c.l.bf16 %v3234_v42  ;;  %v829_v12 = vunpack.c.l.bf16 %v3235_v48  ;;  %v830_v16 = vunpack.c.l.bf16 %v3236_v49 }
  0x48   : > { %v768_v14 = vsel %vm430_vm4, %v766_v1, %v767_v2  ;;  %v795_v15 = vadd.f32 %v765_v10, %v721_v0  ;;  %v3762_v18 = vunpack.c.l.bf16 %v3237_v54  ;;  %v3764_v24 = vunpack.c.l.bf16 %v3238_v55 }
  0x49   : > { %v796_v19 = vadd.f32 %v768_v14, %v722_v9  ;;  %v3766_v26 = vunpack.c.l.bf16 %v3239_v59  ;;  %v3768_v27 = vunpack.c.l.bf16 %v3240_v61  ;;  %v849_v28 = vmul.f32 %v3748_v3, %v827_v62  ;;  %v3809_v9 = vld [vmem:[%s5509_s1 + $0xf] ss:$0 sm:$0xff] }
  0x4a   : > { %v850_v29 = vmul.f32 %v3748_v3, %v829_v12  ;;  %v867_v31 = vmul.f32 %v3753_v7, %v827_v62  ;;  %v868_v32 = vmul.f32 %v3753_v7, %v828_v11  ;;  %v869_v34 = vmul.f32 %v3753_v7, %v829_v12 }
  0x4b   : > { %v870_v35 = vmul.f32 %v3753_v7, %v830_v16  ;;  %v941_v36 = vmul.f32 %v3759_v13, %v827_v62  ;;  %v942_v37 = vmul.f32 %v3759_v13, %v828_v11  ;;  %v857_v38 = vadd.f32 %v849_v28, %v795_v15 }
  0x4c   : > { %v858_v40 = vadd.f32 %v850_v29, %v796_v19  ;;  %v899_v41 = vrot.slane %v867_v31, 1  ;;  %v900_v42 = vrot.slane %v868_v32, 1  ;;  %v902_v44 = vrot.slane %v869_v34, 1  ;;  %v3818_v32 = vld [vmem:[%s5509_s1 + $0x10] ss:$0 sm:$0xff] }
  0x4d   : > { %v903_v45 = vrot.slane %v870_v35, 1  ;;  %v943_v46 = vmul.f32 %v3759_v13, %v829_v12  ;;  %v944_v48 = vmul.f32 %v3759_v13, %v830_v16  ;;  %v973_v50 = vrot.slane %v941_v36, 2 }
  0x4e   : > { %v901_v49 = vsel %vm355_vm3, %v899_v41, %v900_v42  ;;  %v974_v51 = vrot.slane %v942_v37, 2  ;;  %v1015_v52 = vmul.f32 %v3777_v33, %v829_v12  ;;  %v1016_v61 = vmul.f32 %v3777_v33, %v3762_v18  ;;  %v3830_v41 = vld [vmem:[%s5509_s1 + $0x11] ss:$0 sm:$0xff] }
  0x4f   : > { %v904_v54 = vsel %vm355_vm3, %v902_v44, %v903_v45  ;;  %v931_v55 = vadd.f32 %v901_v49, %v857_v38  ;;  %v976_v56 = vrot.slane %v943_v46, 2  ;;  %v977_v57 = vrot.slane %v944_v48, 2 }
  0x50   : > { %v932_v58 = vadd.f32 %v904_v54, %v858_v40  ;;  %v975_v59 = vsel %vm430_vm4, %v973_v50, %v974_v51  ;;  %v1033_v62 = vmul.f32 %v3786_v43, %v829_v12  ;;  %v1034_v1 = vmul.f32 %v3786_v43, %v830_v16 }
  0x51   : > { %v978_v63 = vsel %vm430_vm4, %v976_v56, %v977_v57  ;;  %v1005_v0 = vadd.f32 %v975_v59, %v931_v55  ;;  %v1035_v2 = vmul.f32 %v3786_v43, %v3762_v18  ;;  %v1036_v11 = vmul.f32 %v3786_v43, %v3764_v24 }
  0x52   : > { %v1006_v10 = vadd.f32 %v978_v63, %v932_v58  ;;  %v1065_v14 = vrot.slane %v1033_v62, 1  ;;  %v1107_v15 = vmul.f32 %v3795_v53, %v829_v12  ;;  %v1066_v28 = vrot.slane %v1034_v1, 1  ;;  %v3253_v62 = vld [vmem:[%s3617_s9 + $0xa0] sm:$0xf]  ;;  %v3254_v63 = vld [vmem:[%s3617_s9 + $0xa4] sm:$0x1] }
  0x53   : > { %v1023_v19 = vadd.f32 %v1015_v52, %v1005_v0  ;;  %v1068_v29 = vrot.slane %v1035_v2, 1  ;;  %v1108_v31 = vmul.f32 %v3795_v53, %v830_v16  ;;  %v1069_v35 = vrot.slane %v1036_v11, 1  ;;  %v3255_v11 = vld [vmem:[%s3617_s9 + $0xa8] sm:$0xf] }
  0x54   : > { %v1024_v34 = vadd.f32 %v1016_v61, %v1006_v10  ;;  %v1109_v36 = vmul.f32 %v3795_v53, %v3762_v18  ;;  %v1110_v37 = vmul.f32 %v3795_v53, %v3764_v24  ;;  %v1067_v12 = vsel %vm355_vm3, %v1065_v14, %v1066_v28  ;;  %v3256_v14 = vld [vmem:[%s3617_s9 + $0xac] sm:$0x1] }
  0x55   : > { %v1139_v38 = vrot.slane %v1107_v15, 2  ;;  %v1140_v40 = vrot.slane %v1108_v31, 2  ;;  %v1181_v16 = vmul.f32 %v3809_v9, %v3762_v18  ;;  %v1070_v42 = vsel %vm355_vm3, %v1068_v29, %v1069_v35  ;;  %v3257_v31 = vld [vmem:[%s3617_s9 + $0xb0] sm:$0xf] }
  0x56   : > { %v1097_v44 = vadd.f32 %v1067_v12, %v1023_v19  ;;  %v1142_v45 = vrot.slane %v1109_v36, 2  ;;  %v1143_v46 = vrot.slane %v1110_v37, 2  ;;  %v1098_v48 = vadd.f32 %v1070_v42, %v1024_v34  ;;  %v3258_v34 = vld [vmem:[%s3617_s9 + $0xb4] sm:$0x1]  ;;  %v3259_v12 = vld [vmem:[%s3617_s9 + $0xb8] sm:$0xf] }
  0x57   : > { %v1141_v49 = vsel %vm430_vm4, %v1139_v38, %v1140_v40  ;;  %v1182_v50 = vmul.f32 %v3809_v9, %v3766_v26  ;;  %v1199_v51 = vmul.f32 %v3818_v32, %v3762_v18  ;;  %v1200_v55 = vmul.f32 %v3818_v32, %v3764_v24  ;;  %v3260_v38 = vld [vmem:[%s3617_s9 + $0xbc] sm:$0x1] }
  0x58   : > { %v1144_v52 = vsel %vm430_vm4, %v1142_v45, %v1143_v46  ;;  %v1171_v54 = vadd.f32 %v1141_v49, %v1097_v44  ;;  %v1201_v56 = vmul.f32 %v3818_v32, %v3766_v26  ;;  %v1202_v58 = vmul.f32 %v3818_v32, %v3768_v27  ;;  %v3866_v46 = vld [vmem:[%s5509_s1 + $0x12] ss:$0 sm:$0xff] }
  0x59   : > { %v1172_v57 = vadd.f32 %v1144_v52, %v1098_v48  ;;  %v1231_v59 = vrot.slane %v1199_v51, 1  ;;  %v1273_v61 = vmul.f32 %v3830_v41, %v3762_v18  ;;  %v1232_v1 = vrot.slane %v1200_v55, 1  ;;  %v3871_v48 = vld [vmem:[%s5509_s1 + $0x13] ss:$0 sm:$0xff] }
  0x5a   : > { %v1189_v0 = vadd.f32 %v1181_v16, %v1171_v54  ;;  %v1234_v2 = vrot.slane %v1201_v56, 1  ;;  %v1274_v10 = vmul.f32 %v3830_v41, %v3764_v24  ;;  %v1235_v19 = vrot.slane %v1202_v58, 1  ;;  %v3877_v54 = vld [vmem:[%s5509_s1 + $0x14] ss:$0 sm:$0xff] }
  0x5b   : > { %v1190_v15 = vadd.f32 %v1182_v50, %v1172_v57  ;;  %v1275_v28 = vmul.f32 %v3830_v41, %v3766_v26  ;;  %v1276_v29 = vmul.f32 %v3830_v41, %v3768_v27  ;;  %v1233_v35 = vsel %vm355_vm3, %v1231_v59, %v1232_v1 }
  0x5c   : > { %v1305_v36 = vrot.slane %v1273_v61, 2  ;;  %v1306_v37 = vrot.slane %v1274_v10, 2  ;;  %v1369_v40 = vunpack.c.l.bf16 %v3253_v62  ;;  %v1236_v16 = vsel %vm355_vm3, %v1234_v2, %v1235_v19 }
  0x5d   : > { %v1263_v42 = vadd.f32 %v1233_v35, %v1189_v0  ;;  %v1308_v44 = vrot.slane %v1275_v28, 2  ;;  %v1309_v45 = vrot.slane %v1276_v29, 2  ;;  %v1264_v49 = vadd.f32 %v1236_v16, %v1190_v15 }
  0x5e   : > { %v1307_v50 = vsel %vm430_vm4, %v1305_v36, %v1306_v37  ;;  %v1370_v51 = vunpack.c.l.bf16 %v3254_v63  ;;  %v1371_v52 = vunpack.c.l.bf16 %v3255_v11  ;;  %v1372_v57 = vunpack.c.l.bf16 %v3256_v14  ;;  %v3895_v11 = vld [vmem:[%s5509_s1 + $0x15] ss:$0 sm:$0xff]  ;;  %v3904_v36 = vld [vmem:[%s5509_s1 + $0x16] ss:$0 sm:$0xff] }
  0x5f   : > { %v1310_v55 = vsel %vm430_vm4, %v1308_v44, %v1309_v45  ;;  %v1337_v56 = vadd.f32 %v1307_v50, %v1263_v42  ;;  %v3880_v58 = vunpack.c.l.bf16 %v3257_v31  ;;  %v3882_v61 = vunpack.c.l.bf16 %v3258_v34 }
  0x60   : > { %v1338_v59 = vadd.f32 %v1310_v55, %v1264_v49  ;;  %v3884_v62 = vunpack.c.l.bf16 %v3259_v12  ;;  %v3886_v0 = vunpack.c.l.bf16 %v3260_v38  ;;  %v1391_v63 = vmul.f32 %v3866_v46, %v1369_v40  ;;  %v3913_v49 = vld [vmem:[%s5509_s1 + $0x17] ss:$0 sm:$0xff] }
  0x61   : > { %v1392_v1 = vmul.f32 %v3866_v46, %v1371_v52  ;;  %v1409_v2 = vmul.f32 %v3871_v48, %v1369_v40  ;;  %v1410_v10 = vmul.f32 %v3871_v48, %v1370_v51  ;;  %v1411_v14 = vmul.f32 %v3871_v48, %v1371_v52 }
  0x62   : > { %v1412_v15 = vmul.f32 %v3871_v48, %v1372_v57  ;;  %v1483_v19 = vmul.f32 %v3877_v54, %v1369_v40  ;;  %v1484_v28 = vmul.f32 %v3877_v54, %v1370_v51  ;;  %v1399_v29 = vadd.f32 %v1391_v63, %v1337_v56 }
  0x63   : > { %v1400_v31 = vadd.f32 %v1392_v1, %v1338_v59  ;;  %v1441_v34 = vrot.slane %v1409_v2, 1  ;;  %v1442_v35 = vrot.slane %v1410_v10, 1  ;;  %v1444_v37 = vrot.slane %v1411_v14, 1 }
  0x64   : > { %v1445_v12 = vrot.slane %v1412_v15, 1  ;;  %v1485_v38 = vmul.f32 %v3877_v54, %v1371_v52  ;;  %v1486_v16 = vmul.f32 %v3877_v54, %v1372_v57  ;;  %v1515_v40 = vrot.slane %v1483_v19, 2 }
  0x65   : > { %v1443_v42 = vsel %vm355_vm3, %v1441_v34, %v1442_v35  ;;  %v1516_v44 = vrot.slane %v1484_v28, 2  ;;  %v1557_v45 = vmul.f32 %v3895_v11, %v1371_v52  ;;  %v1558_v1 = vmul.f32 %v3895_v11, %v3880_v58  ;;  %v3927_v28 = vld [vmem:[%s5509_s1 + $0x18] ss:$0 sm:$0xff] }
  0x66   : > { %v1446_v50 = vsel %vm355_vm3, %v1444_v37, %v1445_v12  ;;  %v1473_v51 = vadd.f32 %v1443_v42, %v1399_v29  ;;  %v1518_v55 = vrot.slane %v1485_v38, 2  ;;  %v1519_v56 = vrot.slane %v1486_v16, 2  ;;  %v3936_v42 = vld [vmem:[%s5509_s1 + $0x19] ss:$0 sm:$0xff] }
  0x67   : > { %v1474_v59 = vadd.f32 %v1446_v50, %v1400_v31  ;;  %v1517_v63 = vsel %vm430_vm4, %v1515_v40, %v1516_v44  ;;  %v1575_v2 = vmul.f32 %v3904_v36, %v1371_v52  ;;  %v1576_v15 = vmul.f32 %v3904_v36, %v1372_v57  ;;  %5546 = vst [vmem:[#allocation4_spill] sm:$0xff] %v3936_v42 }
  0x68   : > { %v1520_v10 = vsel %vm430_vm4, %v1518_v55, %v1519_v56  ;;  %v1547_v14 = vadd.f32 %v1517_v63, %v1473_v51  ;;  %v1577_v19 = vmul.f32 %v3904_v36, %v3880_v58  ;;  %v1578_v31 = vmul.f32 %v3904_v36, %v3882_v61  ;;  %v3948_v56 = vld [vmem:[%s5509_s1 + $0x1a] ss:$0 sm:$0xff] }
  0x69   : > { %v1548_v29 = vadd.f32 %v1520_v10, %v1474_v59  ;;  %v1607_v34 = vrot.slane %v1575_v2, 1  ;;  %v1649_v35 = vmul.f32 %v3913_v49, %v1371_v52  ;;  %v1608_v12 = vrot.slane %v1576_v15, 1  ;;  %5547 = vst [vmem:[#allocation5_spill] sm:$0xff] %v3948_v56 }
  0x6a   : > { %v1565_v37 = vadd.f32 %v1557_v45, %v1547_v14  ;;  %v1610_v38 = vrot.slane %v1577_v19, 1  ;;  %v1650_v16 = vmul.f32 %v3913_v49, %v1372_v57  ;;  %v1611_v44 = vrot.slane %v1578_v31, 1 }
  0x6b   : > { %v1566_v40 = vadd.f32 %v1558_v1, %v1548_v29  ;;  %v1651_v50 = vmul.f32 %v3913_v49, %v3880_v58  ;;  %v1652_v51 = vmul.f32 %v3913_v49, %v3882_v61  ;;  %v1609_v52 = vsel %vm355_vm3, %v1607_v34, %v1608_v12 }
  0x6c   : > { %v1681_v45 = vrot.slane %v1649_v35, 2  ;;  %v1682_v55 = vrot.slane %v1650_v16, 2  ;;  %v1723_v57 = vmul.f32 %v3927_v28, %v3880_v58  ;;  %v1612_v59 = vsel %vm355_vm3, %v1610_v38, %v1611_v44 }
  0x6d   : > { %v1639_v63 = vadd.f32 %v1609_v52, %v1565_v37  ;;  %v1684_v1 = vrot.slane %v1651_v50, 2  ;;  %v1685_v2 = vrot.slane %v1652_v51, 2  ;;  %v1640_v10 = vadd.f32 %v1612_v59, %v1566_v40 }
  0x6e   : > { %v1683_v14 = vsel %vm430_vm4, %v1681_v45, %v1682_v55  ;;  %v1724_v15 = vmul.f32 %v3927_v28, %v3884_v62  ;;  %v1741_v19 = vmul.f32 %v3936_v42, %v3880_v58  ;;  %v1742_v34 = vmul.f32 %v3936_v42, %v3882_v61 }
  0x6f   : > { %v1686_v29 = vsel %vm430_vm4, %v1684_v1, %v1685_v2  ;;  %v1713_v31 = vadd.f32 %v1683_v14, %v1639_v63  ;;  %v1743_v35 = vmul.f32 %v3936_v42, %v3884_v62  ;;  %v1744_v12 = vmul.f32 %v3936_v42, %v3886_v0 }
  0x70   : > { %v1714_v37 = vadd.f32 %v1686_v29, %v1640_v10  ;;  %v1773_v38 = vrot.slane %v1741_v19, 1  ;;  %v1815_v16 = vmul.f32 %v3948_v56, %v3880_v58  ;;  %v1774_v44 = vrot.slane %v1742_v34, 1 }
  0x71   : > { %v1731_v40 = vadd.f32 %v1723_v57, %v1713_v31  ;;  %v1776_v50 = vrot.slane %v1743_v35, 1  ;;  %v1816_v51 = vmul.f32 %v3948_v56, %v3882_v61  ;;  %v1777_v45 = vrot.slane %v1744_v12, 1 }
  0x72   : > { %v1732_v52 = vadd.f32 %v1724_v15, %v1714_v37  ;;  %v1817_v55 = vmul.f32 %v3948_v56, %v3884_v62  ;;  %v1818_v59 = vmul.f32 %v3948_v56, %v3886_v0  ;;  %v1775_v63 = vsel %vm355_vm3, %v1773_v38, %v1774_v44 }
  0x73   : > { %v1847_v1 = vrot.slane %v1815_v16, 2  ;;  %v1848_v2 = vrot.slane %v1816_v51, 2  ;;  %v1778_v10 = vsel %vm355_vm3, %v1776_v50, %v1777_v45  ;;  %v1805_v57 = vadd.f32 %v1775_v63, %v1731_v40 }
  0x74   : > { %v1850_v14 = vrot.slane %v1817_v55, 2  ;;  %v1851_v19 = vrot.slane %v1818_v59, 2  ;;  %v1806_v29 = vadd.f32 %v1778_v10, %v1732_v52  ;;  %v307_v35 = vmul.f32 %v3622_v5, %v3637_v20 }
  0x75   : > { %v1849_v31 = vsel %vm430_vm4, %v1847_v1, %v1848_v2  ;;  %v327_v12 = vmul.f32 %v3627_v6, %v3637_v20  ;;  %v328_v38 = vmul.f32 %v3627_v6, %v3639_v21  ;;  %v329_v40 = vmul.f32 %v3627_v6, %v3641_v22 }
  0x76   : > { %v1852_v15 = vsel %vm430_vm4, %v1850_v14, %v1851_v19  ;;  %v3975_v34 = vadd.f32 %v1849_v31, %v1805_v57  ;;  %v330_v44 = vmul.f32 %v3627_v6, %v3643_v23  ;;  %v308_v51 = vmul.f32 %v3622_v5, %v3641_v22  ;;  %v271_v19 = vld [vmem:[%s3617_s9 + $0x20] sm:$0xf] }
  0x77   : > { %v3979_v37 = vadd.f32 %v1852_v15, %v1806_v29  ;;  %v362_v52 = vrot.slane %v327_v12, 1  ;;  %v363_v45 = vrot.slane %v328_v38, 1  ;;  %v315_v59 = vadd.f32 %v3614_v4, %v307_v35  ;;  %v272_v29 = vld [vmem:[%s3617_s9 + $0x24] sm:$0x1] }
  0x78   : > { %v3986_v16 = vmul.f32 0.70710677, %v3975_v34  ;;  %v365_v63 = vrot.slane %v329_v40, 1  ;;  %v366_v1 = vrot.slane %v330_v44, 1  ;;  %v402_v6 = vmul.f32 %v3649_v25, %v3637_v20 }
  0x79   : > { %v3993_v50 = vmul.f32 0.70710677, %v3979_v37  ;;  %v364_v10 = vsel %vm355_vm3, %v362_v52, %v363_v45  ;;  %v403_v57 = vmul.f32 %v3649_v25, %v3639_v21  ;;  %v316_v31 = vadd.f32 %v3614_v4, %v308_v51 }
  0x7a   : > { %v1895_v55 = vand.u32 2147483647, %v3986_v16  ;;  %v404_v15 = vmul.f32 %v3649_v25, %v3641_v22  ;;  %v367_v12 = vsel %vm355_vm3, %v365_v63, %v366_v1  ;;  %v390_v38 = vadd.f32 %v364_v10, %v315_v59 }
  0x7b   : > { %v1896_v2 = vand.u32 2147483647, %v3993_v50  ;;  %v405_v40 = vmul.f32 %v3649_v25, %v3643_v23  ;;  %v437_v52 = vrot.slane %v402_v6, 2  ;;  %v438_v21 = vrot.slane %v403_v57, 2 }
  0x7c   : > { %v1903_v14 = vmul.f32 0.3275911, %v1895_v55  ;;  %v1999_v44 = vsub.f32 0.0, %v1895_v55  ;;  %v4013_v56 = vunpack.c.l.bf16 %v271_v19  ;;  %v4015_v42 = vunpack.c.l.bf16 %v272_v29 }
  0x7d   : > { %v1904_v5 = vmul.f32 0.3275911, %v1896_v2  ;;  %v2000_v45 = vsub.f32 0.0, %v1896_v2  ;;  %v391_v4 = vadd.f32 %v367_v12, %v316_v31  ;;  %v439_v51 = vsel %vm430_vm4, %v437_v52, %v438_v21 }
  0x7e   : > { %v1911_v35 = vadd.f32 1.0, %v1903_v14  ;;  %v440_v14 = vrot.slane %v404_v15, 2  ;;  %v441_v63 = vrot.slane %v405_v40, 2  ;;  %v465_v59 = vadd.f32 %v439_v51, %v390_v38 }
  0x7f   : > { %v1912_v20 = vadd.f32 1.0, %v1904_v5  ;;  %v475_v25 = vmul.f32 %v3658_v30, %v3641_v22  ;;  %v2007_v1 = vmul.f32 %v1999_v44, %v1895_v55  ;;  %v476_v10 = vmul.f32 %v3658_v30, %v4013_v56 }
  0x80   : > { %3387 = vrcp.f32 %v1911_v35  ;;  %v495_v6 = vmul.f32 %v3668_v39, %v3641_v22  ;;  %v496_v57 = vmul.f32 %v3668_v39, %v3643_v23  ;;  %v442_v5 = vsel %vm430_vm4, %v440_v14, %v441_v63 }
  0x81   : > { %3389 = vrcp.f32 %v1912_v20  ;;  %v483_v19 = vadd.f32 %v475_v25, %v465_v59  ;;  %v497_v29 = vmul.f32 %v3668_v39, %v4013_v56  ;;  %v498_v31 = vmul.f32 %v3668_v39, %v4015_v42  ;;  %v273_v39 = vld [vmem:[%s3617_s9 + $0x28] sm:$0xf] }
  0x82   : > { %v2008_v55 = vmul.f32 %v2000_v45, %v1896_v2  ;;  %v466_v15 = vadd.f32 %v442_v5, %v391_v4  ;;  %v529_v35 = vrot.slane %v495_v6, 1  ;;  %v530_v30 = vrot.slane %v496_v57, 1  ;;  %v274_v5 = vld [vmem:[%s3617_s9 + $0x2c] sm:$0x1] }
  0x83   : > { %v532_v38 = vrot.slane %v497_v29, 1  ;;  %v533_v40 = vrot.slane %v498_v31, 1  ;;  %v569_v20 = vmul.f32 %v3677_v47, %v3641_v22  ;;  %v570_v44 = vmul.f32 %v3677_v47, %v3643_v23 }
  0x84   : > { %v484_v2 = vadd.f32 %v476_v10, %v466_v15  ;;  %v531_v45 = vsel %vm355_vm3, %v529_v35, %v530_v30  ;;  %v571_v4 = vmul.f32 %v3677_v47, %v4013_v56  ;;  %v572_v23 = vmul.f32 %v3677_v47, %v4015_v42 }
  0x85   : > { %v534_v14 = vsel %vm355_vm3, %v532_v38, %v533_v40  ;;  %v557_v22 = vadd.f32 %v531_v45, %v483_v19  ;;  %v2015_v59 = vmul.f32 1.442695, %v2007_v1  ;;  %v603_v25 = vrot.slane %v569_v20, 2 }
  0x86   : > { %v4031_v12 = vpop.eup %3387  ;;  %v604_v6 = vrot.slane %v570_v44, 2  ;;  %v4049_v10 = vunpack.c.l.bf16 %v273_v39  ;;  %v606_v29 = vrot.slane %v571_v4, 2  ;;  %v607_v31 = vrot.slane %v572_v23, 2 }
  0x87   : > { %v4037_v52 = vpop.eup %3389  ;;  %v1927_v21 = vmul.f32 1.0614054, %v4031_v12  ;;  %v2017_v35 = vmul.f32 1.442695, %v2008_v55  ;;  %v558_v30 = vadd.f32 %v534_v14, %v484_v2  ;;  %v641_v1 = vmul.f32 %v3691_v60, %v4013_v56 }
  0x88   : > { %v1928_v51 = vmul.f32 1.0614054, %v4037_v52  ;;  %v605_v38 = vsel %vm430_vm4, %v603_v25, %v604_v6  ;;  %v608_v47 = vsel %vm430_vm4, %v606_v29, %v607_v31  ;;  %3391 = vpow2.f32 %v2015_v59 }
  0x89   : > { %v1935_v63 = vadd.f32 -1.4531521, %v1927_v21  ;;  %v631_v40 = vadd.f32 %v605_v38, %v557_v22  ;;  %v4057_v44 = vunpack.c.l.bf16 %v274_v5  ;;  %v642_v39 = vmul.f32 %v3691_v60, %v4049_v10 }
  0x8a   : > { %v1936_v57 = vadd.f32 -1.4531521, %v1928_v51  ;;  %v661_v55 = vmul.f32 %v3700_v8, %v4013_v56  ;;  %v662_v2 = vmul.f32 %v3700_v8, %v4015_v42  ;;  %v632_v4 = vadd.f32 %v608_v47, %v558_v30 }
  0x8b   : > { %v1943_v15 = vmul.f32 %v4031_v12, %v1935_v63  ;;  %v663_v51 = vmul.f32 %v3700_v8, %v4049_v10  ;;  %v664_v14 = vmul.f32 %v3700_v8, %v4057_v44  ;;  %3393 = vpow2.f32 %v2017_v35 }
  0x8c   : > { %v1944_v19 = vmul.f32 %v4037_v52, %v1936_v57  ;;  %v649_v23 = vadd.f32 %v641_v1, %v631_v40  ;;  %v695_v60 = vrot.slane %v661_v55, 1  ;;  %v696_v59 = vrot.slane %v662_v2, 1 }
  0x8d   : > { %v1951_v20 = vadd.f32 1.4214138, %v1943_v15  ;;  %v698_v25 = vrot.slane %v663_v51, 1  ;;  %v699_v6 = vrot.slane %v664_v14, 1  ;;  %v735_v5 = vmul.f32 %v3712_v17, %v4013_v56 }
  0x8e   : > { %v1952_v21 = vadd.f32 1.4214138, %v1944_v19  ;;  %v736_v29 = vmul.f32 %v3712_v17, %v4015_v42  ;;  %v737_v31 = vmul.f32 %v3712_v17, %v4049_v10  ;;  %v3392_v8 = vpop.eup %3391  ;;  %v650_v35 = vadd.f32 %v642_v39, %v632_v4 }
  0x8f   : > { %v1959_v45 = vmul.f32 %v4031_v12, %v1951_v20  ;;  %v697_v30 = vsel %vm355_vm3, %v695_v60, %v696_v59  ;;  %v738_v38 = vmul.f32 %v3712_v17, %v4057_v44  ;;  %v700_v47 = vsel %vm355_vm3, %v698_v25, %v699_v6 }
  0x90   : > { %v1960_v22 = vmul.f32 %v4037_v52, %v1952_v21  ;;  %v723_v1 = vadd.f32 %v697_v30, %v649_v23  ;;  %v769_v20 = vrot.slane %v735_v5, 2  ;;  %v770_v21 = vrot.slane %v736_v29, 2 }
  0x91   : > { %v1967_v63 = vadd.f32 -0.28449672, %v1959_v45  ;;  %v3394_v55 = vpop.eup %3393  ;;  %v772_v45 = vrot.slane %v737_v31, 2  ;;  %v773_v51 = vrot.slane %v738_v38, 2  ;;  %v724_v4 = vadd.f32 %v700_v47, %v650_v35 }
  0x92   : > { %v1968_v57 = vadd.f32 -0.28449672, %v1960_v22  ;;  %v771_v14 = vsel %vm430_vm4, %v769_v20, %v770_v21  ;;  %v3241_v22 = vld [vmem:[%s3617_s9 + $0x70] sm:$0xf]  ;;  %vm2047_vm5 = vcmp.ge.f32.partialorder %v3986_v16, 0.0  ;;  %vm2048_vm6 = vcmp.ge.f32.partialorder %v3993_v50, 0.0 }
  0x93   : > { %v1975_v15 = vmul.f32 %v4031_v12, %v1967_v63  ;;  %v774_v23 = vsel %vm430_vm4, %v772_v45, %v773_v51  ;;  %v2071_v63 = vmul.f32 0.5, %v3975_v34  ;;  %v797_v59 = vadd.f32 %v771_v14, %v723_v1  ;;  %v3244_v45 = vld [vmem:[%s3617_s9 + $0x7c] sm:$0x1] }
  0x94   : > { %v1976_v19 = vmul.f32 %v4037_v52, %v1968_v57  ;;  %v851_v25 = vmul.f32 %v3748_v3, %v3762_v18  ;;  %v2072_v6 = vmul.f32 0.5, %v3979_v37  ;;  %v3242_v57 = vld [vmem:[%s3617_s9 + $0x74] sm:$0x1]  ;;  %v4095_v5 = vunpack.c.l.bf16 %v3241_v22 }
  0x95   : > { %v1983_v40 = vadd.f32 0.2548296, %v1975_v15  ;;  %v798_v31 = vadd.f32 %v774_v23, %v724_v4  ;;  %v852_v34 = vmul.f32 %v3748_v3, %v3766_v26  ;;  %v873_v37 = vmul.f32 %v3753_v7, %v3766_v26  ;;  %v3243_v3 = vld [vmem:[%s3617_s9 + $0x78] sm:$0xf] }
  0x96   : > { %v1984_v2 = vadd.f32 0.2548296, %v1976_v19  ;;  %v874_v35 = vmul.f32 %v3753_v7, %v3768_v27  ;;  %v4107_v19 = vunpack.c.l.bf16 %v3242_v57  ;;  %v859_v47 = vadd.f32 %v851_v25, %v797_v59 }
  0x97   : > { %v1991_v39 = vmul.f32 %v4031_v12, %v1983_v40  ;;  %vm2198_vm8 = vcmask 24592   ;;  %vm2199_vm9 = vsmask.f32 256  ;;  %v908_v20 = vrot.slane %v873_v37, 1 }
  0x98   : > { %v1992_v17 = vmul.f32 %v4037_v52, %v1984_v2  ;;  %v871_v52 = vmul.f32 %v3753_v7, %v3762_v18  ;;  %v909_v21 = vrot.slane %v874_v35, 1  ;;  %v946_v51 = vmul.f32 %v3759_v13, %v3764_v24  ;;  %vm4165_vm14 = vmand %vm2198_vm8, %vm2199_vm9 }
  0x99   : > { %v2031_v60 = vmul.f32 %v3392_v8, %v1991_v39  ;;  %v872_v8 = vmul.f32 %v3753_v7, %v3764_v24  ;;  %v860_v7 = vadd.f32 %v852_v34, %v798_v31  ;;  %v947_v39 = vmul.f32 %v3759_v13, %v3766_v26 }
  0x9a   : > { %v2032_v12 = vmul.f32 %v3394_v55, %v1992_v17  ;;  %v905_v30 = vrot.slane %v871_v52, 1  ;;  %v945_v55 = vmul.f32 %v3759_v13, %v3762_v18  ;;  %vm2192_vm10 = vcmask 27664  }
  0x9b   : > { %v2039_v29 = vsub.f32 1.0, %v2031_v60  ;;  %v906_v40 = vrot.slane %v872_v8, 1  ;;  %vm2193_vm11 = vsmask.f32 7938  ;;  %v910_v18 = vsel %vm355_vm3, %v908_v20, %v909_v21 }
  0x9c   : > { %v2040_v15 = vsub.f32 1.0, %v2032_v12  ;;  %v4123_v17 = vunpack.c.l.bf16 %v3243_v3  ;;  %v948_v23 = vmul.f32 %v3759_v13, %v3768_v27  ;;  %v979_v24 = vrot.slane %v945_v55, 2  ;;  %vm4175_vm15 = vmand %vm2192_vm10, %vm2193_vm11 }
  0x9d   : > { %v2055_v38 = vsub.f32 0.0, %v2039_v29  ;;  %v907_v22 = vsel %vm355_vm3, %v905_v30, %v906_v40  ;;  %v4127_v59 = vunpack.c.l.bf16 %v3244_v45  ;;  %v980_v25 = vrot.slane %v946_v51, 2  ;;  %v2201_v51 = vld [vmem:[#allocation2 + $0x4] sm:$0x1] }
  0x9e   : > { %v2056_v1 = vsub.f32 0.0, %v2040_v15  ;;  %v982_v50 = vrot.slane %v947_v39, 2  ;;  %v933_v57 = vadd.f32 %v907_v22, %v859_v47  ;;  %v934_v52 = vadd.f32 %v910_v18, %v860_v7  ;;  %v5279_v7 = vld [vmem:[%s5512_s4] ss:$0 sm:$0xff] }
  0x9f   : > { %v2063_v2 = vsel %vm2047_vm5, %v2039_v29, %v2055_v38  ;;  %v983_v29 = vrot.slane %v948_v23, 2  ;;  %v1017_v34 = vmul.f32 %v3777_v33, %v3766_v26  ;;  %v1018_v8 = vmul.f32 %v3777_v33, %v4095_v5 }
  0xa0   : > { %v2064_v4 = vsel %vm2048_vm6, %v2040_v15, %v2056_v1  ;;  %v2079_v14 = vadd.f32 1.0, %v2063_v2  ;;  %v4137_v13 = vmul.f32 %v3786_v43, %v3766_v26  ;;  %v981_v15 = vsel %vm430_vm4, %v979_v24, %v980_v25 }
  0xa1   : > { %v2080_v16 = vadd.f32 1.0, %v2064_v4  ;;  %v4148_v37 = vmul.f32 %v3786_v43, %v4095_v5  ;;  %vm2286_vm12 = vcmask 44065   ;;  %v984_v38 = vsel %vm430_vm4, %v982_v50, %v983_v29 }
  0xa2   : > { %v2087_v60 = vmul.f32 %v2079_v14, %v2071_v63  ;;  %vm2288_vm13 = vcmask 40992   ;;  %v1007_v14 = vadd.f32 %v981_v15, %v933_v57  ;;  %v1040_v24 = vmul.f32 %v3786_v43, %v4107_v19 }
  0xa3   : > { %v2088_v12 = vmul.f32 %v2080_v16, %v2072_v6  ;;  %v4144_v6 = vmul.f32 %v3786_v43, %v3768_v27  ;;  %v2207_v16 = vld [vmem:[#allocation2 + $0xc] sm:$0x1]  ;;  %v5550_v50 = vmov 0  ;;  %vm2352_vm0 = vcmask 60465  }
  0xa4   : > { %v4129_v31 = vpack.c.bf16 %v2087_v60, %v2087_v60  ;;  %v5551_v50 = vsel %vm4175_vm15, 4294967295, %v5550_v50  ;;  %vm2353_vm1 = vsmask.f32 7942  ;;  %vm2358_vm2 = vcmask 58416  }
  0xa5   : > { %v4139_v63 = vpack.c.bf16 %v2088_v12, %v2088_v12  ;;  %5552 = vst [vmem:[#allocation6_spill] sm:$0xff] %v5551_v50  ;;  %vm2359_vm5 = vsmask.f32 1280  ;;  %vm2438_vm6 = vcmask 76866   ;;  %vm2440_vm8 = vcmask 74816   ;;  %vm4238_vm9 = vmand %vm2352_vm0, %vm2353_vm1 }
  0xa6   : > { %2104 = vst.msk [vmem:[#allocation2] sm:$0xf] %vm2103_vm7, %v4129_v31  ;;  %v2113_v33 = vshrl.u32 %v4129_v31, 16  ;;  %v2116_v35 = vshll.u32 %v4129_v31, 16  ;;  %v2254_v30 = vrot.slane %v4129_v31, 7  ;;  %v2406_v3 = vrot.slane %v4129_v31, 6  ;;  %vm4246_vm10 = vmand %vm2358_vm2, %vm2359_vm5 }
  0xa7   : > { %2105 = vst.msk [vmem:[#allocation2 + $0x8] sm:$0xf] %vm2103_vm7, %v4139_v63  ;;  %v2121_v47 = vshrl.u32 %v4139_v63, 16  ;;  %v2124_v40 = vshll.u32 %v4139_v63, 16  ;;  %v2256_v1 = vrot.slane %v4139_v63, 7  ;;  %v2408_v2 = vrot.slane %v4139_v63, 6 }
  0xa8   : > { %v2115_v20 = vrot.slane %v2113_v33, 7  ;;  %v2304_v21 = vrot.slane %v2113_v33, 6  ;;  %v2305_v55 = vrot.slane %v2116_v35, 7  ;;  %v2255_v12 = vrot.slane %v2254_v30, 4 }
  0xa9   : > { %v2123_v45 = vrot.slane %v2121_v47, 7  ;;  %v2308_v39 = vrot.slane %v2121_v47, 6  ;;  %v2309_v4 = vrot.slane %v2124_v40, 7  ;;  %v2257_v15 = vrot.slane %v2256_v1, 4 }
  0xaa   : > { %v2118_v22 = vor.u32 %v2116_v35, %v2115_v20  ;;  %v2119_v18 = vrot.slane %v2115_v20, 4  ;;  %v4169_v23 = vor.u32 %v2305_v55, %v2304_v21  ;;  %v4187_v43 = vrot.slane %v2406_v3, 4 }
  0xab   : > { %v2126_v60 = vor.u32 %v2124_v40, %v2123_v45  ;;  %v2127_v25 = vrot.slane %v2123_v45, 4  ;;  %v4179_v29 = vor.u32 %v2309_v4, %v2308_v39  ;;  %v4191_v33 = vrot.slane %v2408_v2, 4 }
  0xac   : > { %v2202_v57 = vsel %vm4165_vm14, %v2119_v18, %v2201_v51  ;;  %v2307_v40 = vrot.slane %v4169_v23, 4  ;;  %v1008_v21 = vadd.f32 %v984_v38, %v934_v52  ;;  %v1025_v51 = vadd.f32 %v1017_v34, %v1007_v14 }
  0xad   : > { %v2195_v35 = vld [vmem:[#allocation2] sm:$0xf]  ;;  %2203 = vst [vmem:[#allocation2 + $0x4] sm:$0x1] %v2202_v57  ;;  %v2208_v47 = vsel %vm4165_vm14, %v2127_v25, %v2207_v16  ;;  %v2311_v20 = vrot.slane %v4179_v29, 4  ;;  %v1071_v39 = vrot.slane %v4137_v13, 1  ;;  %v1111_v4 = vmul.f32 %v3795_v53, %v3766_v26 }
  0xae   : > { %v2196_v55 = vsel %vm4175_vm15, %v2118_v22, %v2195_v35  ;;  %v2204_v45 = vld [vmem:[#allocation2 + $0x8] sm:$0xf]  ;;  %2209 = vst [vmem:[#allocation2 + $0xc] sm:$0x1] %v2208_v47  ;;  %v1026_v16 = vadd.f32 %v1018_v8, %v1008_v21  ;;  %v1072_v25 = vrot.slane %v4144_v6, 1  ;;  %v1074_v52 = vrot.slane %v4148_v37, 1 }
  0xaf   : > { %2197 = vst [vmem:[#allocation2] sm:$0xf] %v2196_v55  ;;  %v2205_v18 = vsel %vm4175_vm15, %v2126_v60, %v2204_v45  ;;  %v1075_v38 = vrot.slane %v1040_v24, 1  ;;  %v1112_v22 = vmul.f32 %v3795_v53, %v3768_v27  ;;  %v1113_v34 = vmul.f32 %v3795_v53, %v4095_v5 }
  0xb0   : > { %2206 = vst [vmem:[#allocation2 + $0x8] sm:$0xf] %v2205_v18  ;;  %v1114_v26 = vmul.f32 %v3795_v53, %v4107_v19  ;;  %v1073_v13 = vsel %vm355_vm3, %v1071_v39, %v1072_v25  ;;  %v1145_v8 = vrot.slane %v1111_v4, 2  ;;  %v1183_v6 = vmul.f32 %v3809_v9, %v4095_v5 }
  0xb1   : > { %2287 = vst.msk [vmem:[#allocation2] sm:$0xe] %vm2286_vm12, %v2254_v30  ;;  %v1184_v37 = vmul.f32 %v3809_v9, %v4123_v17  ;;  %v1076_v27 = vsel %vm355_vm3, %v1074_v52, %v1075_v38  ;;  %v1099_v14 = vadd.f32 %v1073_v13, %v1025_v51  ;;  %v1146_v24 = vrot.slane %v1112_v22, 2 }
  0xb2   : > { %2289 = vst.msk [vmem:[#allocation2 + $0x4] sm:$0x1] %vm2288_vm13, %v2255_v12  ;;  %v1148_v60 = vrot.slane %v1113_v34, 2  ;;  %v1100_v53 = vadd.f32 %v1076_v27, %v1026_v16  ;;  %v1149_v30 = vrot.slane %v1114_v26, 2  ;;  %v1203_v57 = vmul.f32 %v3818_v32, %v4095_v5  ;;  %v3261_v34 = vld [vmem:[%s3617_s9 + $0xc0] sm:$0xf] }
  0xb3   : > { %2290 = vst.msk [vmem:[#allocation2 + $0x8] sm:$0xe] %vm2286_vm12, %v2256_v1  ;;  %v1204_v9 = vmul.f32 %v3818_v32, %v4107_v19  ;;  %v1147_v12 = vsel %vm430_vm4, %v1145_v8, %v1146_v24  ;;  %v1205_v35 = vmul.f32 %v3818_v32, %v4123_v17  ;;  %v1206_v1 = vmul.f32 %v3818_v32, %v4127_v59  ;;  %v3262_v26 = vld [vmem:[%s3617_s9 + $0xc4] sm:$0x1] }
  0xb4   : > { %2291 = vst.msk [vmem:[#allocation2 + $0xc] sm:$0x1] %vm2288_vm13, %v2257_v15  ;;  %v1277_v47 = vmul.f32 %v3830_v41, %v4095_v5  ;;  %v1150_v21 = vsel %vm430_vm4, %v1148_v60, %v1149_v30  ;;  %v1173_v55 = vadd.f32 %v1147_v12, %v1099_v14  ;;  %v1237_v45 = vrot.slane %v1203_v57, 1  ;;  %v3263_v60 = vld [vmem:[%s3617_s9 + $0xc8] sm:$0xf] }
  0xb5   : > { %v1238_v51 = vrot.slane %v1204_v9, 1  ;;  %v1174_v39 = vadd.f32 %v1150_v21, %v1100_v53  ;;  %v1240_v4 = vrot.slane %v1205_v35, 1  ;;  %v1241_v32 = vrot.slane %v1206_v1, 1  ;;  %v3264_v12 = vld [vmem:[%s3617_s9 + $0xcc] sm:$0x1] }
  0xb6   : > { %v1278_v18 = vmul.f32 %v3830_v41, %v4107_v19  ;;  %v5555_v16 = vmov 0  ;;  %v1191_v25 = vadd.f32 %v1183_v6, %v1173_v55  ;;  %v1279_v38 = vmul.f32 %v3830_v41, %v4123_v17 }
  0xb7   : > { %v5556_v16 = vsel %vm4246_vm10, 4294967295, %v5555_v16  ;;  %v1239_v52 = vsel %vm355_vm3, %v1237_v45, %v1238_v51  ;;  %v1280_v22 = vmul.f32 %v3830_v41, %v4127_v59  ;;  %v1192_v8 = vadd.f32 %v1184_v37, %v1174_v39 }
  0xb8   : > { %5557 = vst [vmem:[#allocation7_spill] sm:$0xff] %v5556_v16  ;;  %v2355_v13 = vld [vmem:[#allocation2] sm:$0xe]  ;;  %v1242_v27 = vsel %vm355_vm3, %v1240_v4, %v1241_v32  ;;  %v1311_v14 = vrot.slane %v1277_v47, 2  ;;  %v1312_v24 = vrot.slane %v1278_v18, 2  ;;  %v1265_v30 = vadd.f32 %v1239_v52, %v1191_v25 }
  0xb9   : > { %v2356_v6 = vsel %vm4238_vm9, %v4169_v23, %v2355_v13  ;;  %v2361_v53 = vld [vmem:[#allocation2 + $0x4] sm:$0x3]  ;;  %v1314_v57 = vrot.slane %v1279_v38, 2  ;;  %v1315_v9 = vrot.slane %v1280_v22, 2  ;;  %v1266_v35 = vadd.f32 %v1242_v27, %v1192_v8 }
  0xba   : > { %2357 = vst [vmem:[#allocation2] sm:$0xe] %v2356_v6  ;;  %v2362_v41 = vsel %vm4246_vm10, %v2307_v40, %v2361_v53  ;;  %v2364_v37 = vld [vmem:[#allocation2 + $0x8] sm:$0xe]  ;;  %v1313_v1 = vsel %vm430_vm4, %v1311_v14, %v1312_v24  ;;  %v4268_v47 = vunpack.c.l.bf16 %v3261_v34  ;;  %vm2488_vm11 = vcmask 1042432  }
  0xbb   : > { %2363 = vst [vmem:[#allocation2 + $0x4] sm:$0x3] %v2362_v41  ;;  %v2365_v21 = vsel %vm4238_vm9, %v4179_v29, %v2364_v37  ;;  %v2367_v55 = vld [vmem:[#allocation2 + $0xc] sm:$0x3]  ;;  %vm2489_vm0 = vcmask 1046532   ;;  %v1316_v45 = vsel %vm430_vm4, %v1314_v57, %v1315_v9  ;;  %v1339_v23 = vadd.f32 %v1313_v1, %v1265_v30 }
  0xbc   : > { %v4274_v51 = vunpack.c.l.bf16 %v3262_v26  ;;  %2366 = vst [vmem:[#allocation2 + $0x8] sm:$0xe] %v2365_v21  ;;  %v2368_v40 = vsel %vm4246_vm10, %v2311_v20, %v2367_v55  ;;  %v1340_v39 = vadd.f32 %v1316_v45, %v1266_v35  ;;  %v4280_v4 = vunpack.c.l.bf16 %v3263_v60  ;;  %vm4334_vm2 = vmor %vm2488_vm11, %vm2489_vm0 }
  0xbd   : > { %v4282_v32 = vunpack.c.l.bf16 %v3264_v12  ;;  %2369 = vst [vmem:[#allocation2 + $0xc] sm:$0x3] %v2368_v40  ;;  %v1393_v18 = vmul.f32 %v3866_v46, %v3880_v58  ;;  %v1394_v25 = vmul.f32 %v3866_v46, %v3884_v62  ;;  %v1413_v52 = vmul.f32 %v3871_v48, %v3880_v58 }
  0xbe   : > { %v1414_v29 = vmul.f32 %v3871_v48, %v3882_v61  ;;  %2439 = vst.msk [vmem:[#allocation2] sm:$0xc] %vm2438_vm6, %v2406_v3  ;;  %v1415_v20 = vmul.f32 %v3871_v48, %v3884_v62  ;;  %v1416_v38 = vmul.f32 %v3871_v48, %v3886_v0  ;;  %v1487_v22 = vmul.f32 %v3877_v54, %v3880_v58 }
  0xbf   : > { %v1488_v46 = vmul.f32 %v3877_v54, %v3882_v61  ;;  %2441 = vst.msk [vmem:[#allocation2 + $0x4] sm:$0x3] %vm2440_vm8, %v4187_v43  ;;  %v1401_v34 = vadd.f32 %v1393_v18, %v1339_v23  ;;  %v1402_v26 = vadd.f32 %v1394_v25, %v1340_v39  ;;  %v1447_v31 = vrot.slane %v1413_v52, 1 }
  0xc0   : > { %v1448_v13 = vrot.slane %v1414_v29, 1  ;;  %2442 = vst.msk [vmem:[#allocation2 + $0x8] sm:$0xc] %vm2438_vm6, %v2408_v2  ;;  %v1450_v3 = vrot.slane %v1415_v20, 1  ;;  %v1451_v8 = vrot.slane %v1416_v38, 1  ;;  %v1489_v48 = vmul.f32 %v3877_v54, %v3884_v62 }
  0xc1   : > { %v1490_v58 = vmul.f32 %v3877_v54, %v3886_v0  ;;  %2443 = vst.msk [vmem:[#allocation2 + $0xc] sm:$0x3] %vm2440_vm8, %v4191_v33  ;;  %v1521_v43 = vrot.slane %v1487_v22, 2  ;;  %v1522_v27 = vrot.slane %v1488_v46, 2  ;;  %v1559_v63 = vmul.f32 %v3895_v11, %v3884_v62 }
  0xc2   : > { %v1449_v61 = vsel %vm355_vm3, %v1447_v31, %v1448_v13  ;;  %v1452_v2 = vsel %vm355_vm3, %v1450_v3, %v1451_v8  ;;  %v1524_v24 = vrot.slane %v1489_v48, 2  ;;  %v1560_v54 = vmul.f32 %v3895_v11, %v4268_v47 }
  0xc3   : > { %v1475_v14 = vadd.f32 %v1449_v61, %v1401_v34  ;;  %v1525_v60 = vrot.slane %v1490_v58, 2  ;;  %v1476_v6 = vadd.f32 %v1452_v2, %v1402_v26  ;;  %v1523_v53 = vsel %vm430_vm4, %v1521_v43, %v1522_v27 }
  0xc4   : > { %v1579_v33 = vmul.f32 %v3904_v36, %v3884_v62  ;;  %v1580_v9 = vmul.f32 %v3904_v36, %v3886_v0  ;;  %v1581_v12 = vmul.f32 %v3904_v36, %v4268_v47  ;;  %vm2546_vm1 = vcmask 80896  }
  0xc5   : > { %v1526_v30 = vsel %vm430_vm4, %v1524_v24, %v1525_v60  ;;  %v1549_v57 = vadd.f32 %v1523_v53, %v1475_v14  ;;  %v2456_v41 = vld [vmem:[#allocation2] sm:$0xe]  ;;  %v1582_v35 = vmul.f32 %v3904_v36, %v4274_v51  ;;  %v1653_v11 = vmul.f32 %v3913_v49, %v3884_v62 }
  0xc6   : > { %v1550_v37 = vadd.f32 %v1526_v30, %v1476_v6  ;;  %v1613_v1 = vrot.slane %v1579_v33, 1  ;;  %v2457_v21 = vld [vmem:[#allocation2 + $0x4] sm:$0x1]  ;;  %v5558_v55 = vmov 0  ;;  %v3273_v45 = vrot.slane %v2456_v41, 9 }
  0xc7   : > { %v5559_v55 = vsel %vm4334_vm2, 4294967295, %v5558_v55  ;;  %v1567_v23 = vadd.f32 %v1559_v63, %v1549_v57  ;;  %v1614_v40 = vrot.slane %v1580_v9, 1  ;;  %v1616_v39 = vrot.slane %v1581_v12, 1  ;;  %v2458_v18 = vld [vmem:[#allocation2 + $0x8] sm:$0xe]  ;;  %v5561_v14 = vld [vmem:[#allocation4_spill] sm:$0xff] }
  0xc8   : > { %5560 = vst [vmem:[#allocation8_spill] sm:$0xff] %v5559_v55  ;;  %v2493_v25 = vrot.slane %v2457_v21, 5  ;;  %v1568_v52 = vadd.f32 %v1560_v54, %v1550_v37  ;;  %v1617_v29 = vrot.slane %v1582_v35, 1  ;;  %v1654_v36 = vmul.f32 %v3913_v49, %v3886_v0  ;;  %v2459_v20 = vld [vmem:[#allocation2 + $0xc] sm:$0x1] }
  0xc9   : > { %v3274_v62 = vrot.slane %v2458_v18, 9  ;;  %v1615_v38 = vsel %vm355_vm3, %v1613_v1, %v1614_v40  ;;  %v1655_v22 = vmul.f32 %v3913_v49, %v4268_v47  ;;  %v1656_v46 = vmul.f32 %v3913_v49, %v4274_v51  ;;  %v5562_v37 = vld [vmem:[#allocation5_spill] sm:$0xff] }
  0xca   : > { %v2494_v34 = vsel %vm4334_vm2, %v3273_v45, %v2493_v25  ;;  %v2497_v26 = vrot.slane %v2459_v20, 5  ;;  %v1618_v31 = vsel %vm355_vm3, %v1616_v39, %v1617_v29  ;;  %v1641_v13 = vadd.f32 %v1615_v38, %v1567_v23  ;;  %v275_v23 = vld [vmem:[%s3617_s9 + $0x30] sm:$0xf]  ;;  %v276_v25 = vld [vmem:[%s3617_s9 + $0x34] sm:$0x1] }
  0xcb   : > { %v2529_v3 = vunpack.c.l.b16 %v2494_v34  ;;  %v1642_v8 = vadd.f32 %v1618_v31, %v1568_v52  ;;  %v1687_v0 = vrot.slane %v1653_v11, 2  ;;  %v1688_v48 = vrot.slane %v1654_v36, 2 }
  0xcc   : > { %v2498_v58 = vsel %vm4334_vm2, %v3274_v62, %v2497_v26  ;;  %v1690_v61 = vrot.slane %v1655_v22, 2  ;;  %v1691_v43 = vrot.slane %v1656_v46, 2  ;;  %v1725_v27 = vmul.f32 %v3927_v28, %v4268_v47  ;;  %v4385_v26 = vld [vmem:[%s5509_s1] ss:$0 sm:$0xff] }
  0xcd   : > { %v2530_v49 = vunpack.c.l.b16 %v2498_v58  ;;  %v1689_v63 = vsel %vm430_vm4, %v1687_v0, %v1688_v48  ;;  %v1726_v2 = vmul.f32 %v3927_v28, %v4280_v4  ;;  %v1745_v24 = vmul.f32 %v5561_v14, %v4268_v47  ;;  %v4395_v0 = vld [vmem:[%s5509_s1 + $0x1] ss:$0 sm:$0xff] }
  0xce   : > { %v1692_v60 = vsel %vm430_vm4, %v1690_v61, %v1691_v43  ;;  %v1715_v6 = vadd.f32 %v1689_v63, %v1641_v13  ;;  %v1746_v53 = vmul.f32 %v5561_v14, %v4274_v51  ;;  %v1747_v54 = vmul.f32 %v5561_v14, %v4280_v4  ;;  %v4404_v43 = vld [vmem:[%s5510_s2] ss:$0 sm:$0xff] }
  0xcf   : > { %v2537_v33 = vpack.c.b16 %v2530_v49, %v2529_v3  ;;  %v1716_v30 = vadd.f32 %v1692_v60, %v1642_v8  ;;  %v1748_v57 = vmul.f32 %v5561_v14, %v4282_v32  ;;  %v1779_v28 = vrot.slane %v1745_v24, 1  ;;  %v277_v14 = vld [vmem:[%s3617_s9 + $0x38] sm:$0xf] }
  0xd0   : > { %v1733_v9 = vadd.f32 %v1725_v27, %v1715_v6  ;;  %v1780_v12 = vrot.slane %v1746_v53, 1  ;;  %v1782_v41 = vrot.slane %v1747_v54, 1  ;;  %v1819_v35 = vmul.f32 %v5562_v37, %v4268_v47  ;;  %v278_v54 = vld [vmem:[%s3617_s9 + $0x3c] sm:$0x1] }
  0xd1   : > { %3285 = vmatmul.msk.bf16.vlgmr.msra.gmra.mxu0 %vm2546_vm1, %v2537_v33  ;;  %v1734_v1 = vadd.f32 %v1726_v2, %v1716_v30  ;;  %v1783_v11 = vrot.slane %v1748_v57, 1  ;;  %v1820_v21 = vmul.f32 %v5562_v37, %v4274_v51  ;;  %v1821_v45 = vmul.f32 %v5562_v37, %v4280_v4  ;;  %v4421_v30 = vld [vmem:[%s5509_s1 + $0x2] ss:$0 sm:$0xff] }
  0xd2   : > { %v1781_v40 = vsel %vm355_vm3, %v1779_v28, %v1780_v12  ;;  %v1822_v39 = vmul.f32 %v5562_v37, %v4282_v32  ;;  %v1853_v18 = vrot.slane %v1819_v35, 2  ;;  %v4377_v22 = vunpack.c.l.bf16 %v275_v23 }
  0xd3   : > { %v1784_v52 = vsel %vm355_vm3, %v1782_v41, %v1783_v11  ;;  %v1807_v29 = vadd.f32 %v1781_v40, %v1733_v9  ;;  %v1854_v36 = vrot.slane %v1820_v21, 2  ;;  %v1856_v20 = vrot.slane %v1821_v45, 2 }
  0xd4   : > { %v1808_v62 = vadd.f32 %v1784_v52, %v1734_v1  ;;  %v1857_v38 = vrot.slane %v1822_v39, 2  ;;  %v4380_v34 = vunpack.c.l.bf16 %v276_v25  ;;  %v309_v31 = vmul.f32 %v4385_v26, %v4013_v56 }
  0xd5   : > { %v1855_v46 = vsel %vm430_vm4, %v1853_v18, %v1854_v36  ;;  %v310_v13 = vmul.f32 %v4385_v26, %v4049_v10  ;;  %v331_v48 = vmul.f32 %v4395_v0, %v4013_v56  ;;  %v332_v58 = vmul.f32 %v4395_v0, %v4015_v42 }
  0xd6   : > { %v1858_v3 = vsel %vm430_vm4, %v1856_v20, %v1857_v38  ;;  %v1881_v8 = vadd.f32 %v1855_v46, %v1807_v29  ;;  %v317_v27 = vadd.f32 %v4404_v43, %v309_v31  ;;  %v333_v63 = vmul.f32 %v4395_v0, %v4049_v10 }
  0xd7   : > { %v1882_v61 = vadd.f32 %v1858_v3, %v1808_v62  ;;  %v318_v49 = vadd.f32 %v4404_v43, %v310_v13  ;;  %v334_v24 = vmul.f32 %v4395_v0, %v4057_v44  ;;  %v368_v60 = vrot.slane %v331_v48, 1 }
  0xd8   : > { %v4410_v2 = vmul.f32 0.70710677, %v1881_v8  ;;  %v369_v6 = vrot.slane %v332_v58, 1  ;;  %v371_v33 = vrot.slane %v333_v63, 1  ;;  %v406_v57 = vmul.f32 %v4421_v30, %v4013_v56 }
  0xd9   : > { %v4415_v53 = vmul.f32 0.70710677, %v1882_v61  ;;  %v407_v28 = vmul.f32 %v4421_v30, %v4015_v42  ;;  %v372_v41 = vrot.slane %v334_v24, 1  ;;  %v408_v37 = vmul.f32 %v4421_v30, %v4049_v10 }
  0xda   : > { %v1897_v9 = vand.u32 2147483647, %v4410_v2  ;;  %v370_v12 = vsel %vm355_vm3, %v368_v60, %v369_v6  ;;  %v4432_v1 = vunpack.c.l.bf16 %v277_v14  ;;  %v409_v11 = vmul.f32 %v4421_v30, %v4057_v44 }
  0xdb   : > { %v1898_v35 = vand.u32 2147483647, %v4415_v53  ;;  %v443_v21 = vrot.slane %v406_v57, 2  ;;  %v4436_v23 = vunpack.c.l.bf16 %v278_v54  ;;  %v392_v42 = vadd.f32 %v370_v12, %v317_v27 }
  0xdc   : > { %v1905_v56 = vmul.f32 0.3275911, %v1897_v9  ;;  %v2001_v45 = vsub.f32 0.0, %v1897_v9  ;;  %v373_v18 = vsel %vm355_vm3, %v371_v33, %v372_v41  ;;  %v444_v25 = vrot.slane %v407_v28, 2 }
  0xdd   : > { %v1906_v40 = vmul.f32 0.3275911, %v1898_v35  ;;  %v2002_v39 = vsub.f32 0.0, %v1898_v35  ;;  %v393_v36 = vadd.f32 %v373_v18, %v318_v49  ;;  %v446_v20 = vrot.slane %v408_v37, 2  ;;  %v4448_v49 = vld [vmem:[%s5509_s1 + $0x3] ss:$0 sm:$0xff] }
  0xde   : > { %v1913_v52 = vadd.f32 1.0, %v1905_v56  ;;  %v2009_v29 = vmul.f32 %v2001_v45, %v1897_v9  ;;  %v445_v46 = vsel %vm430_vm4, %v443_v21, %v444_v25  ;;  %v447_v31 = vrot.slane %v409_v11, 2  ;;  %v4470_v9 = vld [vmem:[%s5509_s1 + $0x5] ss:$0 sm:$0xff] }
  0xdf   : > { %v1914_v62 = vadd.f32 1.0, %v1906_v40  ;;  %v2010_v38 = vmul.f32 %v2002_v39, %v1898_v35  ;;  %v4440_v3 = vmul.f32 0.5, %v1881_v8  ;;  %v4442_v48 = vmul.f32 0.5, %v1882_v61  ;;  %v4457_v61 = vld [vmem:[%s5509_s1 + $0x4] ss:$0 sm:$0xff] }
  0xe0   : > { %3395 = vrcp.f32 %v1913_v52  ;;  %v2019_v13 = vmul.f32 1.442695, %v2009_v29  ;;  %v448_v27 = vsel %vm430_vm4, %v446_v20, %v447_v31  ;;  %v467_v63 = vadd.f32 %v445_v46, %v392_v42 }
  0xe1   : > { %3397 = vrcp.f32 %v1914_v62  ;;  %v2021_v58 = vmul.f32 1.442695, %v2010_v38  ;;  %v468_v14 = vadd.f32 %v448_v27, %v393_v36  ;;  %v477_v24 = vmul.f32 %v4448_v49, %v4049_v10 }
  0xe2   : > { %3399 = vpow2.f32 %v2019_v13  ;;  %v478_v8 = vmul.f32 %v4448_v49, %v4377_v22  ;;  %v499_v60 = vmul.f32 %v4457_v61, %v4049_v10  ;;  %v500_v6 = vmul.f32 %v4457_v61, %v4057_v44 }
  0xe3   : > { %3401 = vpow2.f32 %v2021_v58  ;;  %v501_v54 = vmul.f32 %v4457_v61, %v4377_v22  ;;  %v485_v33 = vadd.f32 %v477_v24, %v467_v63  ;;  %v502_v28 = vmul.f32 %v4457_v61, %v4380_v34 }
  0xe4   : > { %v486_v57 = vadd.f32 %v478_v8, %v468_v14  ;;  %v573_v12 = vmul.f32 %v4470_v9, %v4049_v10  ;;  %v535_v41 = vrot.slane %v499_v60, 1  ;;  %v536_v37 = vrot.slane %v500_v6, 1  ;;  %v4505_v8 = vld [vmem:[%s5509_s1 + $0x7] ss:$0 sm:$0xff] }
  0xe5   : > { %v538_v35 = vrot.slane %v501_v54, 1  ;;  %v574_v11 = vmul.f32 %v4470_v9, %v4057_v44  ;;  %v539_v56 = vrot.slane %v502_v28, 1  ;;  %v575_v45 = vmul.f32 %v4470_v9, %v4377_v22  ;;  %v4489_v44 = vld [vmem:[%s5509_s1 + $0x6] ss:$0 sm:$0xff] }
  0xe6   : > { %v4476_v21 = vpop.eup %3395  ;;  %v576_v42 = vmul.f32 %v4470_v9, %v4380_v34  ;;  %v609_v40 = vrot.slane %v573_v12, 2  ;;  %v537_v18 = vsel %vm355_vm3, %v535_v41, %v536_v37  ;;  %v643_v52 = vmul.f32 %v4489_v44, %v4377_v22 }
  0xe7   : > { %v4482_v39 = vpop.eup %3397  ;;  %v1929_v10 = vmul.f32 1.0614054, %v4476_v21  ;;  %v610_v25 = vrot.slane %v574_v11, 2  ;;  %v540_v20 = vsel %vm355_vm3, %v538_v35, %v539_v56  ;;  %v559_v62 = vadd.f32 %v537_v18, %v485_v33 }
  0xe8   : > { %v4493_v29 = vpop.eup %3399  ;;  %v1930_v36 = vmul.f32 1.0614054, %v4482_v39  ;;  %v612_v38 = vrot.slane %v575_v45, 2  ;;  %v560_v13 = vadd.f32 %v540_v20, %v486_v57  ;;  %v613_v27 = vrot.slane %v576_v42, 2 }
  0xe9   : > { %v4497_v46 = vpop.eup %3401  ;;  %v1937_v31 = vadd.f32 -1.4531521, %v1929_v10  ;;  %v611_v58 = vsel %vm430_vm4, %v609_v40, %v610_v25  ;;  %v644_v24 = vmul.f32 %v4489_v44, %v4432_v1  ;;  %v665_v60 = vmul.f32 %v4505_v8, %v4377_v22  ;;  %v4521_v10 = vld [vmem:[%s5509_s1 + $0x8] ss:$0 sm:$0xff] }
  0xea   : > { %v1938_v63 = vadd.f32 -1.4531521, %v1930_v36  ;;  %v633_v14 = vadd.f32 %v611_v58, %v559_v62  ;;  %v614_v54 = vsel %vm430_vm4, %v612_v38, %v613_v27  ;;  %v666_v33 = vmul.f32 %v4505_v8, %v4380_v34  ;;  %v3245_v38 = vld [vmem:[%s3617_s9 + $0x80] sm:$0xf] }
  0xeb   : > { %v1945_v6 = vmul.f32 %v4476_v21, %v1937_v31  ;;  %v667_v57 = vmul.f32 %v4505_v8, %v4432_v1  ;;  %v634_v12 = vadd.f32 %v614_v54, %v560_v13  ;;  %v668_v37 = vmul.f32 %v4505_v8, %v4436_v23 }
  0xec   : > { %v1946_v28 = vmul.f32 %v4482_v39, %v1938_v63  ;;  %v651_v41 = vadd.f32 %v643_v52, %v633_v14  ;;  %v701_v11 = vrot.slane %v665_v60, 1  ;;  %v702_v56 = vrot.slane %v666_v33, 1  ;;  %v3246_v63 = vld [vmem:[%s3617_s9 + $0x84] sm:$0x1]  ;;  %v3247_v14 = vld [vmem:[%s3617_s9 + $0x88] sm:$0xf] }
  0xed   : > { %v1953_v35 = vadd.f32 1.4214138, %v1945_v6  ;;  %v704_v45 = vrot.slane %v667_v57, 1  ;;  %v652_v40 = vadd.f32 %v644_v24, %v634_v12  ;;  %v739_v18 = vmul.f32 %v4521_v10, %v4377_v22  ;;  %v3248_v33 = vld [vmem:[%s3617_s9 + $0x8c] sm:$0x1] }
  0xee   : > { %v1954_v42 = vadd.f32 1.4214138, %v1946_v28  ;;  %v740_v25 = vmul.f32 %v4521_v10, %v4380_v34  ;;  %v703_v36 = vsel %vm355_vm3, %v701_v11, %v702_v56  ;;  %v705_v20 = vrot.slane %v668_v37, 1 }
  0xef   : > { %v1961_v52 = vmul.f32 %v4476_v21, %v1953_v35  ;;  %v741_v62 = vmul.f32 %v4521_v10, %v4432_v1  ;;  %v725_v13 = vadd.f32 %v703_v36, %v651_v41  ;;  %v742_v58 = vmul.f32 %v4521_v10, %v4436_v23  ;;  %v4556_v36 = vld [vmem:[%s5509_s1 + $0x9] ss:$0 sm:$0xff] }
  0xf0   : > { %v1962_v31 = vmul.f32 %v4482_v39, %v1954_v42  ;;  %v775_v27 = vrot.slane %v739_v18, 2  ;;  %v706_v60 = vsel %vm355_vm3, %v704_v45, %v705_v20  ;;  %v776_v6 = vrot.slane %v740_v25, 2 }
  0xf1   : > { %v1969_v24 = vadd.f32 -0.28449672, %v1961_v52  ;;  %v778_v54 = vrot.slane %v741_v62, 2  ;;  %v726_v28 = vadd.f32 %v706_v60, %v652_v40  ;;  %v779_v12 = vrot.slane %v742_v58, 2 }
  0xf2   : > { %v1970_v57 = vadd.f32 -0.28449672, %v1962_v31  ;;  %v4539_v37 = vunpack.c.l.bf16 %v3245_v38  ;;  %v777_v41 = vsel %vm430_vm4, %v775_v27, %v776_v6  ;;  %v4543_v11 = vunpack.c.l.bf16 %v3246_v63  ;;  %v4565_v31 = vld [vmem:[%s5509_s1 + $0xa] ss:$0 sm:$0xff] }
  0xf3   : > { %v1977_v35 = vmul.f32 %v4476_v21, %v1969_v24  ;;  %v4545_v56 = vunpack.c.l.bf16 %v3247_v14  ;;  %vm2049_vm5 = vcmp.ge.f32.partialorder %v4410_v2, 0.0  ;;  %v780_v45 = vsel %vm430_vm4, %v778_v54, %v779_v12 }
  0xf4   : > { %v1978_v42 = vmul.f32 %v4482_v39, %v1970_v57  ;;  %v799_v18 = vadd.f32 %v777_v41, %v725_v13  ;;  %v4550_v25 = vunpack.c.l.bf16 %v3248_v33  ;;  %vm2050_vm11 = vcmp.ge.f32.partialorder %v4415_v53, 0.0  ;;  %v4628_v53 = vld [vmem:[%s5509_s1 + $0xe] ss:$0 sm:$0xff] }
  0xf5   : > { %v1985_v40 = vadd.f32 0.2548296, %v1977_v35  ;;  %v800_v52 = vadd.f32 %v780_v45, %v726_v28  ;;  %v853_v20 = vmul.f32 %v4556_v36, %v4095_v5  ;;  %v854_v62 = vmul.f32 %v4556_v36, %v4123_v17  ;;  %v4581_v35 = vld [vmem:[%s5509_s1 + $0xb] ss:$0 sm:$0xff]  ;;  %5564 = vst [vmem:[#allocation5_spill] sm:$0xff] %v4628_v53 }
  0xf6   : > { %v1986_v38 = vadd.f32 0.2548296, %v1978_v42  ;;  %v875_v13 = vmul.f32 %v4565_v31, %v4095_v5  ;;  %v876_v58 = vmul.f32 %v4565_v31, %v4107_v19  ;;  %v877_v27 = vmul.f32 %v4565_v31, %v4123_v17 }
  0xf7   : > { %v1993_v63 = vmul.f32 %v4476_v21, %v1985_v40  ;;  %v861_v14 = vadd.f32 %v853_v20, %v799_v18  ;;  %v862_v24 = vadd.f32 %v854_v62, %v800_v52  ;;  %v878_v60 = vmul.f32 %v4565_v31, %v4127_v59 }
  0xf8   : > { %v1994_v6 = vmul.f32 %v4482_v39, %v1986_v38  ;;  %v911_v54 = vrot.slane %v875_v13, 1  ;;  %v912_v33 = vrot.slane %v876_v58, 1  ;;  %v914_v57 = vrot.slane %v877_v27, 1 }
  0xf9   : > { %v2033_v28 = vmul.f32 %v4493_v29, %v1993_v63  ;;  %v915_v12 = vrot.slane %v878_v60, 1  ;;  %v949_v21 = vmul.f32 %v4581_v35, %v4095_v5  ;;  %v950_v41 = vmul.f32 %v4581_v35, %v4107_v19 }
  0xfa   : > { %v2034_v42 = vmul.f32 %v4497_v46, %v1994_v6  ;;  %v913_v39 = vsel %vm355_vm3, %v911_v54, %v912_v33  ;;  %v951_v45 = vmul.f32 %v4581_v35, %v4123_v17  ;;  %v952_v29 = vmul.f32 %v4581_v35, %v4127_v59  ;;  %v4597_v46 = vld [vmem:[%s5509_s1 + $0xc] ss:$0 sm:$0xff] }
  0xfb   : > { %v2041_v18 = vsub.f32 1.0, %v2033_v28  ;;  %v916_v40 = vsel %vm355_vm3, %v914_v57, %v915_v12  ;;  %v935_v52 = vadd.f32 %v913_v39, %v861_v14  ;;  %v985_v20 = vrot.slane %v949_v21, 2 }
  0xfc   : > { %v2042_v62 = vsub.f32 1.0, %v2034_v42  ;;  %v936_v5 = vadd.f32 %v916_v40, %v862_v24  ;;  %v986_v38 = vrot.slane %v950_v41, 2  ;;  %v988_v13 = vrot.slane %v951_v45, 2  ;;  %v4607_v24 = vld [vmem:[%s5509_s1 + $0xd] ss:$0 sm:$0xff] }
  0xfd   : > { %v2057_v19 = vsub.f32 0.0, %v2041_v18  ;;  %v989_v58 = vrot.slane %v952_v29, 2  ;;  %v1019_v27 = vmul.f32 %v4597_v46, %v4123_v17  ;;  %v1020_v63 = vmul.f32 %v4597_v46, %v4539_v37  ;;  %5563 = vst [vmem:[#allocation4_spill] sm:$0xff] %v4607_v24 }
  0xfe   : > { %v2058_v60 = vsub.f32 0.0, %v2042_v62  ;;  %v987_v14 = vsel %vm430_vm4, %v985_v20, %v986_v38  ;;  %v1041_v6 = vmul.f32 %v4607_v24, %v4123_v17  ;;  %v1042_v54 = vmul.f32 %v4607_v24, %v4127_v59 }
  0xff   : > { %v2065_v33 = vsel %vm2049_vm5, %v2041_v18, %v2057_v19  ;;  %v990_v57 = vsel %vm430_vm4, %v988_v13, %v989_v58  ;;  %v1009_v28 = vadd.f32 %v987_v14, %v935_v52  ;;  %v1043_v12 = vmul.f32 %v4607_v24, %v4539_v37 }
 0x100   : > { %v2066_v21 = vsel %vm2050_vm11, %v2042_v62, %v2058_v60  ;;  %v2081_v41 = vadd.f32 1.0, %v2065_v33  ;;  %v1010_v42 = vadd.f32 %v990_v57, %v936_v5  ;;  %v1044_v39 = vmul.f32 %v4607_v24, %v4543_v11 }
 0x101   : > { %v2082_v45 = vadd.f32 1.0, %v2066_v21  ;;  %v1027_v29 = vadd.f32 %v1019_v27, %v1009_v28  ;;  %v1077_v40 = vrot.slane %v1041_v6, 1  ;;  %v1078_v20 = vrot.slane %v1042_v54, 1 }
 0x102   : > { %v2089_v2 = vmul.f32 %v2081_v41, %v4440_v3  ;;  %v1028_v18 = vadd.f32 %v1020_v63, %v1010_v42  ;;  %v1080_v38 = vrot.slane %v1043_v12, 1  ;;  %v1081_v52 = vrot.slane %v1044_v39, 1 }
 0x103   : > { %v2090_v13 = vmul.f32 %v2082_v45, %v4442_v48  ;;  %v1079_v19 = vsel %vm355_vm3, %v1077_v40, %v1078_v20  ;;  %v1115_v62 = vmul.f32 %v4628_v53, %v4123_v17  ;;  %v1116_v5 = vmul.f32 %v4628_v53, %v4127_v59  ;;  %v2213_v40 = vld [vmem:[#allocation2 + $0x14] sm:$0x1] }
 0x104   : > { %v4634_v58 = vpack.c.bf16 %v2089_v2, %v2089_v2  ;;  %v1082_v3 = vsel %vm355_vm3, %v1080_v38, %v1081_v52  ;;  %v1101_v27 = vadd.f32 %v1079_v19, %v1027_v29  ;;  %v1117_v48 = vmul.f32 %v4628_v53, %v4539_v37 }
 0x105   : > { %v4639_v63 = vpack.c.bf16 %v2090_v13, %v2090_v13  ;;  %v1102_v60 = vadd.f32 %v1082_v3, %v1028_v18  ;;  %v1118_v14 = vmul.f32 %v4628_v53, %v4543_v11  ;;  %v1151_v6 = vrot.slane %v1115_v62, 2  ;;  %v2219_v13 = vld [vmem:[#allocation2 + $0x1c] sm:$0x1] }
 0x106   : > { %2106 = vst.msk [vmem:[#allocation2 + $0x10] sm:$0xf] %vm2103_vm7, %v4634_v58  ;;  %v2129_v17 = vshrl.u32 %v4634_v58, 16  ;;  %v2132_v59 = vshll.u32 %v4634_v58, 16  ;;  %v2258_v54 = vrot.slane %v4634_v58, 7  ;;  %v5522_v33 = vrot.slane %v4634_v58, 6 }
 0x107   : > { %2107 = vst.msk [vmem:[#allocation2 + $0x18] sm:$0xf] %vm2103_vm7, %v4639_v63  ;;  %v2137_v57 = vshrl.u32 %v4639_v63, 16  ;;  %v2140_v28 = vshll.u32 %v4639_v63, 16  ;;  %v2260_v12 = vrot.slane %v4639_v63, 7 }
 0x108   : > { %v2131_v41 = vrot.slane %v2129_v17, 7  ;;  %v2259_v42 = vrot.slane %v2258_v54, 4  ;;  %v2312_v39 = vrot.slane %v2129_v17, 6  ;;  %v2313_v45 = vrot.slane %v2132_v59, 7 }
 0x109   : > { %v2139_v29 = vrot.slane %v2137_v57, 7  ;;  %v2261_v20 = vrot.slane %v2260_v12, 4  ;;  %v2316_v2 = vrot.slane %v2137_v57, 6  ;;  %v2317_v18 = vrot.slane %v2140_v28, 7 }
 0x10a   : > { %v2134_v38 = vor.u32 %v2132_v59, %v2131_v41  ;;  %v2135_v52 = vrot.slane %v2131_v41, 4  ;;  %v4655_v19 = vor.u32 %v2313_v45, %v2312_v39  ;;  %v4659_v62 = vrot.slane %v5522_v33, 4  ;;  %v3268_v59 = vld [vmem:[%s3617_s9 + $0xdc] sm:$0x1] }
 0x10b   : > { %v2142_v3 = vor.u32 %v2140_v28, %v2139_v29  ;;  %v2143_v21 = vrot.slane %v2139_v29, 4  ;;  %v4661_v53 = vor.u32 %v2317_v18, %v2316_v2  ;;  %v5565_v17 = vrot.slane %v4639_v63, 6  ;;  %v4676_v2 = vld [vmem:[%s5509_s1 + $0xf] ss:$0 sm:$0xff] }
 0x10c   : > { %v2214_v57 = vsel %vm4165_vm14, %v2135_v52, %v2213_v40  ;;  %v1152_v41 = vrot.slane %v1116_v5, 2  ;;  %v1154_v39 = vrot.slane %v1117_v48, 2  ;;  %v1155_v29 = vrot.slane %v1118_v14, 2  ;;  %v4688_v14 = vld [vmem:[%s5509_s1 + $0x10] ss:$0 sm:$0xff] }
 0x10d   : > { %v4665_v24 = vrot.slane %v5565_v17, 4  ;;  %v2210_v45 = vld [vmem:[#allocation2 + $0x10] sm:$0xf]  ;;  %2215 = vst [vmem:[#allocation2 + $0x14] sm:$0x1] %v2214_v57  ;;  %v2220_v33 = vsel %vm4165_vm14, %v2143_v21, %v2219_v13  ;;  %v1185_v40 = vmul.f32 %v4676_v2, %v4539_v37  ;;  %v1186_v21 = vmul.f32 %v4676_v2, %v4545_v56 }
 0x10e   : > { %v2211_v5 = vsel %vm4175_vm15, %v2134_v38, %v2210_v45  ;;  %v2216_v48 = vld [vmem:[#allocation2 + $0x18] sm:$0xf]  ;;  %2221 = vst [vmem:[#allocation2 + $0x1c] sm:$0x1] %v2220_v33  ;;  %v1153_v18 = vsel %vm430_vm4, %v1151_v6, %v1152_v41  ;;  %v1207_v52 = vmul.f32 %v4688_v14, %v4539_v37  ;;  %v1156_v33 = vsel %vm430_vm4, %v1154_v39, %v1155_v29  ;;  %v3266_v29 = vld [vmem:[%s3617_s9 + $0xd4] sm:$0x1] }
 0x10f   : > { %5566 = vst [vmem:[#allocation9_spill] sm:$0xff] %v4688_v14  ;;  %v2217_v38 = vsel %vm4175_vm15, %v2142_v3, %v2216_v48  ;;  %v1175_v13 = vadd.f32 %v1153_v18, %v1101_v27  ;;  %v1208_v6 = vmul.f32 %v4688_v14, %v4543_v11  ;;  %v1176_v17 = vadd.f32 %v1156_v33, %v1102_v60  ;;  %v4706_v27 = vld [vmem:[%s5509_s1 + $0x11] ss:$0 sm:$0xff] }
 0x110   : > { %2212 = vst [vmem:[#allocation2 + $0x10] sm:$0xf] %v2211_v5  ;;  %v1209_v57 = vmul.f32 %v4688_v14, %v4545_v56  ;;  %v1210_v41 = vmul.f32 %v4688_v14, %v4550_v25  ;;  %v1243_v45 = vrot.slane %v1207_v52, 1  ;;  %v3265_v5 = vld [vmem:[%s3617_s9 + $0xd0] sm:$0xf]  ;;  %v1281_v60 = vmul.f32 %v4706_v27, %v4539_v37 }
 0x111   : > { %2218 = vst [vmem:[#allocation2 + $0x18] sm:$0xf] %v2217_v38  ;;  %v1193_v3 = vadd.f32 %v1185_v40, %v1175_v13  ;;  %v1244_v48 = vrot.slane %v1208_v6, 1  ;;  %v1282_v39 = vmul.f32 %v4706_v27, %v4543_v11  ;;  %v1194_v18 = vadd.f32 %v1186_v21, %v1176_v17  ;;  %v3267_v38 = vld [vmem:[%s3617_s9 + $0xd8] sm:$0xf] }
 0x112   : > { %2292 = vst.msk [vmem:[#allocation2 + $0x10] sm:$0xe] %vm2286_vm12, %v2258_v54  ;;  %v1246_v52 = vrot.slane %v1209_v57, 1  ;;  %v1247_v54 = vrot.slane %v1210_v41, 1  ;;  %v1283_v40 = vmul.f32 %v4706_v27, %v4545_v56  ;;  %v1284_v13 = vmul.f32 %v4706_v27, %v4550_v25 }
 0x113   : > { %2293 = vst.msk [vmem:[#allocation2 + $0x14] sm:$0x1] %vm2288_vm13, %v2259_v42  ;;  %v1245_v33 = vsel %vm355_vm3, %v1243_v45, %v1244_v48  ;;  %v1317_v6 = vrot.slane %v1281_v60, 2  ;;  %v1318_v28 = vrot.slane %v1282_v39, 2  ;;  %v4724_v57 = vunpack.c.l.bf16 %v3265_v5 }
 0x114   : > { %2294 = vst.msk [vmem:[#allocation2 + $0x18] sm:$0xe] %vm2286_vm12, %v2260_v12  ;;  %v1248_v42 = vsel %vm355_vm3, %v1246_v52, %v1247_v54  ;;  %v1267_v21 = vadd.f32 %v1245_v33, %v1193_v3  ;;  %v1320_v17 = vrot.slane %v1283_v40, 2  ;;  %v1321_v12 = vrot.slane %v1284_v13, 2 }
 0x115   : > { %2295 = vst.msk [vmem:[#allocation2 + $0x1c] sm:$0x1] %vm2288_vm13, %v2261_v20  ;;  %v1268_v41 = vadd.f32 %v1248_v42, %v1194_v18  ;;  %v1319_v14 = vsel %vm430_vm4, %v1317_v6, %v1318_v28  ;;  %v4727_v50 = vunpack.c.l.bf16 %v3266_v29  ;;  %v4729_v48 = vunpack.c.l.bf16 %v3267_v38  ;;  %v4736_v20 = vld [vmem:[%s5509_s1 + $0x12] ss:$0 sm:$0xff]  ;;  %v4762_v42 = vld [vmem:[%s5509_s1 + $0x14] ss:$0 sm:$0xff] }
 0x116   : > { %v1341_v45 = vadd.f32 %v1319_v14, %v1267_v21  ;;  %v4731_v60 = vunpack.c.l.bf16 %v3268_v59  ;;  %v1395_v5 = vmul.f32 %v4736_v20, %v4268_v47  ;;  %v1322_v3 = vsel %vm430_vm4, %v1320_v17, %v1321_v12  ;;  %v4746_v14 = vld [vmem:[%s5509_s1 + $0x13] ss:$0 sm:$0xff]  ;;  %5567 = vst [vmem:[#allocation10_spill] sm:$0xff] %v4762_v42 }
 0x117   : > { %v1396_v28 = vmul.f32 %v4736_v20, %v4280_v4  ;;  %v1417_v59 = vmul.f32 %v4746_v14, %v4268_v47  ;;  %v1418_v39 = vmul.f32 %v4746_v14, %v4274_v51  ;;  %v1342_v18 = vadd.f32 %v1322_v3, %v1268_v41 }
 0x118   : > { %v1403_v52 = vadd.f32 %v1395_v5, %v1341_v45  ;;  %v1419_v54 = vmul.f32 %v4746_v14, %v4280_v4  ;;  %v1420_v40 = vmul.f32 %v4746_v14, %v4282_v32  ;;  %v1491_v21 = vmul.f32 %v4762_v42, %v4268_v47 }
 0x119   : > { %v2370_v29 = vld [vmem:[#allocation2 + $0x10] sm:$0xe]  ;;  %v1453_v13 = vrot.slane %v1417_v59, 1  ;;  %v1454_v6 = vrot.slane %v1418_v39, 1  ;;  %v5568_v17 = vrot.slane %v4655_v19, 4  ;;  %v1404_v45 = vadd.f32 %v1396_v28, %v1342_v18 }
 0x11a   : > { %v2371_v38 = vsel %vm4238_vm9, %v4655_v19, %v2370_v29  ;;  %v2373_v33 = vld [vmem:[#allocation2 + $0x14] sm:$0x3]  ;;  %v1456_v5 = vrot.slane %v1419_v54, 1  ;;  %v1457_v3 = vrot.slane %v1420_v40, 1  ;;  %v1492_v47 = vmul.f32 %v4762_v42, %v4274_v51 }
 0x11b   : > { %2372 = vst [vmem:[#allocation2 + $0x10] sm:$0xe] %v2371_v38  ;;  %v2374_v41 = vsel %vm4246_vm10, %v5568_v17, %v2373_v33  ;;  %v2376_v12 = vld [vmem:[#allocation2 + $0x18] sm:$0xe]  ;;  %v1455_v29 = vsel %vm355_vm3, %v1453_v13, %v1454_v6  ;;  %v1493_v19 = vmul.f32 %v4762_v42, %v4280_v4  ;;  %v5569_v38 = vrot.slane %v4661_v53, 4 }
 0x11c   : > { %2375 = vst [vmem:[#allocation2 + $0x14] sm:$0x3] %v2374_v41  ;;  %v2377_v59 = vsel %vm4238_vm9, %v4661_v53, %v2376_v12  ;;  %v2379_v39 = vld [vmem:[#allocation2 + $0x1c] sm:$0x3]  ;;  %v1458_v18 = vsel %vm355_vm3, %v1456_v5, %v1457_v3  ;;  %v1477_v54 = vadd.f32 %v1455_v29, %v1403_v52  ;;  %v1494_v40 = vmul.f32 %v4762_v42, %v4282_v32  ;;  %v4791_v53 = vld [vmem:[%s5509_s1 + $0x15] ss:$0 sm:$0xff] }
 0x11d   : > { %2378 = vst [vmem:[#allocation2 + $0x18] sm:$0xe] %v2377_v59  ;;  %v2380_v28 = vsel %vm4246_vm10, %v5569_v38, %v2379_v39  ;;  %v1478_v33 = vadd.f32 %v1458_v18, %v1404_v45  ;;  %v1527_v13 = vrot.slane %v1491_v21, 2  ;;  %v1528_v6 = vrot.slane %v1492_v47, 2  ;;  %v4800_v21 = vld [vmem:[%s5509_s1 + $0x16] ss:$0 sm:$0xff] }
 0x11e   : > { %2381 = vst [vmem:[#allocation2 + $0x1c] sm:$0x3] %v2380_v28  ;;  %v1530_v51 = vrot.slane %v1493_v19, 2  ;;  %v5570_v17 = vrot.slane %v4634_v58, 6  ;;  %v1531_v41 = vrot.slane %v1494_v40, 2  ;;  %v1561_v52 = vmul.f32 %v4791_v53, %v4280_v4 }
 0x11f   : > { %5571 = vst [vmem:[#allocation11_spill] sm:$0xff] %v4791_v53  ;;  %v1562_v12 = vmul.f32 %v4791_v53, %v4724_v57  ;;  %v1583_v58 = vmul.f32 %v4800_v21, %v4280_v4  ;;  %v1529_v45 = vsel %vm430_vm4, %v1527_v13, %v1528_v6  ;;  %v1584_v5 = vmul.f32 %v4800_v21, %v4282_v32 }
 0x120   : > { %2444 = vst.msk [vmem:[#allocation2 + $0x10] sm:$0xc] %vm2438_vm6, %v5570_v17  ;;  %v1585_v3 = vmul.f32 %v4800_v21, %v4724_v57  ;;  %v1586_v59 = vmul.f32 %v4800_v21, %v4727_v50  ;;  %v5573_v39 = vrot.slane %v4639_v63, 6  ;;  %v1532_v29 = vsel %vm430_vm4, %v1530_v51, %v1531_v41 }
 0x121   : > { %5572 = vst [vmem:[#allocation12_spill] sm:$0xff] %v4800_v21  ;;  %v1551_v47 = vadd.f32 %v1529_v45, %v1477_v54  ;;  %v1619_v19 = vrot.slane %v1583_v58, 1  ;;  %v1552_v28 = vadd.f32 %v1532_v29, %v1478_v33  ;;  %v1620_v18 = vrot.slane %v1584_v5, 1 }
 0x122   : > { %2445 = vst.msk [vmem:[#allocation2 + $0x14] sm:$0x3] %vm2440_vm8, %v4659_v62  ;;  %v4820_v62 = vld [vmem:[%s5509_s1 + $0x17] ss:$0 sm:$0xff]  ;;  %v1622_v63 = vrot.slane %v1585_v3, 1  ;;  %v1623_v40 = vrot.slane %v1586_v59, 1 }
 0x123   : > { %2446 = vst.msk [vmem:[#allocation2 + $0x18] sm:$0xc] %vm2438_vm6, %v5573_v39  ;;  %v1657_v38 = vmul.f32 %v4820_v62, %v4280_v4  ;;  %v1569_v13 = vadd.f32 %v1561_v52, %v1551_v47  ;;  %v1658_v54 = vmul.f32 %v4820_v62, %v4282_v32  ;;  %v1659_v6 = vmul.f32 %v4820_v62, %v4724_v57  ;;  %v4837_v32 = vld [vmem:[%s5509_s1 + $0x18] ss:$0 sm:$0xff]  ;;  %v4846_v39 = vld [vmem:[%s5509_s1 + $0x19] ss:$0 sm:$0xff] }
 0x124   : > { %5574 = vst [vmem:[#allocation13_spill] sm:$0xff] %v4820_v62  ;;  %v1660_v51 = vmul.f32 %v4820_v62, %v4727_v50  ;;  %v1570_v17 = vadd.f32 %v1562_v12, %v1552_v28  ;;  %v1621_v4 = vsel %vm355_vm3, %v1619_v19, %v1620_v18  ;;  %v1624_v41 = vsel %vm355_vm3, %v1622_v63, %v1623_v40 }
 0x125   : > { %2447 = vst.msk [vmem:[#allocation2 + $0x1c] sm:$0x3] %vm2440_vm8, %v4665_v24  ;;  %v1693_v24 = vrot.slane %v1657_v38, 2  ;;  %v1643_v33 = vadd.f32 %v1621_v4, %v1569_v13  ;;  %v1694_v58 = vrot.slane %v1658_v54, 2  ;;  %v1696_v45 = vrot.slane %v1659_v6, 2 }
 0x126   : > { %v1697_v5 = vrot.slane %v1660_v51, 2  ;;  %v1644_v3 = vadd.f32 %v1624_v41, %v1570_v17  ;;  %5575 = vst [vmem:[#allocation14_spill] sm:$0xff] %v4837_v32  ;;  %v1727_v59 = vmul.f32 %v4837_v32, %v4724_v57  ;;  %v1728_v12 = vmul.f32 %v4837_v32, %v4729_v48 }
 0x127   : > { %v2460_v52 = vld [vmem:[#allocation2 + $0x10] sm:$0xe]  ;;  %5576 = vst [vmem:[#allocation15_spill] sm:$0xff] %v4846_v39  ;;  %v1749_v29 = vmul.f32 %v4846_v39, %v4724_v57  ;;  %v1695_v38 = vsel %vm430_vm4, %v1693_v24, %v1694_v58  ;;  %v1750_v18 = vmul.f32 %v4846_v39, %v4727_v50  ;;  %v1751_v6 = vmul.f32 %v4846_v39, %v4729_v48 }
 0x128   : > { %v3275_v19 = vrot.slane %v2460_v52, 9  ;;  %v1698_v28 = vsel %vm430_vm4, %v1696_v45, %v1697_v5  ;;  %v1717_v13 = vadd.f32 %v1695_v38, %v1643_v33  ;;  %v1752_v4 = vmul.f32 %v4846_v39, %v4731_v60 }
 0x129   : > { %v2461_v47 = vld [vmem:[#allocation2 + $0x14] sm:$0x1]  ;;  %v1718_v54 = vadd.f32 %v1698_v28, %v1644_v3  ;;  %v1785_v41 = vrot.slane %v1749_v29, 1  ;;  %v1786_v52 = vrot.slane %v1750_v18, 1  ;;  %v4866_v29 = vld [vmem:[%s5509_s1 + $0x1a] ss:$0 sm:$0xff] }
 0x12a   : > { %v2462_v63 = vld [vmem:[#allocation2 + $0x18] sm:$0xe]  ;;  %v2501_v40 = vrot.slane %v2461_v47, 5  ;;  %v1735_v45 = vadd.f32 %v1727_v59, %v1717_v13  ;;  %v1788_v47 = vrot.slane %v1751_v6, 1  ;;  %v1789_v38 = vrot.slane %v1752_v4, 1  ;;  %5577 = vst [vmem:[#allocation16_spill] sm:$0xff] %v4866_v29 }
 0x12b   : > { %v3276_v17 = vrot.slane %v2462_v63, 9  ;;  %v1736_v5 = vadd.f32 %v1728_v12, %v1718_v54  ;;  %v1787_v3 = vsel %vm355_vm3, %v1785_v41, %v1786_v52  ;;  %v1823_v59 = vmul.f32 %v4866_v29, %v4724_v57  ;;  %v279_v54 = vld [vmem:[%s3617_s9 + $0x40] sm:$0xf]  ;;  %v280_v6 = vld [vmem:[%s3617_s9 + $0x44] sm:$0x1] }
 0x12c   : > { %v2463_v51 = vld [vmem:[#allocation2 + $0x1c] sm:$0x1]  ;;  %v2502_v24 = vsel %vm4334_vm2, %v3275_v19, %v2501_v40  ;;  %v1809_v63 = vadd.f32 %v1787_v3, %v1735_v45  ;;  %v1824_v12 = vmul.f32 %v4866_v29, %v4727_v50  ;;  %v1790_v18 = vsel %vm355_vm3, %v1788_v47, %v1789_v38 }
 0x12d   : > { %v2505_v58 = vrot.slane %v2463_v51, 5  ;;  %v2531_v33 = vunpack.c.l.b16 %v2502_v24  ;;  %v1825_v40 = vmul.f32 %v4866_v29, %v4729_v48  ;;  %v1826_v13 = vmul.f32 %v4866_v29, %v4731_v60 }
 0x12e   : > { %v1810_v51 = vadd.f32 %v1790_v18, %v1736_v5  ;;  %v1860_v4 = vrot.slane %v1824_v12, 2  ;;  %v4881_v3 = vunpack.c.l.bf16 %v279_v54  ;;  %v4883_v47 = vunpack.c.l.bf16 %v280_v6 }
 0x12f   : > { %v2506_v28 = vsel %vm4334_vm2, %v3276_v17, %v2505_v58  ;;  %v1859_v17 = vrot.slane %v1823_v59, 2  ;;  %v1862_v52 = vrot.slane %v1825_v40, 2  ;;  %v1863_v24 = vrot.slane %v1826_v13, 2  ;;  %v281_v58 = vld [vmem:[%s3617_s9 + $0x48] sm:$0xf] }
 0x130   : > { %v2532_v19 = vunpack.c.l.b16 %v2506_v28  ;;  %v311_v38 = vmul.f32 %v4385_v26, %v4377_v22  ;;  %v335_v59 = vmul.f32 %v4395_v0, %v4377_v22  ;;  %v336_v18 = vmul.f32 %v4395_v0, %v4380_v34 }
 0x131   : > { %v1861_v45 = vsel %vm430_vm4, %v1859_v17, %v1860_v4  ;;  %v1864_v5 = vsel %vm430_vm4, %v1862_v52, %v1863_v24  ;;  %v337_v40 = vmul.f32 %v4395_v0, %v4432_v1  ;;  %v4907_v17 = vld [vmem:[%s3617_s9 + $0x4c] sm:$0x1] }
 0x132   : > { %v2538_v41 = vpack.c.b16 %v2532_v19, %v2531_v33  ;;  %v1883_v28 = vadd.f32 %v1861_v45, %v1809_v63  ;;  %v312_v33 = vmul.f32 %v4385_v26, %v4432_v1  ;;  %v1884_v12 = vadd.f32 %v1864_v5, %v1810_v51 }
 0x133   : > { %v4893_v19 = vunpack.c.l.bf16 %v281_v58  ;;  %v319_v54 = vadd.f32 %v4404_v43, %v311_v38  ;;  %v338_v63 = vmul.f32 %v4395_v0, %v4436_v23  ;;  %v374_v26 = vrot.slane %v335_v59, 1 }
 0x134   : > { %3286 = vmatmul.msk.bf16.vlgmr.msra.gmra.mxu1 %vm2546_vm1, %v2538_v41  ;;  %v4899_v13 = vmul.f32 0.70710677, %v1883_v28  ;;  %v4904_v6 = vmul.f32 0.70710677, %v1884_v12  ;;  %v375_v51 = vrot.slane %v336_v18, 1  ;;  %v377_v4 = vrot.slane %v337_v40, 1 }
 0x135   : > { %v410_v41 = vmul.f32 %v4421_v30, %v4377_v22  ;;  %v320_v24 = vadd.f32 %v4404_v43, %v312_v33  ;;  %v378_v58 = vrot.slane %v338_v63, 1  ;;  %v411_v45 = vmul.f32 %v4421_v30, %v4380_v34 }
 0x136   : > { %v1899_v52 = vand.u32 2147483647, %v4899_v13  ;;  %v1900_v0 = vand.u32 2147483647, %v4904_v6  ;;  %v376_v38 = vsel %vm355_vm3, %v374_v26, %v375_v51  ;;  %v412_v5 = vmul.f32 %v4421_v30, %v4432_v1 }
 0x137   : > { %v413_v59 = vmul.f32 %v4421_v30, %v4436_v23  ;;  %v449_v29 = vrot.slane %v410_v41, 2  ;;  %v379_v63 = vsel %vm355_vm3, %v377_v4, %v378_v58  ;;  %v394_v34 = vadd.f32 %v376_v38, %v319_v54 }
 0x138   : > { %v1907_v18 = vmul.f32 0.3275911, %v1899_v52  ;;  %v2003_v22 = vsub.f32 0.0, %v1899_v52  ;;  %v1908_v43 = vmul.f32 0.3275911, %v1900_v0  ;;  %v2004_v33 = vsub.f32 0.0, %v1900_v0 }
 0x139   : > { %v395_v32 = vadd.f32 %v379_v63, %v320_v24  ;;  %v450_v26 = vrot.slane %v411_v45, 2  ;;  %v452_v21 = vrot.slane %v412_v5, 2  ;;  %v453_v53 = vrot.slane %v413_v59, 2 }
 0x13a   : > { %v1915_v55 = vadd.f32 1.0, %v1907_v18  ;;  %v2011_v39 = vmul.f32 %v2003_v22, %v1899_v52  ;;  %v1916_v51 = vadd.f32 1.0, %v1908_v43  ;;  %v2012_v62 = vmul.f32 %v2004_v33, %v1900_v0 }
 0x13b   : > { %v4923_v16 = vmul.f32 0.5, %v1883_v28  ;;  %v4925_v42 = vmul.f32 0.5, %v1884_v12  ;;  %v451_v40 = vsel %vm430_vm4, %v449_v29, %v450_v26  ;;  %v454_v54 = vsel %vm430_vm4, %v452_v21, %v453_v53 }
 0x13c   : > { %3403 = vrcp.f32 %v1915_v55  ;;  %v2023_v30 = vmul.f32 1.442695, %v2011_v39  ;;  %v2025_v41 = vmul.f32 1.442695, %v2012_v62  ;;  %v469_v4 = vadd.f32 %v451_v40, %v394_v34 }
 0x13d   : > { %3405 = vrcp.f32 %v1916_v51  ;;  %v470_v52 = vadd.f32 %v454_v54, %v395_v32  ;;  %v479_v24 = vmul.f32 %v4448_v49, %v4432_v1  ;;  %v480_v55 = vmul.f32 %v4448_v49, %v4881_v3 }
 0x13e   : > { %3407 = vpow2.f32 %v2023_v30  ;;  %v503_v39 = vmul.f32 %v4457_v61, %v4432_v1  ;;  %v504_v62 = vmul.f32 %v4457_v61, %v4436_v23  ;;  %v505_v53 = vmul.f32 %v4457_v61, %v4881_v3 }
 0x13f   : > { %3409 = vpow2.f32 %v2025_v41  ;;  %v487_v28 = vadd.f32 %v479_v24, %v469_v4  ;;  %v506_v21 = vmul.f32 %v4457_v61, %v4883_v47  ;;  %v577_v32 = vmul.f32 %v4470_v9, %v4432_v1 }
 0x140   : > { %v488_v29 = vadd.f32 %v480_v55, %v470_v52  ;;  %v541_v12 = vrot.slane %v503_v39, 1  ;;  %v542_v58 = vrot.slane %v504_v62, 1  ;;  %v578_v49 = vmul.f32 %v4470_v9, %v4436_v23 }
 0x141   : > { %v544_v0 = vrot.slane %v505_v53, 1  ;;  %v545_v38 = vrot.slane %v506_v21, 1  ;;  %v579_v5 = vmul.f32 %v4470_v9, %v4881_v3  ;;  %v580_v59 = vmul.f32 %v4470_v9, %v4883_v47 }
 0x142   : > { %v4945_v45 = vpop.eup %3403  ;;  %v543_v18 = vsel %vm355_vm3, %v541_v12, %v542_v58  ;;  %v615_v22 = vrot.slane %v577_v32, 2  ;;  %v616_v40 = vrot.slane %v578_v49, 2  ;;  %v645_v52 = vmul.f32 %v4489_v44, %v4881_v3 }
 0x143   : > { %v4951_v61 = vpop.eup %3405  ;;  %v1931_v1 = vmul.f32 1.0614054, %v4945_v45  ;;  %v546_v33 = vsel %vm355_vm3, %v544_v0, %v545_v38  ;;  %v561_v63 = vadd.f32 %v543_v18, %v487_v28  ;;  %v618_v34 = vrot.slane %v579_v5, 2 }
 0x144   : > { %v4955_v43 = vpop.eup %3407  ;;  %v1932_v23 = vmul.f32 1.0614054, %v4951_v61  ;;  %v562_v9 = vadd.f32 %v546_v33, %v488_v29  ;;  %v617_v30 = vsel %vm430_vm4, %v615_v22, %v616_v40  ;;  %v619_v41 = vrot.slane %v580_v59, 2 }
 0x145   : > { %v4959_v26 = vpop.eup %3409  ;;  %v1939_v51 = vadd.f32 -1.4531521, %v1931_v1  ;;  %v635_v4 = vadd.f32 %v617_v30, %v561_v63  ;;  %v646_v24 = vmul.f32 %v4489_v44, %v4893_v19  ;;  %v669_v62 = vmul.f32 %v4505_v8, %v4881_v3 }
 0x146   : > { %v1940_v54 = vadd.f32 -1.4531521, %v1932_v23  ;;  %v620_v39 = vsel %vm430_vm4, %v618_v34, %v619_v41  ;;  %v670_v28 = vmul.f32 %v4505_v8, %v4883_v47  ;;  %v671_v29 = vmul.f32 %v4505_v8, %v4893_v19 }
 0x147   : > { %v1947_v55 = vmul.f32 %v4945_v45, %v1939_v51  ;;  %v636_v21 = vadd.f32 %v620_v39, %v562_v9  ;;  %v653_v32 = vadd.f32 %v645_v52, %v635_v4  ;;  %v5578_v44 = vunpack.c.l.bf16 %v4907_v17  ;;  %v3249_v51 = vld [vmem:[%s3617_s9 + $0x90] sm:$0xf]  ;;  %v3250_v9 = vld [vmem:[%s3617_s9 + $0x94] sm:$0x1]  ;;  %v3251_v4 = vld [vmem:[%s3617_s9 + $0x98] sm:$0xf] }
 0x148   : > { %v1948_v53 = vmul.f32 %v4951_v61, %v1940_v54  ;;  %v707_v49 = vrot.slane %v669_v62, 1  ;;  %v708_v0 = vrot.slane %v670_v28, 1  ;;  %v743_v59 = vmul.f32 %v4521_v10, %v4881_v3  ;;  %v4995_v62 = vld [vmem:[%s3617_s9 + $0x9c] sm:$0x1] }
 0x149   : > { %v1955_v12 = vadd.f32 1.4214138, %v1947_v55  ;;  %v672_v58 = vmul.f32 %v4505_v8, %v5578_v44  ;;  %v654_v5 = vadd.f32 %v646_v24, %v636_v21  ;;  %v744_v1 = vmul.f32 %v4521_v10, %v4883_v47 }
 0x14a   : > { %v1956_v38 = vadd.f32 1.4214138, %v1948_v53  ;;  %v709_v22 = vsel %vm355_vm3, %v707_v49, %v708_v0  ;;  %v710_v40 = vrot.slane %v671_v29, 1  ;;  %v745_v63 = vmul.f32 %v4521_v10, %v4893_v19 }
 0x14b   : > { %v1963_v18 = vmul.f32 %v4945_v45, %v1955_v12  ;;  %v711_v23 = vrot.slane %v672_v58, 1  ;;  %v727_v33 = vadd.f32 %v709_v22, %v653_v32  ;;  %v5579_v34 = vmov %v5578_v44 }
 0x14c   : > { %v1964_v8 = vmul.f32 %v4951_v61, %v1956_v38  ;;  %v746_v3 = vmul.f32 %v4521_v10, %v5579_v34  ;;  %v781_v41 = vrot.slane %v743_v59, 2  ;;  %v782_v54 = vrot.slane %v744_v1, 2 }
 0x14d   : > { %v1971_v47 = vadd.f32 -0.28449672, %v1963_v18  ;;  %v712_v30 = vsel %vm355_vm3, %v710_v40, %v711_v23  ;;  %v784_v55 = vrot.slane %v745_v63, 2  ;;  %v4999_v28 = vunpack.c.l.bf16 %v3249_v51 }
 0x14e   : > { %v1972_v52 = vadd.f32 -0.28449672, %v1964_v8  ;;  %v728_v24 = vadd.f32 %v712_v30, %v654_v5  ;;  %v785_v39 = vrot.slane %v746_v3, 2  ;;  %v783_v17 = vsel %vm430_vm4, %v781_v41, %v782_v54 }
 0x14f   : > { %v1979_v19 = vmul.f32 %v4945_v45, %v1971_v47  ;;  %v5001_v10 = vunpack.c.l.bf16 %v3250_v9  ;;  %vm2051_vm0 = vcmp.ge.f32.partialorder %v4899_v13, 0.0  ;;  %v801_v32 = vadd.f32 %v783_v17, %v727_v33 }
 0x150   : > { %v1980_v53 = vmul.f32 %v4951_v61, %v1972_v52  ;;  %v786_v21 = vsel %vm430_vm4, %v784_v55, %v785_v39  ;;  %v5006_v29 = vunpack.c.l.bf16 %v3251_v4  ;;  %vm2052_vm5 = vcmp.ge.f32.partialorder %v4904_v6, 0.0 }
 0x151   : > { %v1987_v12 = vadd.f32 0.2548296, %v1979_v19  ;;  %v802_v44 = vadd.f32 %v786_v21, %v728_v24  ;;  %v846_v58 = vunpack.c.l.bf16 %v4995_v62  ;;  %v855_v49 = vmul.f32 %v4556_v36, %v4539_v37 }
 0x152   : > { %v1988_v0 = vadd.f32 0.2548296, %v1980_v53  ;;  %v856_v38 = vmul.f32 %v4556_v36, %v4545_v56  ;;  %v879_v5 = vmul.f32 %v4565_v31, %v4539_v37  ;;  %v880_v59 = vmul.f32 %v4565_v31, %v4543_v11  ;;  %v5580_v53 = vld [vmem:[#allocation4_spill] sm:$0xff] }
 0x153   : > { %v1995_v1 = vmul.f32 %v4945_v45, %v1987_v12  ;;  %v863_v18 = vadd.f32 %v855_v49, %v801_v32  ;;  %v881_v22 = vmul.f32 %v4565_v31, %v4545_v56  ;;  %v882_v40 = vmul.f32 %v4565_v31, %v4550_v25 }
 0x154   : > { %v1996_v23 = vmul.f32 %v4951_v61, %v1988_v0  ;;  %v864_v8 = vadd.f32 %v856_v38, %v802_v44  ;;  %v917_v33 = vrot.slane %v879_v5, 1  ;;  %v918_v36 = vrot.slane %v880_v59, 1 }
 0x155   : > { %v2035_v63 = vmul.f32 %v4955_v43, %v1995_v1  ;;  %v920_v34 = vrot.slane %v881_v22, 1  ;;  %v921_v3 = vrot.slane %v882_v40, 1  ;;  %v953_v51 = vmul.f32 %v4581_v35, %v4539_v37 }
 0x156   : > { %v2036_v45 = vmul.f32 %v4959_v26, %v1996_v23  ;;  %v919_v9 = vsel %vm355_vm3, %v917_v33, %v918_v36  ;;  %v954_v47 = vmul.f32 %v4581_v35, %v4543_v11  ;;  %v955_v31 = vmul.f32 %v4581_v35, %v4545_v56  ;;  %v5581_v33 = vld [vmem:[#allocation5_spill] sm:$0xff] }
 0x157   : > { %v2043_v61 = vsub.f32 1.0, %v2035_v63  ;;  %v922_v30 = vsel %vm355_vm3, %v920_v34, %v921_v3  ;;  %v937_v41 = vadd.f32 %v919_v9, %v863_v18  ;;  %v956_v43 = vmul.f32 %v4581_v35, %v4550_v25 }
 0x158   : > { %v2044_v54 = vsub.f32 1.0, %v2036_v45  ;;  %v938_v4 = vadd.f32 %v922_v30, %v864_v8  ;;  %v991_v37 = vrot.slane %v953_v51, 2  ;;  %v992_v52 = vrot.slane %v954_v47, 2 }
 0x159   : > { %v2059_v26 = vsub.f32 0.0, %v2043_v61  ;;  %v994_v24 = vrot.slane %v955_v31, 2  ;;  %v995_v55 = vrot.slane %v956_v43, 2  ;;  %v1021_v11 = vmul.f32 %v4597_v46, %v4545_v56 }
 0x15a   : > { %v2060_v39 = vsub.f32 0.0, %v2044_v54  ;;  %v993_v19 = vsel %vm430_vm4, %v991_v37, %v992_v52  ;;  %v1022_v17 = vmul.f32 %v4597_v46, %v4999_v28  ;;  %v1045_v21 = vmul.f32 %v5580_v53, %v4545_v56 }
 0x15b   : > { %v2067_v35 = vsel %vm2051_vm0, %v2043_v61, %v2059_v26  ;;  %v996_v32 = vsel %vm430_vm4, %v994_v24, %v995_v55  ;;  %v1011_v12 = vadd.f32 %v993_v19, %v937_v41  ;;  %v1046_v44 = vmul.f32 %v5580_v53, %v4550_v25  ;;  %v2225_v55 = vld [vmem:[#allocation2 + $0x24] sm:$0x1] }
 0x15c   : > { %v2068_v49 = vsel %vm2052_vm5, %v2044_v54, %v2060_v39  ;;  %v2083_v0 = vadd.f32 1.0, %v2067_v35  ;;  %v1012_v38 = vadd.f32 %v996_v32, %v938_v4  ;;  %v1047_v46 = vmul.f32 %v5580_v53, %v4999_v28 }
 0x15d   : > { %v2084_v5 = vadd.f32 1.0, %v2068_v49  ;;  %v1029_v59 = vadd.f32 %v1021_v11, %v1011_v12  ;;  %v1048_v13 = vmul.f32 %v5580_v53, %v5001_v10  ;;  %v1083_v1 = vrot.slane %v1045_v21, 1  ;;  %v2231_v21 = vld [vmem:[#allocation2 + $0x2c] sm:$0x1] }
 0x15e   : > { %v2091_v18 = vmul.f32 %v2083_v0, %v4923_v16  ;;  %v1030_v22 = vadd.f32 %v1022_v17, %v1012_v38  ;;  %v1084_v40 = vrot.slane %v1046_v44, 1  ;;  %v1086_v23 = vrot.slane %v1047_v46, 1 }
 0x15f   : > { %v2092_v8 = vmul.f32 %v2084_v5, %v4925_v42  ;;  %v1087_v6 = vrot.slane %v1048_v13, 1  ;;  %v1119_v36 = vmul.f32 %v5581_v33, %v4545_v56  ;;  %v1120_v63 = vmul.f32 %v5581_v33, %v4550_v25 }
 0x160   : > { %v5060_v34 = vpack.c.bf16 %v2091_v18, %v2091_v18  ;;  %v1085_v3 = vsel %vm355_vm3, %v1083_v1, %v1084_v40  ;;  %v1121_v51 = vmul.f32 %v5581_v33, %v4999_v28  ;;  %v1122_v16 = vmul.f32 %v5581_v33, %v5001_v10 }
 0x161   : > { %v5067_v45 = vpack.c.bf16 %v2092_v8, %v2092_v8  ;;  %v1088_v42 = vsel %vm355_vm3, %v1086_v23, %v1087_v6  ;;  %v1103_v9 = vadd.f32 %v1085_v3, %v1029_v59  ;;  %v1157_v47 = vrot.slane %v1119_v36, 2 }
 0x162   : > { %2108 = vst.msk [vmem:[#allocation2 + $0x20] sm:$0xf] %vm2103_vm7, %v5060_v34  ;;  %v2145_v56 = vshrl.u32 %v5060_v34, 16  ;;  %v2148_v25 = vshll.u32 %v5060_v34, 16  ;;  %v2262_v31 = vrot.slane %v5060_v34, 7  ;;  %v2414_v61 = vrot.slane %v5060_v34, 6 }
 0x163   : > { %2109 = vst.msk [vmem:[#allocation2 + $0x28] sm:$0xf] %vm2103_vm7, %v5067_v45  ;;  %v2153_v30 = vshrl.u32 %v5067_v45, 16  ;;  %v2156_v41 = vshll.u32 %v5067_v45, 16  ;;  %v2264_v43 = vrot.slane %v5067_v45, 7  ;;  %v2416_v54 = vrot.slane %v5067_v45, 6 }
 0x164   : > { %v2147_v4 = vrot.slane %v2145_v56, 7  ;;  %v2263_v37 = vrot.slane %v2262_v31, 4  ;;  %v2320_v52 = vrot.slane %v2145_v56, 6  ;;  %v2321_v26 = vrot.slane %v2148_v25, 7 }
 0x165   : > { %v2155_v24 = vrot.slane %v2153_v30, 7  ;;  %v2265_v11 = vrot.slane %v2264_v43, 4  ;;  %v2324_v39 = vrot.slane %v2153_v30, 6  ;;  %v2325_v19 = vrot.slane %v2156_v41, 7 }
 0x166   : > { %v2150_v17 = vor.u32 %v2148_v25, %v2147_v4  ;;  %v2151_v53 = vrot.slane %v2147_v4, 4  ;;  %v5082_v35 = vor.u32 %v2321_v26, %v2320_v52  ;;  %v5086_v32 = vrot.slane %v2414_v61, 4 }
 0x167   : > { %v2158_v12 = vor.u32 %v2156_v41, %v2155_v24  ;;  %v2159_v44 = vrot.slane %v2155_v24, 4  ;;  %v5088_v49 = vor.u32 %v2325_v19, %v2324_v39  ;;  %v5092_v0 = vrot.slane %v2416_v54, 4  ;;  %v3270_v24 = vld [vmem:[%s3617_s9 + $0xe4] sm:$0x1] }
 0x168   : > { %v2226_v38 = vsel %vm4165_vm14, %v2151_v53, %v2225_v55  ;;  %v2323_v46 = vrot.slane %v5082_v35, 4  ;;  %v1104_v5 = vadd.f32 %v1088_v42, %v1030_v22  ;;  %v1158_v59 = vrot.slane %v1120_v63, 2  ;;  %v5583_v42 = vld [vmem:[#allocation9_spill] sm:$0xff] }
 0x169   : > { %v2222_v13 = vld [vmem:[#allocation2 + $0x20] sm:$0xf]  ;;  %2227 = vst [vmem:[#allocation2 + $0x24] sm:$0x1] %v2226_v38  ;;  %v2232_v1 = vsel %vm4165_vm14, %v2159_v44, %v2231_v21  ;;  %v2327_v18 = vrot.slane %v5088_v49, 4  ;;  %v1160_v40 = vrot.slane %v1121_v51, 2  ;;  %v1187_v23 = vmul.f32 %v4676_v2, %v4999_v28 }
 0x16a   : > { %v2223_v6 = vsel %vm4175_vm15, %v2150_v17, %v2222_v13  ;;  %v2228_v33 = vld [vmem:[#allocation2 + $0x28] sm:$0xf]  ;;  %2233 = vst [vmem:[#allocation2 + $0x2c] sm:$0x1] %v2232_v1  ;;  %v1159_v22 = vsel %vm430_vm4, %v1157_v47, %v1158_v59  ;;  %v1161_v36 = vrot.slane %v1122_v16, 2  ;;  %v1188_v63 = vmul.f32 %v4676_v2, %v5006_v29 }
 0x16b   : > { %2224 = vst [vmem:[#allocation2 + $0x20] sm:$0xf] %v2223_v6  ;;  %v2229_v3 = vsel %vm4175_vm15, %v2158_v12, %v2228_v33  ;;  %v1177_v51 = vadd.f32 %v1159_v22, %v1103_v9  ;;  %v1211_v56 = vmul.f32 %v5583_v42, %v4999_v28  ;;  %v1212_v25 = vmul.f32 %v5583_v42, %v5001_v10  ;;  %v3269_v47 = vld [vmem:[%s3617_s9 + $0xe0] sm:$0xf] }
 0x16c   : > { %2230 = vst [vmem:[#allocation2 + $0x28] sm:$0xf] %v2229_v3  ;;  %v1162_v30 = vsel %vm430_vm4, %v1160_v40, %v1161_v36  ;;  %v1213_v16 = vmul.f32 %v5583_v42, %v5006_v29  ;;  %v1214_v2 = vmul.f32 %v5583_v42, %v846_v58  ;;  %v1285_v9 = vmul.f32 %v4706_v27, %v4999_v28  ;;  %v3271_v28 = vld [vmem:[%s3617_s9 + $0xe8] sm:$0xf] }
 0x16d   : > { %2296 = vst.msk [vmem:[#allocation2 + $0x20] sm:$0xe] %vm2286_vm12, %v2262_v31  ;;  %v1178_v41 = vadd.f32 %v1162_v30, %v1104_v5  ;;  %v1195_v4 = vadd.f32 %v1187_v23, %v1177_v51  ;;  %v1249_v52 = vrot.slane %v1211_v56, 1  ;;  %v1250_v26 = vrot.slane %v1212_v25, 1  ;;  %v5584_v25 = vld [vmem:[#allocation10_spill] sm:$0xff] }
 0x16e   : > { %2297 = vst.msk [vmem:[#allocation2 + $0x24] sm:$0x1] %vm2288_vm13, %v2263_v37  ;;  %v1252_v55 = vrot.slane %v1213_v16, 1  ;;  %v1253_v39 = vrot.slane %v1214_v2, 1  ;;  %v1286_v19 = vmul.f32 %v4706_v27, %v5001_v10  ;;  %v1287_v17 = vmul.f32 %v4706_v27, %v5006_v29  ;;  %v5136_v37 = vld [vmem:[%s3617_s9 + $0xec] sm:$0x1] }
 0x16f   : > { %2298 = vst.msk [vmem:[#allocation2 + $0x28] sm:$0xe] %vm2286_vm12, %v2264_v43  ;;  %v1196_v31 = vadd.f32 %v1188_v63, %v1178_v41  ;;  %v1251_v53 = vsel %vm355_vm3, %v1249_v52, %v1250_v26  ;;  %v1288_v21 = vmul.f32 %v4706_v27, %v846_v58  ;;  %v1323_v12 = vrot.slane %v1285_v9, 2 }
 0x170   : > { %2299 = vst.msk [vmem:[#allocation2 + $0x2c] sm:$0x1] %vm2288_vm13, %v2265_v11  ;;  %v1254_v10 = vsel %vm355_vm3, %v1252_v55, %v1253_v39  ;;  %v1269_v44 = vadd.f32 %v1251_v53, %v1195_v4  ;;  %v1324_v38 = vrot.slane %v1286_v19, 2  ;;  %v1326_v29 = vrot.slane %v1287_v17, 2 }
 0x171   : > { %v1270_v5 = vadd.f32 %v1254_v10, %v1196_v31  ;;  %v1327_v59 = vrot.slane %v1288_v21, 2  ;;  %v5140_v43 = vunpack.c.l.bf16 %v3269_v47  ;;  %v5142_v13 = vunpack.c.l.bf16 %v3270_v24  ;;  %v5587_v10 = vld [vmem:[#allocation12_spill] sm:$0xff] }
 0x172   : > { %v1325_v62 = vsel %vm430_vm4, %v1323_v12, %v1324_v38  ;;  %v5145_v1 = vunpack.c.l.bf16 %v3271_v28  ;;  %v1388_v27 = vunpack.c.l.bf16 %v5136_v37  ;;  %v1397_v58 = vmul.f32 %v4736_v20, %v4724_v57 }
 0x173   : > { %v1328_v11 = vsel %vm430_vm4, %v1326_v29, %v1327_v59  ;;  %v1343_v40 = vadd.f32 %v1325_v62, %v1269_v44  ;;  %v1398_v23 = vmul.f32 %v4736_v20, %v4729_v48  ;;  %v1421_v6 = vmul.f32 %v4746_v14, %v4724_v57 }
 0x174   : > { %v2382_v33 = vld [vmem:[#allocation2 + $0x20] sm:$0xe]  ;;  %v1344_v22 = vadd.f32 %v1328_v11, %v1270_v5  ;;  %v1422_v36 = vmul.f32 %v4746_v14, %v4727_v50  ;;  %v1423_v63 = vmul.f32 %v4746_v14, %v4729_v48  ;;  %v1424_v3 = vmul.f32 %v4746_v14, %v4731_v60  ;;  %v5588_v5 = vld [vmem:[#allocation13_spill] sm:$0xff] }
 0x175   : > { %v2383_v51 = vsel %vm4238_vm9, %v5082_v35, %v2382_v33  ;;  %v2385_v42 = vld [vmem:[#allocation2 + $0x24] sm:$0x3]  ;;  %v1405_v20 = vadd.f32 %v1397_v58, %v1343_v40  ;;  %v1459_v56 = vrot.slane %v1421_v6, 1  ;;  %v1495_v30 = vmul.f32 %v5584_v25, %v4724_v57 }
 0x176   : > { %2384 = vst [vmem:[#allocation2 + $0x20] sm:$0xe] %v2383_v51  ;;  %v2386_v2 = vsel %vm4246_vm10, %v2323_v46, %v2385_v42  ;;  %v2388_v9 = vld [vmem:[#allocation2 + $0x28] sm:$0xe]  ;;  %v1406_v47 = vadd.f32 %v1398_v23, %v1344_v22  ;;  %v1460_v41 = vrot.slane %v1422_v36, 1  ;;  %v1462_v14 = vrot.slane %v1423_v63, 1 }
 0x177   : > { %2387 = vst [vmem:[#allocation2 + $0x24] sm:$0x3] %v2386_v2  ;;  %v2389_v4 = vsel %vm4238_vm9, %v5088_v49, %v2388_v9  ;;  %v2391_v52 = vld [vmem:[#allocation2 + $0x2c] sm:$0x3]  ;;  %v1463_v26 = vrot.slane %v1424_v3, 1  ;;  %v1496_v57 = vmul.f32 %v5584_v25, %v4727_v50  ;;  %v1497_v35 = vmul.f32 %v5584_v25, %v4729_v48 }
 0x178   : > { %2390 = vst [vmem:[#allocation2 + $0x28] sm:$0xe] %v2389_v4  ;;  %v2392_v46 = vsel %vm4246_vm10, %v2327_v18, %v2391_v52  ;;  %v1461_v24 = vsel %vm355_vm3, %v1459_v56, %v1460_v41  ;;  %v1498_v55 = vmul.f32 %v5584_v25, %v4731_v60  ;;  %v1533_v39 = vrot.slane %v1495_v30, 2  ;;  %v5586_v18 = vld [vmem:[#allocation11_spill] sm:$0xff] }
 0x179   : > { %2393 = vst [vmem:[#allocation2 + $0x2c] sm:$0x3] %v2392_v46  ;;  %v1464_v19 = vsel %vm355_vm3, %v1462_v14, %v1463_v26  ;;  %v1479_v17 = vadd.f32 %v1461_v24, %v1405_v20  ;;  %v1534_v50 = vrot.slane %v1496_v57, 2  ;;  %v1536_v28 = vrot.slane %v1497_v35, 2  ;;  %v5590_v41 = vld [vmem:[#allocation15_spill] sm:$0xff] }
 0x17a   : > { %2448 = vst.msk [vmem:[#allocation2 + $0x20] sm:$0xc] %vm2438_vm6, %v2414_v61  ;;  %v1480_v49 = vadd.f32 %v1464_v19, %v1406_v47  ;;  %v1537_v31 = vrot.slane %v1498_v55, 2  ;;  %v1563_v53 = vmul.f32 %v5586_v18, %v4729_v48  ;;  %v1564_v21 = vmul.f32 %v5586_v18, %v5140_v43 }
 0x17b   : > { %2449 = vst.msk [vmem:[#allocation2 + $0x24] sm:$0x3] %vm2440_vm8, %v5086_v32  ;;  %v1535_v12 = vsel %vm430_vm4, %v1533_v39, %v1534_v50  ;;  %v1587_v44 = vmul.f32 %v5587_v10, %v4729_v48  ;;  %v1588_v34 = vmul.f32 %v5587_v10, %v4731_v60  ;;  %v1589_v61 = vmul.f32 %v5587_v10, %v5140_v43 }
 0x17c   : > { %2450 = vst.msk [vmem:[#allocation2 + $0x28] sm:$0xc] %vm2438_vm6, %v2416_v54  ;;  %v1538_v38 = vsel %vm430_vm4, %v1536_v28, %v1537_v31  ;;  %v1553_v29 = vadd.f32 %v1535_v12, %v1479_v17  ;;  %v1590_v32 = vmul.f32 %v5587_v10, %v5142_v13  ;;  %v1661_v59 = vmul.f32 %v5588_v5, %v4729_v48 }
 0x17d   : > { %2451 = vst.msk [vmem:[#allocation2 + $0x2c] sm:$0x3] %vm2440_vm8, %v5092_v0  ;;  %v1554_v62 = vadd.f32 %v1538_v38, %v1480_v49  ;;  %v1625_v58 = vrot.slane %v1587_v44, 1  ;;  %v1626_v11 = vrot.slane %v1588_v34, 1  ;;  %v1628_v40 = vrot.slane %v1589_v61, 1  ;;  %v5592_v61 = vld [vmem:[#allocation16_spill] sm:$0xff] }
 0x17e   : > { %v1571_v23 = vadd.f32 %v1563_v53, %v1553_v29  ;;  %v1629_v45 = vrot.slane %v1590_v32, 1  ;;  %v1662_v54 = vmul.f32 %v5588_v5, %v4731_v60  ;;  %v1663_v6 = vmul.f32 %v5588_v5, %v5140_v43  ;;  %v5589_v60 = vld [vmem:[#allocation14_spill] sm:$0xff] }
 0x17f   : > { %v1572_v33 = vadd.f32 %v1564_v21, %v1554_v62  ;;  %v1627_v22 = vsel %vm355_vm3, %v1625_v58, %v1626_v11  ;;  %v1664_v48 = vmul.f32 %v5588_v5, %v5142_v13  ;;  %v1699_v36 = vrot.slane %v1661_v59, 2 }
 0x180   : > { %v1630_v0 = vsel %vm355_vm3, %v1628_v40, %v1629_v45  ;;  %v1645_v63 = vadd.f32 %v1627_v22, %v1571_v23  ;;  %v1700_v3 = vrot.slane %v1662_v54, 2  ;;  %v1702_v51 = vrot.slane %v1663_v6, 2 }
 0x181   : > { %v2464_v42 = vld [vmem:[#allocation2 + $0x20] sm:$0xe]  ;;  %v1646_v20 = vadd.f32 %v1630_v0, %v1572_v33  ;;  %v1703_v56 = vrot.slane %v1664_v48, 2  ;;  %v1729_v25 = vmul.f32 %v5589_v60, %v5140_v43  ;;  %v1730_v30 = vmul.f32 %v5589_v60, %v5145_v1 }
 0x182   : > { %v2465_v2 = vld [vmem:[#allocation2 + $0x24] sm:$0x1]  ;;  %v3277_v9 = vrot.slane %v2464_v42, 9  ;;  %v1701_v47 = vsel %vm430_vm4, %v1699_v36, %v1700_v3  ;;  %v1753_v14 = vmul.f32 %v5590_v41, %v5140_v43  ;;  %v1754_v4 = vmul.f32 %v5590_v41, %v5142_v13 }
 0x183   : > { %v2466_v52 = vld [vmem:[#allocation2 + $0x28] sm:$0xe]  ;;  %v2509_v26 = vrot.slane %v2465_v2, 5  ;;  %v1704_v57 = vsel %vm430_vm4, %v1702_v51, %v1703_v56  ;;  %v1719_v35 = vadd.f32 %v1701_v47, %v1645_v63  ;;  %v1755_v46 = vmul.f32 %v5590_v41, %v5145_v1 }
 0x184   : > { %v2467_v24 = vld [vmem:[#allocation2 + $0x2c] sm:$0x1]  ;;  %v3278_v55 = vrot.slane %v2466_v52, 9  ;;  %v1720_v39 = vadd.f32 %v1704_v57, %v1646_v20  ;;  %v1756_v19 = vmul.f32 %v5590_v41, %v1388_v27  ;;  %v1791_v17 = vrot.slane %v1753_v14, 1 }
 0x185   : > { %v2510_v28 = vsel %vm4334_vm2, %v3277_v9, %v2509_v26  ;;  %v2513_v49 = vrot.slane %v2467_v24, 5  ;;  %v1737_v31 = vadd.f32 %v1729_v25, %v1719_v35  ;;  %v1792_v18 = vrot.slane %v1754_v4, 1 }
 0x186   : > { %v2533_v53 = vunpack.c.l.b16 %v2510_v28  ;;  %v1738_v21 = vadd.f32 %v1730_v30, %v1720_v39  ;;  %v1794_v12 = vrot.slane %v1755_v46, 1  ;;  %v1795_v10 = vrot.slane %v1756_v19, 1 }
 0x187   : > { %v2514_v44 = vsel %vm4334_vm2, %v3278_v55, %v2513_v49  ;;  %v1793_v34 = vsel %vm355_vm3, %v1791_v17, %v1792_v18  ;;  %v1827_v38 = vmul.f32 %v5592_v61, %v5140_v43  ;;  %v1828_v29 = vmul.f32 %v5592_v61, %v5142_v13 }
 0x188   : > { %v2534_v32 = vunpack.c.l.b16 %v2514_v44  ;;  %v1796_v5 = vsel %vm355_vm3, %v1794_v12, %v1795_v10  ;;  %v1811_v59 = vadd.f32 %v1793_v34, %v1737_v31  ;;  %v1829_v62 = vmul.f32 %v5592_v61, %v5145_v1 }
 0x189   : > { %v1830_v58 = vmul.f32 %v5592_v61, %v1388_v27  ;;  %v1865_v11 = vrot.slane %v1827_v38, 2  ;;  %v1866_v40 = vrot.slane %v1828_v29, 2  ;;  %v1812_v45 = vadd.f32 %v1796_v5, %v1738_v21 }
 0x18a   : > { %v2539_v23 = vpack.c.b16 %v2534_v32, %v2533_v53  ;;  %v1868_v54 = vrot.slane %v1829_v62, 2 }
 0x18b   : > { %v1867_v43 = vsel %vm430_vm4, %v1865_v11, %v1866_v40  ;;  %v1869_v6 = vrot.slane %v1830_v58, 2 }
 0x18c   : > { %3287 = vmatmul.msk.bf16.vlgmr.msra.gmra.mxu2 %vm2546_vm1, %v2539_v23  ;;  %v1885_v13 = vadd.f32 %v1867_v43, %v1811_v59 }
 0x18d   : > { %v1870_v33 = vsel %vm430_vm4, %v1868_v54, %v1869_v6 }
 0x18e   : > { %v1886_v22 = vadd.f32 %v1870_v33, %v1812_v45  ;;  %v1893_v48 = vmul.f32 0.70710677, %v1885_v13  ;;  %v2077_v61 = vmul.f32 0.5, %v1885_v13 }
 0x190   : > { %v1894_v1 = vmul.f32 0.70710677, %v1886_v22  ;;  %v1901_v36 = vand.u32 2147483647, %v1893_v48  ;;  %vm2053_vm3 = vcmp.ge.f32.partialorder %v1893_v48, 0.0  ;;  %v2078_v32 = vmul.f32 0.5, %v1886_v22 }
 0x191   : > { %v2237_v22 = vld [vmem:[#allocation2 + $0x34] sm:$0x1] }
 0x192   : > { %v1902_v37 = vand.u32 2147483647, %v1894_v1  ;;  %v1909_v0 = vmul.f32 0.3275911, %v1901_v36  ;;  %v2005_v51 = vsub.f32 0.0, %v1901_v36  ;;  %vm2054_vm4 = vcmp.ge.f32.partialorder %v1894_v1, 0.0 }
 0x194   : > { %v1910_v27 = vmul.f32 0.3275911, %v1902_v37  ;;  %v1917_v63 = vadd.f32 1.0, %v1909_v0  ;;  %v2006_v20 = vsub.f32 0.0, %v1902_v37  ;;  %v2013_v25 = vmul.f32 %v2005_v51, %v1901_v36 }
 0x196   : > { %v1918_v3 = vadd.f32 1.0, %v1910_v27  ;;  %3411 = vrcp.f32 %v1917_v63  ;;  %v2014_v9 = vmul.f32 %v2006_v20, %v1902_v37  ;;  %v2027_v14 = vmul.f32 1.442695, %v2013_v25  ;;  %v2243_v63 = vld [vmem:[#allocation2 + $0x3c] sm:$0x1] }
 0x198   : > { %3413 = vrcp.f32 %v1918_v3  ;;  %v2029_v26 = vmul.f32 1.442695, %v2014_v9 }
 0x199   : > { %3415 = vpow2.f32 %v2027_v14 }
 0x19a   : > { %3417 = vpow2.f32 %v2029_v26 }
 0x19c   : > { %v3412_v42 = vpop.eup %3411 }
 0x19d   : > { %v1933_v56 = vmul.f32 1.0614054, %v3412_v42 }
 0x19e   : > { %v3414_v60 = vpop.eup %3413 }
 0x19f   : > { %v1934_v30 = vmul.f32 1.0614054, %v3414_v60  ;;  %v1941_v2 = vadd.f32 -1.4531521, %v1933_v56  ;;  %v3416_v28 = vpop.eup %3415 }
 0x1a0   : > { %v3418_v18 = vpop.eup %3417 }
 0x1a1   : > { %v1942_v47 = vadd.f32 -1.4531521, %v1934_v30  ;;  %v1949_v41 = vmul.f32 %v3412_v42, %v1941_v2 }
 0x1a3   : > { %v1950_v4 = vmul.f32 %v3414_v60, %v1942_v47  ;;  %v1957_v52 = vadd.f32 1.4214138, %v1949_v41  ;;  %v2572_v41 = vpop.f32.mrf.mxu0 }
 0x1a5   : > { %v1958_v57 = vadd.f32 1.4214138, %v1950_v4  ;;  %v1965_v35 = vmul.f32 %v3412_v42, %v1957_v52 }
 0x1a7   : > { %v1966_v46 = vmul.f32 %v3414_v60, %v1958_v57  ;;  %v1973_v24 = vadd.f32 -0.28449672, %v1965_v35 }
 0x1a9   : > { %v1974_v55 = vadd.f32 -0.28449672, %v1966_v46  ;;  %v1981_v39 = vmul.f32 %v3412_v42, %v1973_v24  ;;  %v2573_v46 = vadd.f32 %v5279_v7, %v2572_v41 }
 0x1ab   : > { %v1982_v19 = vmul.f32 %v3414_v60, %v1974_v55  ;;  %v1989_v17 = vadd.f32 0.2548296, %v1981_v39  ;;  %2592 = vxpose.xlu0.b32.start.end [1/1] (short) (narrow) %v2573_v46, 16 }
 0x1ad   : > { %v1990_v49 = vadd.f32 0.2548296, %v1982_v19  ;;  %v1997_v31 = vmul.f32 %v3412_v42, %v1989_v17 }
 0x1af   : > { %v1998_v53 = vmul.f32 %v3414_v60, %v1990_v49  ;;  %v2037_v21 = vmul.f32 %v3416_v28, %v1997_v31 }
 0x1b1   : > { %v2038_v12 = vmul.f32 %v3418_v18, %v1998_v53  ;;  %v2045_v10 = vsub.f32 1.0, %v2037_v21  ;;  %v2577_v14 = vpop.f32.mrf.mxu1 }
 0x1b2   : > { %v2578_v35 = vadd.f32 %v5279_v7, %v2577_v14 }
 0x1b3   : > { %v2046_v44 = vsub.f32 1.0, %v2038_v12  ;;  %v2061_v34 = vsub.f32 0.0, %v2045_v10 }
 0x1b4   : > { %2713 = vxpose.xlu1.b32.start.end [1/1] (short) (narrow) %v2578_v35, 16 }
 0x1b5   : > { %v2062_v38 = vsub.f32 0.0, %v2046_v44  ;;  %v2069_v29 = vsel %vm2053_vm3, %v2045_v10, %v2061_v34  ;;  %v2574_v10 = vpop.f32.mrf.mxu0 }
 0x1b6   : > { %v2085_v5 = vadd.f32 1.0, %v2069_v29 }
 0x1b7   : > { %v2070_v59 = vsel %vm2054_vm4, %v2046_v44, %v2062_v38 }
 0x1b8   : > { %v2086_v62 = vadd.f32 1.0, %v2070_v59  ;;  %v2093_v58 = vmul.f32 %v2085_v5, %v2077_v61  ;;  %v2575_v61 = vadd.f32 %v5279_v7, %v2574_v10 }
 0x1b9   : > { %v2579_v44 = vpop.f32.mrf.mxu1 }
 0x1ba   : > { %v2094_v11 = vmul.f32 %v2086_v62, %v2078_v32  ;;  %v5252_v40 = vpack.c.bf16 %v2093_v58, %v2093_v58  ;;  %v2580_v15 = vadd.f32 %v5279_v7, %v2579_v44 }
 0x1bb   : > { %2653 = vxpose.xlu0.b32.start.end [1/1] (short) (narrow) %v2575_v61, 16 }
 0x1bc   : > { %v5254_v23 = vpack.c.bf16 %v2094_v11, %v2094_v11  ;;  %2110 = vst.msk [vmem:[#allocation2 + $0x30] sm:$0xf] %vm2103_vm7, %v5252_v40  ;;  %v2161_v45 = vshrl.u32 %v5252_v40, 16  ;;  %v2164_v54 = vshll.u32 %v5252_v40, 16  ;;  %v2266_v43 = vrot.slane %v5252_v40, 7 }
 0x1bd   : > { %v2418_v47 = vrot.slane %v5252_v40, 6 }
 0x1be   : > { %2111 = vst.msk [vmem:[#allocation2 + $0x38] sm:$0xf] %vm2103_vm7, %v5254_v23  ;;  %v2163_v6 = vrot.slane %v2161_v45, 7  ;;  %v2169_v13 = vshrl.u32 %v5254_v23, 16  ;;  %v2172_v33 = vshll.u32 %v5254_v23, 16  ;;  %v2267_v48 = vrot.slane %v2266_v43, 4 }
 0x1bf   : > { %v2328_v1 = vrot.slane %v2161_v45, 6  ;;  %v2329_v27 = vrot.slane %v2164_v54, 7  ;;  %v2268_v20 = vrot.slane %v5254_v23, 7  ;;  %v2419_v24 = vrot.slane %v2418_v47, 4 }
 0x1c0   : > { %v2166_v36 = vor.u32 %v2164_v54, %v2163_v6  ;;  %v2167_v37 = vrot.slane %v2163_v6, 4  ;;  %v2171_v0 = vrot.slane %v2169_v13, 7  ;;  %v2332_v9 = vrot.slane %v2169_v13, 6 }
 0x1c1   : > { %v2330_v30 = vor.u32 %v2329_v27, %v2328_v1  ;;  %v2269_v52 = vrot.slane %v2268_v20, 4  ;;  %v2333_v26 = vrot.slane %v2172_v33, 7  ;;  %v2420_v17 = vrot.slane %v5254_v23, 6 }
 0x1c2   : > { %v2174_v3 = vor.u32 %v2172_v33, %v2171_v0  ;;  %v2175_v51 = vrot.slane %v2171_v0, 4  ;;  %v2238_v42 = vsel %vm4165_vm14, %v2167_v37, %v2237_v22  ;;  %vm2642_vm7 = vcmask 57344  }
 0x1c3   : > { %v2234_v56 = vld [vmem:[#allocation2 + $0x30] sm:$0xf]  ;;  %2239 = vst [vmem:[#allocation2 + $0x34] sm:$0x1] %v2238_v42  ;;  %v2331_v57 = vrot.slane %v2330_v30, 4  ;;  %v2334_v8 = vor.u32 %v2333_v26, %v2332_v9  ;;  %v2421_v12 = vrot.slane %v2420_v17, 4 }
 0x1c4   : > { %v2235_v60 = vsel %vm4175_vm15, %v2166_v36, %v2234_v56  ;;  %v2244_v25 = vsel %vm4165_vm14, %v2175_v51, %v2243_v63  ;;  %2301 = vst.msk [vmem:[#allocation2 + $0x34] sm:$0x1] %vm2288_vm13, %v2267_v48  ;;  %2773 = vxpose.xlu1.b32.start.end [1/1] (short) (narrow) %v2580_v15, 16 }
 0x1c5   : > { %2236 = vst [vmem:[#allocation2 + $0x30] sm:$0xf] %v2235_v60  ;;  %v2240_v2 = vld [vmem:[#allocation2 + $0x38] sm:$0xf]  ;;  %v2335_v19 = vrot.slane %v2334_v8, 4 }
 0x1c6   : > { %v2241_v4 = vsel %vm4175_vm15, %v2174_v3, %v2240_v2  ;;  %2245 = vst [vmem:[#allocation2 + $0x3c] sm:$0x1] %v2244_v25 }
 0x1c7   : > { %2242 = vst [vmem:[#allocation2 + $0x38] sm:$0xf] %v2241_v4 }
 0x1c8   : > { %2300 = vst.msk [vmem:[#allocation2 + $0x30] sm:$0xe] %vm2286_vm12, %v2266_v43 }
 0x1c9   : > { %2302 = vst.msk [vmem:[#allocation2 + $0x38] sm:$0xe] %vm2286_vm12, %v2268_v20 }
 0x1ca   : > { %2303 = vst.msk [vmem:[#allocation2 + $0x3c] sm:$0x1] %vm2288_vm13, %v2269_v52 }
 0x1cb   : > { %v2397_v55 = vld [vmem:[#allocation2 + $0x34] sm:$0x3] }
 0x1cc   : > { %v2398_v39 = vsel %vm4246_vm10, %v2331_v57, %v2397_v55 }
 0x1cd   : > { %2399 = vst [vmem:[#allocation2 + $0x34] sm:$0x3] %v2398_v39 }
 0x1ce   : > { %2453 = vst.msk [vmem:[#allocation2 + $0x34] sm:$0x3] %vm2440_vm8, %v2419_v24 }
 0x1cf   : > { %v2394_v28 = vld [vmem:[#allocation2 + $0x30] sm:$0xe] }
 0x1d0   : > { %v2395_v49 = vsel %vm4238_vm9, %v2330_v30, %v2394_v28  ;;  %v2400_v31 = vld [vmem:[#allocation2 + $0x38] sm:$0xe] }
 0x1d1   : > { %2396 = vst [vmem:[#allocation2 + $0x30] sm:$0xe] %v2395_v49  ;;  %v2401_v18 = vsel %vm4238_vm9, %v2334_v8, %v2400_v31  ;;  %v2403_v53 = vld [vmem:[#allocation2 + $0x3c] sm:$0x3] }
 0x1d2   : > { %2402 = vst [vmem:[#allocation2 + $0x38] sm:$0xe] %v2401_v18  ;;  %v2404_v21 = vsel %vm4246_vm10, %v2335_v19, %v2403_v53 }
 0x1d3   : > { %2405 = vst [vmem:[#allocation2 + $0x3c] sm:$0x3] %v2404_v21 }
 0x1d4   : > { %2452 = vst.msk [vmem:[#allocation2 + $0x30] sm:$0xc] %vm2438_vm6, %v2418_v47 }
 0x1d5   : > { %2454 = vst.msk [vmem:[#allocation2 + $0x38] sm:$0xc] %vm2438_vm6, %v2420_v17  ;;  %v2469_v34 = vld [vmem:[#allocation2 + $0x34] sm:$0x1] }
 0x1d6   : > { %2455 = vst.msk [vmem:[#allocation2 + $0x3c] sm:$0x3] %vm2440_vm8, %v2421_v12  ;;  %v2517_v38 = vrot.slane %v2469_v34, 5 }
 0x1db   : > { %v2468_v16 = vld [vmem:[#allocation2 + $0x30] sm:$0xe] }
 0x1dc   : > { %v2470_v29 = vld [vmem:[#allocation2 + $0x38] sm:$0xe]  ;;  %v3279_v32 = vrot.slane %v2468_v16, 9 }
 0x1dd   : > { %v2471_v5 = vld [vmem:[#allocation2 + $0x3c] sm:$0x1]  ;;  %v3280_v59 = vrot.slane %v2470_v29, 9 }
 0x1de   : > { %v2518_v62 = vsel %vm4334_vm2, %v3279_v32, %v2517_v38  ;;  %v2521_v58 = vrot.slane %v2471_v5, 5 }
 0x1df   : > { %v2535_v11 = vunpack.c.l.b16 %v2518_v62 }
 0x1e0   : > { %v2522_v40 = vsel %vm4334_vm2, %v3280_v59, %v2521_v58 }
 0x1e1   : > { %v2536_v23 = vunpack.c.l.b16 %v2522_v40 }
 0x1e3   : > { %v2540_v45 = vpack.c.b16 %v2536_v23, %v2535_v11 }
 0x1e5   : > { %3288 = vmatmul.msk.bf16.vlgmr.msra.gmra.mxu3 %vm2546_vm1, %v2540_v45 }
 0x20f   : > { %v2582_v54 = vpop.f32.mrf.mxu2 }
 0x210   : > { %v2583_v43 = vadd.f32 %v5279_v7, %v2582_v54 }
 0x212   : > { %2833 = vxpose.xlu2.b32.start.end [1/1] (short) (narrow) %v2583_v43, 16 }
 0x217   : > { %v2584_v6 = vpop.f32.mrf.mxu2 }
 0x218   : > { %v2585_v13 = vadd.f32 %v5279_v7, %v2584_v6 }
 0x222   : > { %2893 = vxpose.xlu2.b32.start.end [1/1] (short) (narrow) %v2585_v13, 16 }
 0x24f   : > { %v2608_v48 = vpop.trf.xlu0 }
 0x250   : > { %2643 = vst.msk [vmem:[%s3601_s16] sm:$0x1] %vm2642_vm7, %v2608_v48  ;;  %v2626_v20 = vrot.slane %v2608_v48, 1  ;;  %v2627_v56 = vrot.slane %v2608_v48, 2  ;;  %v2628_v60 = vrot.slane %v2608_v48, 3  ;;  %v2629_v25 = vrot.slane %v2608_v48, 4 }
 0x251   : > { %v2630_v30 = vrot.slane %v2608_v48, 5  ;;  %v2631_v2 = vrot.slane %v2608_v48, 6  ;;  %v2632_v47 = vrot.slane %v2608_v48, 7 }
 0x252   : > { %2644 = vst.msk [vmem:[%s3601_s16 + $0x8] sm:$0x1] %vm2642_vm7, %v2626_v20 }
 0x253   : > { %2645 = vst.msk [vmem:[%s3601_s16 + $0x10] sm:$0x1] %vm2642_vm7, %v2627_v56 }
 0x254   : > { %2646 = vst.msk [vmem:[%s3601_s16 + $0x18] sm:$0x1] %vm2642_vm7, %v2628_v60 }
 0x255   : > { %2647 = vst.msk [vmem:[%s3601_s16 + $0x20] sm:$0x1] %vm2642_vm7, %v2629_v25 }
 0x256   : > { %2648 = vst.msk [vmem:[%s3601_s16 + $0x28] sm:$0x1] %vm2642_vm7, %v2630_v30 }
 0x257   : > { %v2609_v41 = vpop.trf.xlu0  ;;  %2649 = vst.msk [vmem:[%s3601_s16 + $0x30] sm:$0x1] %vm2642_vm7, %v2631_v2 }
 0x258   : > { %v2729_v50 = vpop.trf.xlu1  ;;  %2650 = vst.msk [vmem:[%s3601_s16 + $0x38] sm:$0x1] %vm2642_vm7, %v2632_v47  ;;  %v2633_v4 = vrot.slane %v2609_v41, 1 }
 0x259   : > { %v2747_v1 = vrot.slane %v2729_v50, 1  ;;  %v2748_v36 = vrot.slane %v2729_v50, 2  ;;  %v2749_v37 = vrot.slane %v2729_v50, 3  ;;  %2763 = vst.msk [vmem:[%s3601_s16 + $0x2] sm:$0x1] %vm2642_vm7, %v2729_v50  ;;  %v2750_v27 = vrot.slane %v2729_v50, 4 }
 0x25a   : > { %v2751_v3 = vrot.slane %v2729_v50, 5  ;;  %v2752_v51 = vrot.slane %v2729_v50, 6  ;;  %v2753_v42 = vrot.slane %v2729_v50, 7  ;;  %2651 = vst.msk [vmem:[%s3601_s16 + $0x40] sm:$0x1] %vm2642_vm7, %v2609_v41 }
 0x25b   : > { %2764 = vst.msk [vmem:[%s3601_s16 + $0xa] sm:$0x1] %vm2642_vm7, %v2747_v1 }
 0x25c   : > { %2765 = vst.msk [vmem:[%s3601_s16 + $0x12] sm:$0x1] %vm2642_vm7, %v2748_v36 }
 0x25d   : > { %2766 = vst.msk [vmem:[%s3601_s16 + $0x1a] sm:$0x1] %vm2642_vm7, %v2749_v37 }
 0x25e   : > { %2767 = vst.msk [vmem:[%s3601_s16 + $0x22] sm:$0x1] %vm2642_vm7, %v2750_v27 }
 0x25f   : > { %2768 = vst.msk [vmem:[%s3601_s16 + $0x2a] sm:$0x1] %vm2642_vm7, %v2751_v3  ;;  %v2669_v26 = vpop.trf.xlu0 }
 0x260   : > { %2769 = vst.msk [vmem:[%s3601_s16 + $0x32] sm:$0x1] %vm2642_vm7, %v2752_v51  ;;  %v2730_v9 = vpop.trf.xlu1  ;;  %v2687_v39 = vrot.slane %v2669_v26, 1  ;;  %v2688_v19 = vrot.slane %v2669_v26, 2  ;;  %v2689_v17 = vrot.slane %v2669_v26, 3  ;;  %v2690_v28 = vrot.slane %v2669_v26, 4 }
 0x261   : > { %2770 = vst.msk [vmem:[%s3601_s16 + $0x3a] sm:$0x1] %vm2642_vm7, %v2753_v42  ;;  %v2754_v14 = vrot.slane %v2730_v9, 1  ;;  %v2691_v49 = vrot.slane %v2669_v26, 5  ;;  %v2692_v31 = vrot.slane %v2669_v26, 6  ;;  %v2693_v53 = vrot.slane %v2669_v26, 7 }
 0x262   : > { %2771 = vst.msk [vmem:[%s3601_s16 + $0x42] sm:$0x1] %vm2642_vm7, %v2730_v9 }
 0x263   : > { %2772 = vst.msk [vmem:[%s3601_s16 + $0x4a] sm:$0x1] %vm2642_vm7, %v2754_v14 }
 0x264   : > { %2652 = vst.msk [vmem:[%s3601_s16 + $0x48] sm:$0x1] %vm2642_vm7, %v2633_v4 }
 0x265   : > { %2703 = vst.msk [vmem:[%s3601_s16 + $0x1] sm:$0x1] %vm2642_vm7, %v2669_v26 }
 0x266   : > { %2704 = vst.msk [vmem:[%s3601_s16 + $0x9] sm:$0x1] %vm2642_vm7, %v2687_v39 }
 0x267   : > { %2705 = vst.msk [vmem:[%s3601_s16 + $0x11] sm:$0x1] %vm2642_vm7, %v2688_v19  ;;  %v2670_v21 = vpop.trf.xlu0 }
 0x268   : > { %v2587_v33 = vpop.f32.mrf.mxu3  ;;  %v2789_v52 = vpop.trf.xlu1  ;;  %2706 = vst.msk [vmem:[%s3601_s16 + $0x19] sm:$0x1] %vm2642_vm7, %v2689_v17  ;;  %v2694_v10 = vrot.slane %v2670_v21, 1 }
 0x269   : > { %v2588_v22 = vadd.f32 %v5279_v7, %v2587_v33  ;;  %v2808_v57 = vrot.slane %v2789_v52, 2  ;;  %v2809_v35 = vrot.slane %v2789_v52, 3  ;;  %2823 = vst.msk [vmem:[%s3601_s16 + $0x3] sm:$0x1] %vm2642_vm7, %v2789_v52  ;;  %v2810_v46 = vrot.slane %v2789_v52, 4 }
 0x26a   : > { %v2811_v8 = vrot.slane %v2789_v52, 5  ;;  %v2812_v24 = vrot.slane %v2789_v52, 6  ;;  %v2813_v55 = vrot.slane %v2789_v52, 7  ;;  %2707 = vst.msk [vmem:[%s3601_s16 + $0x21] sm:$0x1] %vm2642_vm7, %v2690_v28 }
 0x26b   : > { %2953 = vxpose.xlu0.b32.start.end [1/1] (short) (narrow) %v2588_v22, 16  ;;  %2825 = vst.msk [vmem:[%s3601_s16 + $0x13] sm:$0x1] %vm2642_vm7, %v2808_v57 }
 0x26c   : > { %2826 = vst.msk [vmem:[%s3601_s16 + $0x1b] sm:$0x1] %vm2642_vm7, %v2809_v35 }
 0x26d   : > { %2827 = vst.msk [vmem:[%s3601_s16 + $0x23] sm:$0x1] %vm2642_vm7, %v2810_v46 }
 0x26e   : > { %2828 = vst.msk [vmem:[%s3601_s16 + $0x2b] sm:$0x1] %vm2642_vm7, %v2811_v8 }
 0x26f   : > { %2829 = vst.msk [vmem:[%s3601_s16 + $0x33] sm:$0x1] %vm2642_vm7, %v2812_v24 }
 0x270   : > { %v2589_v0 = vpop.f32.mrf.mxu3  ;;  %2830 = vst.msk [vmem:[%s3601_s16 + $0x3b] sm:$0x1] %vm2642_vm7, %v2813_v55  ;;  %v2790_v18 = vpop.trf.xlu1 }
 0x271   : > { %v2590_v63 = vadd.f32 %v5279_v7, %v2589_v0  ;;  %v2807_v7 = vrot.slane %v2789_v52, 1  ;;  %2708 = vst.msk [vmem:[%s3601_s16 + $0x29] sm:$0x1] %vm2642_vm7, %v2691_v49  ;;  %v2814_v12 = vrot.slane %v2790_v18, 1 }
 0x272   : > { %2709 = vst.msk [vmem:[%s3601_s16 + $0x31] sm:$0x1] %vm2642_vm7, %v2692_v31 }
 0x273   : > { %3013 = vxpose.xlu1.b32.start.end [1/1] (short) (narrow) %v2590_v63, 16  ;;  %2824 = vst.msk [vmem:[%s3601_s16 + $0xb] sm:$0x1] %vm2642_vm7, %v2807_v7 }
 0x274   : > { %2710 = vst.msk [vmem:[%s3601_s16 + $0x39] sm:$0x1] %vm2642_vm7, %v2693_v53 }
 0x275   : > { %2831 = vst.msk [vmem:[%s3601_s16 + $0x43] sm:$0x1] %vm2642_vm7, %v2790_v18 }
 0x276   : > { %2832 = vst.msk [vmem:[%s3601_s16 + $0x4b] sm:$0x1] %vm2642_vm7, %v2814_v12 }
 0x277   : > { %2711 = vst.msk [vmem:[%s3601_s16 + $0x41] sm:$0x1] %vm2642_vm7, %v2670_v21 }
 0x278   : > { %2712 = vst.msk [vmem:[%s3601_s16 + $0x49] sm:$0x1] %vm2642_vm7, %v2694_v10 }
 0x2ab   : > { %v2849_v44 = vpop.trf.xlu2 }
 0x2ac   : > { %v2867_v34 = vrot.slane %v2849_v44, 1  ;;  %v2868_v61 = vrot.slane %v2849_v44, 2  ;;  %v2869_v15 = vrot.slane %v2849_v44, 3  ;;  %2883 = vst.msk [vmem:[%s3601_s16 + $0x4] sm:$0x1] %vm2642_vm7, %v2849_v44  ;;  %v2870_v38 = vrot.slane %v2849_v44, 4 }
 0x2ad   : > { %v2871_v16 = vrot.slane %v2849_v44, 5  ;;  %v2872_v29 = vrot.slane %v2849_v44, 6  ;;  %v2873_v32 = vrot.slane %v2849_v44, 7 }
 0x2ae   : > { %2884 = vst.msk [vmem:[%s3601_s16 + $0xc] sm:$0x1] %vm2642_vm7, %v2867_v34 }
 0x2af   : > { %2885 = vst.msk [vmem:[%s3601_s16 + $0x14] sm:$0x1] %vm2642_vm7, %v2868_v61 }
 0x2b0   : > { %2886 = vst.msk [vmem:[%s3601_s16 + $0x1c] sm:$0x1] %vm2642_vm7, %v2869_v15 }
 0x2b1   : > { %2887 = vst.msk [vmem:[%s3601_s16 + $0x24] sm:$0x1] %vm2642_vm7, %v2870_v38 }
 0x2b2   : > { %2888 = vst.msk [vmem:[%s3601_s16 + $0x2c] sm:$0x1] %vm2642_vm7, %v2871_v16 }
 0x2b3   : > { %2889 = vst.msk [vmem:[%s3601_s16 + $0x34] sm:$0x1] %vm2642_vm7, %v2872_v29  ;;  %v2850_v5 = vpop.trf.xlu2 }
 0x2b4   : > { %2890 = vst.msk [vmem:[%s3601_s16 + $0x3c] sm:$0x1] %vm2642_vm7, %v2873_v32  ;;  %v2874_v59 = vrot.slane %v2850_v5, 1 }
 0x2b5   : > { %2891 = vst.msk [vmem:[%s3601_s16 + $0x44] sm:$0x1] %vm2642_vm7, %v2850_v5 }
 0x2b6   : > { %2892 = vst.msk [vmem:[%s3601_s16 + $0x4c] sm:$0x1] %vm2642_vm7, %v2874_v59 }
 0x2bb   : > { %v2909_v62 = vpop.trf.xlu2 }
 0x2bc   : > { %v2927_v58 = vrot.slane %v2909_v62, 1  ;;  %v2928_v11 = vrot.slane %v2909_v62, 2  ;;  %v2929_v40 = vrot.slane %v2909_v62, 3  ;;  %2943 = vst.msk [vmem:[%s3601_s16 + $0x5] sm:$0x1] %vm2642_vm7, %v2909_v62  ;;  %v2930_v23 = vrot.slane %v2909_v62, 4 }
 0x2bd   : > { %v2931_v45 = vrot.slane %v2909_v62, 5  ;;  %v2932_v54 = vrot.slane %v2909_v62, 6  ;;  %v2933_v43 = vrot.slane %v2909_v62, 7 }
 0x2be   : > { %2944 = vst.msk [vmem:[%s3601_s16 + $0xd] sm:$0x1] %vm2642_vm7, %v2927_v58 }
 0x2bf   : > { %2945 = vst.msk [vmem:[%s3601_s16 + $0x15] sm:$0x1] %vm2642_vm7, %v2928_v11 }
 0x2c0   : > { %2946 = vst.msk [vmem:[%s3601_s16 + $0x1d] sm:$0x1] %vm2642_vm7, %v2929_v40 }
 0x2c1   : > { %2947 = vst.msk [vmem:[%s3601_s16 + $0x25] sm:$0x1] %vm2642_vm7, %v2930_v23 }
 0x2c2   : > { %2948 = vst.msk [vmem:[%s3601_s16 + $0x2d] sm:$0x1] %vm2642_vm7, %v2931_v45 }
 0x2c3   : > { %2949 = vst.msk [vmem:[%s3601_s16 + $0x35] sm:$0x1] %vm2642_vm7, %v2932_v54  ;;  %v2910_v6 = vpop.trf.xlu2 }
 0x2c4   : > { %2950 = vst.msk [vmem:[%s3601_s16 + $0x3d] sm:$0x1] %vm2642_vm7, %v2933_v43  ;;  %v2934_v13 = vrot.slane %v2910_v6, 1 }
 0x2c5   : > { %2951 = vst.msk [vmem:[%s3601_s16 + $0x45] sm:$0x1] %vm2642_vm7, %v2910_v6 }
 0x2c6   : > { %2952 = vst.msk [vmem:[%s3601_s16 + $0x4d] sm:$0x1] %vm2642_vm7, %v2934_v13 }
 0x30f   : > { %v2969_v33 = vpop.trf.xlu0 }
 0x310   : > { %v2987_v22 = vrot.slane %v2969_v33, 1  ;;  %v2988_v50 = vrot.slane %v2969_v33, 2  ;;  %v2989_v48 = vrot.slane %v2969_v33, 3  ;;  %3003 = vst.msk [vmem:[%s3601_s16 + $0x6] sm:$0x1] %vm2642_vm7, %v2969_v33  ;;  %v2990_v1 = vrot.slane %v2969_v33, 4 }
 0x311   : > { %v2991_v36 = vrot.slane %v2969_v33, 5  ;;  %v2992_v37 = vrot.slane %v2969_v33, 6  ;;  %v2993_v0 = vrot.slane %v2969_v33, 7 }
 0x312   : > { %3004 = vst.msk [vmem:[%s3601_s16 + $0xe] sm:$0x1] %vm2642_vm7, %v2987_v22 }
 0x313   : > { %3005 = vst.msk [vmem:[%s3601_s16 + $0x16] sm:$0x1] %vm2642_vm7, %v2988_v50 }
 0x314   : > { %3006 = vst.msk [vmem:[%s3601_s16 + $0x1e] sm:$0x1] %vm2642_vm7, %v2989_v48 }
 0x315   : > { %3007 = vst.msk [vmem:[%s3601_s16 + $0x26] sm:$0x1] %vm2642_vm7, %v2990_v1 }
 0x316   : > { %3008 = vst.msk [vmem:[%s3601_s16 + $0x2e] sm:$0x1] %vm2642_vm7, %v2991_v36 }
 0x317   : > { %v3029_v27 = vpop.trf.xlu1  ;;  %3009 = vst.msk [vmem:[%s3601_s16 + $0x36] sm:$0x1] %vm2642_vm7, %v2992_v37  ;;  %v2970_v25 = vpop.trf.xlu0 }
 0x318   : > { %v3047_v63 = vrot.slane %v3029_v27, 1  ;;  %v3048_v3 = vrot.slane %v3029_v27, 2  ;;  %v3049_v51 = vrot.slane %v3029_v27, 3  ;;  %3063 = vst.msk [vmem:[%s3601_s16 + $0x7] sm:$0x1] %vm2642_vm7, %v3029_v27  ;;  %v3050_v42 = vrot.slane %v3029_v27, 4 }
 0x319   : > { %3010 = vst.msk [vmem:[%s3601_s16 + $0x3e] sm:$0x1] %vm2642_vm7, %v2993_v0  ;;  %v3051_v20 = vrot.slane %v3029_v27, 5  ;;  %v3052_v56 = vrot.slane %v3029_v27, 6  ;;  %v3053_v60 = vrot.slane %v3029_v27, 7  ;;  %v2994_v9 = vrot.slane %v2970_v25, 1 }
 0x31a   : > { %3064 = vst.msk [vmem:[%s3601_s16 + $0xf] sm:$0x1] %vm2642_vm7, %v3047_v63 }
 0x31b   : > { %3065 = vst.msk [vmem:[%s3601_s16 + $0x17] sm:$0x1] %vm2642_vm7, %v3048_v3 }
 0x31c   : > { %3066 = vst.msk [vmem:[%s3601_s16 + $0x1f] sm:$0x1] %vm2642_vm7, %v3049_v51 }
 0x31d   : > { %3067 = vst.msk [vmem:[%s3601_s16 + $0x27] sm:$0x1] %vm2642_vm7, %v3050_v42 }
 0x31e   : > { %3068 = vst.msk [vmem:[%s3601_s16 + $0x2f] sm:$0x1] %vm2642_vm7, %v3051_v20 }
 0x31f   : > { %3069 = vst.msk [vmem:[%s3601_s16 + $0x37] sm:$0x1] %vm2642_vm7, %v3052_v56  ;;  %v3030_v30 = vpop.trf.xlu1  ;;  %v3130_v47 = vld [vmem:[%s3601_s16] sm:$0xff] (%p3580_p5) }
 0x320   : > { %3070 = vst.msk [vmem:[%s3601_s16 + $0x3f] sm:$0x1] %vm2642_vm7, %v3053_v60  ;;  %v3054_v2 = vrot.slane %v3030_v30, 1  ;;  %3079 = sbr.rel (!%p3580_p5) target bundleno = 815 (0x32f), region = 48 }
 0x321   : > { %3071 = vst.msk [vmem:[%s3601_s16 + $0x47] sm:$0x1] %vm2642_vm7, %v3030_v30  ;;  %v3132_v41 = vld [vmem:[%s3601_s16 + $0x8] sm:$0xff] (%p3580_p5) }
 0x322   : > { %3072 = vst.msk [vmem:[%s3601_s16 + $0x4f] sm:$0x1] %vm2642_vm7, %v3054_v2  ;;  %v3134_v14 = vld [vmem:[%s3601_s16 + $0x10] sm:$0xff] (%p3580_p5) }
 0x323   : > { %3011 = vst.msk [vmem:[%s3601_s16 + $0x46] sm:$0x1] %vm2642_vm7, %v2970_v25  ;;  %v3136_v4 = vld [vmem:[%s3601_s16 + $0x18] sm:$0xff] (%p3580_p5) }
 0x324   : > { %3012 = vst.msk [vmem:[%s3601_s16 + $0x4e] sm:$0x1] %vm2642_vm7, %v2994_v9  ;;  %v3138_v52 = vld [vmem:[%s3601_s16 + $0x20] sm:$0xff] (%p3580_p5) }
 0x325   : > { %3131 = vst [vmem:[%s3083_s29] sm:$0xff] %v3130_v47  ;;  %v3140_v26 = vld [vmem:[%s3601_s16 + $0x28] sm:$0xff] }
 0x326   : > { %3133 = vst [vmem:[%s3083_s29 + $0x20] sm:$0xff] %v3132_v41  ;;  %v3142_v7 = vld [vmem:[%s3601_s16 + $0x30] sm:$0xff] }
 0x327   : > { %3135 = vst [vmem:[%s3083_s29 + $0x40] sm:$0xff] %v3134_v14  ;;  %v3144_v57 = vld [vmem:[%s3601_s16 + $0x38] sm:$0xff] }
 0x328   : > { %3137 = vst [vmem:[%s3083_s29 + $0x60] sm:$0xff] %v3136_v4 }
 0x329   : > { %3139 = vst [vmem:[%s3083_s29 + $0x80] sm:$0xff] %v3138_v52 }
 0x32a   : > { %3141 = vst [vmem:[%s3083_s29 + $0xa0] sm:$0xff] %v3140_v26  ;;  %v3146_v35 = vld [vmem:[%s3601_s16 + $0x40] sm:$0xff] }
 0x32b   : > { %3143 = vst [vmem:[%s3083_s29 + $0xc0] sm:$0xff] %v3142_v7  ;;  %v3148_v46 = vld [vmem:[%s3601_s16 + $0x48] sm:$0xff] }
 0x32c   : > { %3145 = vst [vmem:[%s3083_s29 + $0xe0] sm:$0xff] %v3144_v57 }
 0x32d   : > { %3147 = vst [vmem:[%s3083_s29 + $0x100] sm:$0xff] %v3146_v35 }
 0x32e   : > { %3149 = vst [vmem:[%s3083_s29 + $0x120] sm:$0xff] %v3148_v46 }
 0x32f PF: > { %s15_s24 = sadd.s32 1, %s3501_s24   ;;  %s5593_s18 = smov %s3481_s19 }
 0x330   : > { %p12_p11 = scmp.ge.s32.totalorder %s15_s24, 10   ;;  %s5594_s19 = smov %s3591_s8 }
 0x331   : > { %s5595_s20 = smov %s3493_s22  ;;  %s5596_s21 = smov %s3497_s23 }
 0x332   : > { %s5597_s22 = smov %s5600_s25  ;;  %s5598_s23 = smov %s5604_s26 }
 0x333   :  { %14 = sbr.rel (!%p12_p11) target bundleno = 4 (0x4), region = 115 }

</bundles_post_ra>
